<compile_context>
chip_gen: v7x
topology: tpu7x:2x2x1
jax: 0.10.0
libtpu: 0.0.40
codegen_flags: <defaults>
</compile_context>

<pallas_src>
import functools

import jax
import jax.numpy as jnp
from jax.experimental import pallas as pl
from jax.experimental.pallas import tpu as pltpu

LANE = 128  # TPU lane width


def _round_up(x, m):
    return ((x + m - 1) // m) * m


# --------------------------------------------------------------------------
# Kernel
# --------------------------------------------------------------------------
def autoencoder_kernel(x_ref,
                       w1, w2, w3, w4, w5, w6, w7, w8,   # padded bf16 weights
                       b_ref,                            # (8, max_fo) f32 biases
                       out_ref):
    """Fused forward: 8 x (bf16 MXU matmul, f32 accumulate) + bias, ReLU/Sigmoid."""
    biases = b_ref[...]          # (8, max_fo) f32 -- a few vregs, loaded once
    h = x_ref[...]               # (tile_m, in_pad) bf16

    def layer(h, w_ref, j, last=False):
        fo = w_ref.shape[1]
        y = jnp.dot(h, w_ref[...], preferred_element_type=jnp.float32)
        y = y + biases[j:j + 1, :fo]                     # f32 bias add (VPU)
        if last:
            return jax.nn.sigmoid(y)                     # f32 sigmoid (EUP)
        # ReLU in f32, store inter-layer activation in bf16 (halves spill bytes)
        return jnp.maximum(y, 0.0).astype(jnp.bfloat16)

    # encoder
    h = layer(h, w1, 0)
    h = layer(h, w2, 1)
    h = layer(h, w3, 2)
    h = layer(h, w4, 3)
    # decoder
    h = layer(h, w5, 4)
    h = layer(h, w6, 5)
    h = layer(h, w7, 6)
    h = layer(h, w8, 7, last=True)

    out_ref[...] = h.astype(out_ref.dtype)


# --------------------------------------------------------------------------
# Parameter init / one-time packing
# --------------------------------------------------------------------------
def init_params(key, n_inputs, encoding_dim, dtype=jnp.float32):
    """PyTorch nn.Linear-style init (uniform(-1/sqrt(in), 1/sqrt(in))).

    Weights returned as (in_features, out_features), biases as (1, out_features).
    """
    dims = [n_inputs, 512, 256, 128, encoding_dim, 128, 256, 512, n_inputs]
    params = []
    for i in range(len(dims) - 1):
        fan_in, fan_out = dims[i], dims[i + 1]
        key, kw, kb = jax.random.split(key, 3)
        bound = 1.0 / (fan_in ** 0.5)
        w = jax.random.uniform(kw, (fan_in, fan_out), dtype, minval=-bound, maxval=bound)
        b = jax.random.uniform(kb, (1, fan_out), dtype, minval=-bound, maxval=bound)
        params.append((w, b))
    return params


def pack_params(params):
    """One-time packing: lane-pad feature dims, weights -> bf16, biases -> one (8, max_fo) f32."""
    max_fo = max(_round_up(w.shape[1], LANE) for w, _ in params)
    weights = []
    biases = jnp.zeros((len(params), max_fo), jnp.float32)
    for idx, (w, b) in enumerate(params):
        fi, fo = w.shape
        fi_p, fo_p = _round_up(fi, LANE), _round_up(fo, LANE)
        w_p = jnp.zeros((fi_p, fo_p), jnp.bfloat16).at[:fi, :fo].set(w.astype(jnp.bfloat16))
        weights.append(w_p)
        biases = biases.at[idx, :fo].set(b.reshape(-1).astype(jnp.float32))
    return tuple(weights), biases


# --------------------------------------------------------------------------
# Jitted forward
# --------------------------------------------------------------------------
@functools.partial(jax.jit, static_argnames=("tile_m",))
def autoencoder_forward(x, weights, biases, *, tile_m=256):
    """Fused autoencoder forward. tile_m should be a multiple of 128 (256+ preferred)."""
    B, n_inputs = x.shape
    in_pad = weights[0].shape[0]
    out_pad = weights[-1].shape[1]

    # Cap the tile at the padded batch so small batches don't over-pad,
    # then pad the batch to a whole number of tiles.
    tile = min(tile_m, _round_up(max(B, 1), LANE))
    b_pad = _round_up(max(B, 1), tile)
    grid = (b_pad // tile,)

    # bf16 input: the first matmul consumes bf16 anyway; halves input DMA bytes.
    x_pad = jnp.zeros((b_pad, in_pad), jnp.bfloat16).at[:B, :n_inputs].set(
        x.astype(jnp.bfloat16))

    # Cost estimate: 8 GEMMs + one sigmoid per (padded) output element.
    flops = 2 * b_pad * sum(w.shape[0] * w.shape[1] for w in weights)
    bytes_accessed = (x_pad.size * 2 + b_pad * out_pad * 4
                      + sum(w.size * 2 for w in weights) + biases.size * 4)
    cost = pl.CostEstimate(flops=flops,
                           transcendentals=b_pad * out_pad,
                           bytes_accessed=bytes_accessed)

    const_map = lambda i: (0, 0)
    in_specs = [pl.BlockSpec((tile, in_pad), lambda i: (i, 0))]
    in_specs += [pl.BlockSpec(w.shape, const_map) for w in weights]
    in_specs += [pl.BlockSpec(biases.shape, const_map)]
    out_spec = pl.BlockSpec((tile, out_pad), lambda i: (i, 0))

    out = pl.pallas_call(
        autoencoder_kernel,
        out_shape=jax.ShapeDtypeStruct((b_pad, out_pad), jnp.float32),
        grid=grid,
        in_specs=in_specs,
        out_specs=out_spec,
        cost_estimate=cost,
        compiler_params=pltpu.CompilerParams(
            dimension_semantics=("parallel",)),
    )(x_pad, *weights, biases)

    return out[:B, :n_inputs].astype(x.dtype)


# --------------------------------------------------------------------------
# Pure-JAX reference
# --------------------------------------------------------------------------
def autoencoder_ref(x, params):
    """Pure-JAX f32 reference for correctness check."""
    h = x.astype(jnp.float32)
    n = len(params)
    for idx, (w, b) in enumerate(params):
        h = h @ w + b
        h = jnp.maximum(h, 0.0) if idx < n - 1 else jax.nn.sigmoid(h)
    return h.astype(x.dtype)


if __name__ == "__main__":
    n_inputs = 256
    encoding_dim = 32

    key = jax.random.PRNGKey(0)
    kx1, kx2, kp = jax.random.split(key, 3)

    params = init_params(kp, n_inputs, encoding_dim)
    weights, biases = pack_params(params)     # one-time packing (hoisted out of hot path)

    # Small demo batch (padded internally to one 128-row MXU tile).
    x_small = jax.random.uniform(kx1, (8, n_inputs), jnp.float32)
    out_small = jax.block_until_ready(autoencoder_forward(x_small, weights, biases))
    ref_small = autoencoder_ref(x_small, params)
    assert out_small.shape == x_small.shape
    # bf16 matmuls / bf16 activations (f32 accumulate) vs f32 reference.
    assert jnp.allclose(out_small, ref_small, atol=2e-2, rtol=2e-2), \
        "mismatch vs reference (small batch)"

    # Multi-tile batch: 512 rows -> tile_m=256, grid=2 (pipelining / v7x dual-TC).
    x_big = jax.random.uniform(kx2, (512, n_inputs), jnp.float32)
    out_big = jax.block_until_ready(autoencoder_forward(x_big, weights, biases))
    ref_big = autoencoder_ref(x_big, params)
    assert out_big.shape == x_big.shape
    assert jnp.allclose(out_big, ref_big, atol=2e-2, rtol=2e-2), \
        "mismatch vs reference (multi-tile batch)"

    print("KERNEL_OK")
</pallas_src>

<mosaic_0001>
module attributes {stable_mosaic.version = 11 : i64} {
  func.func @autoencoder_kernel(%arg0: i32, %arg1: memref<128x256xbf16, #tpu.memory_space<vmem>>, %arg2: memref<256x512xbf16, #tpu.memory_space<vmem>>, %arg3: memref<512x256xbf16, #tpu.memory_space<vmem>>, %arg4: memref<256x128xbf16, #tpu.memory_space<vmem>>, %arg5: memref<128x128xbf16, #tpu.memory_space<vmem>>, %arg6: memref<128x128xbf16, #tpu.memory_space<vmem>>, %arg7: memref<128x256xbf16, #tpu.memory_space<vmem>>, %arg8: memref<256x512xbf16, #tpu.memory_space<vmem>>, %arg9: memref<512x256xbf16, #tpu.memory_space<vmem>>, %arg10: memref<8x512xf32, #tpu.memory_space<vmem>>, %arg11: memref<128x256xf32, #tpu.memory_space<vmem>>) attributes {dimension_semantics = [#tpu.dimension_semantics<parallel>], iteration_bounds = array<i64: 1>, scalar_prefetch = 0 : i64, scratch_operands = 0 : i64, tpu.core_type = #tpu.core_type<tc>, window_params = [{transform_indices = @transform_0, window_bounds = array<i64: 128, 256>}, {pipeline_mode = #tpu.pipeline_mode<synchronous>, transform_indices = @transform_1, window_bounds = array<i64: 256, 512>}, {pipeline_mode = #tpu.pipeline_mode<synchronous>, transform_indices = @transform_2, window_bounds = array<i64: 512, 256>}, {pipeline_mode = #tpu.pipeline_mode<synchronous>, transform_indices = @transform_3, window_bounds = array<i64: 256, 128>}, {pipeline_mode = #tpu.pipeline_mode<synchronous>, transform_indices = @transform_4, window_bounds = array<i64: 128, 128>}, {pipeline_mode = #tpu.pipeline_mode<synchronous>, transform_indices = @transform_5, window_bounds = array<i64: 128, 128>}, {pipeline_mode = #tpu.pipeline_mode<synchronous>, transform_indices = @transform_6, window_bounds = array<i64: 128, 256>}, {pipeline_mode = #tpu.pipeline_mode<synchronous>, transform_indices = @transform_7, window_bounds = array<i64: 256, 512>}, {pipeline_mode = #tpu.pipeline_mode<synchronous>, transform_indices = @transform_8, window_bounds = array<i64: 512, 256>}, {pipeline_mode = #tpu.pipeline_mode<synchronous>, transform_indices = @transform_9, window_bounds = array<i64: 8, 512>}, {transform_indices = @transform_10, window_bounds = array<i64: 128, 256>}]} {
    %c0 = arith.constant 0 : index
    %c0_0 = arith.constant 0 : index
    %0 = vector.load %arg10[%c0, %c0_0] : memref<8x512xf32, #tpu.memory_space<vmem>>, vector<8x512xf32>
    %c0_1 = arith.constant 0 : index
    %c0_2 = arith.constant 0 : index
    %1 = vector.load %arg1[%c0_1, %c0_2] : memref<128x256xbf16, #tpu.memory_space<vmem>>, vector<128x256xbf16>
    %c0_3 = arith.constant 0 : index
    %c0_4 = arith.constant 0 : index
    %2 = vector.load %arg2[%c0_3, %c0_4] : memref<256x512xbf16, #tpu.memory_space<vmem>>, vector<256x512xbf16>
    %cst = arith.constant dense<0.000000e+00> : vector<128x512xf32>
    %3 = tpu.matmul %1, %2, %cst {dimension_numbers = #tpu.dot_dimension_numbers<[1], [0], [0], [1], [0, 0, 1, 1], [], []>} : vector<128x256xbf16>, vector<256x512xbf16>, vector<128x512xf32> -> vector<128x512xf32>
    %4 = vector.extract_strided_slice %0 {offsets = [0, 0], sizes = [1, 512], strides = [1, 1]} : vector<8x512xf32> to vector<1x512xf32>
    %5 = vector.broadcast %4 : vector<1x512xf32> to vector<128x512xf32>
    %6 = arith.addf %3, %5 : vector<128x512xf32>
    %cst_5 = arith.constant 0.000000e+00 : f32
    %7 = vector.broadcast %cst_5 : f32 to vector<128x512xf32>
    %8 = arith.maximumf %6, %7 : vector<128x512xf32>
    %9 = arith.truncf %8 : vector<128x512xf32> to vector<128x512xbf16>
    %c0_6 = arith.constant 0 : index
    %c0_7 = arith.constant 0 : index
    %10 = vector.load %arg3[%c0_6, %c0_7] : memref<512x256xbf16, #tpu.memory_space<vmem>>, vector<512x256xbf16>
    %cst_8 = arith.constant dense<0.000000e+00> : vector<128x256xf32>
    %11 = tpu.matmul %9, %10, %cst_8 {dimension_numbers = #tpu.dot_dimension_numbers<[1], [0], [0], [1], [0, 0, 1, 1], [], []>} : vector<128x512xbf16>, vector<512x256xbf16>, vector<128x256xf32> -> vector<128x256xf32>
    %12 = vector.extract_strided_slice %0 {offsets = [1, 0], sizes = [1, 256], strides = [1, 1]} : vector<8x512xf32> to vector<1x256xf32>
    %13 = vector.broadcast %12 : vector<1x256xf32> to vector<128x256xf32>
    %14 = arith.addf %11, %13 : vector<128x256xf32>
    %cst_9 = arith.constant 0.000000e+00 : f32
    %15 = vector.broadcast %cst_9 : f32 to vector<128x256xf32>
    %16 = arith.maximumf %14, %15 : vector<128x256xf32>
    %17 = arith.truncf %16 : vector<128x256xf32> to vector<128x256xbf16>
    %c0_10 = arith.constant 0 : index
    %c0_11 = arith.constant 0 : index
    %18 = vector.load %arg4[%c0_10, %c0_11] : memref<256x128xbf16, #tpu.memory_space<vmem>>, vector<256x128xbf16>
    %cst_12 = arith.constant dense<0.000000e+00> : vector<128x128xf32>
    %19 = tpu.matmul %17, %18, %cst_12 {dimension_numbers = #tpu.dot_dimension_numbers<[1], [0], [0], [1], [0, 0, 1, 1], [], []>} : vector<128x256xbf16>, vector<256x128xbf16>, vector<128x128xf32> -> vector<128x128xf32>
    %20 = vector.extract_strided_slice %0 {offsets = [2, 0], sizes = [1, 128], strides = [1, 1]} : vector<8x512xf32> to vector<1x128xf32>
    %21 = vector.broadcast %20 : vector<1x128xf32> to vector<128x128xf32>
    %22 = arith.addf %19, %21 : vector<128x128xf32>
    %cst_13 = arith.constant 0.000000e+00 : f32
    %23 = vector.broadcast %cst_13 : f32 to vector<128x128xf32>
    %24 = arith.maximumf %22, %23 : vector<128x128xf32>
    %25 = arith.truncf %24 : vector<128x128xf32> to vector<128x128xbf16>
    %c0_14 = arith.constant 0 : index
    %c0_15 = arith.constant 0 : index
    %26 = vector.load %arg5[%c0_14, %c0_15] : memref<128x128xbf16, #tpu.memory_space<vmem>>, vector<128x128xbf16>
    %cst_16 = arith.constant dense<0.000000e+00> : vector<128x128xf32>
    %27 = tpu.matmul %25, %26, %cst_16 {dimension_numbers = #tpu.dot_dimension_numbers<[1], [0], [0], [1], [0, 0, 1, 1], [], []>} : vector<128x128xbf16>, vector<128x128xbf16>, vector<128x128xf32> -> vector<128x128xf32>
    %28 = vector.extract_strided_slice %0 {offsets = [3, 0], sizes = [1, 128], strides = [1, 1]} : vector<8x512xf32> to vector<1x128xf32>
    %29 = vector.broadcast %28 : vector<1x128xf32> to vector<128x128xf32>
    %30 = arith.addf %27, %29 : vector<128x128xf32>
    %cst_17 = arith.constant 0.000000e+00 : f32
    %31 = vector.broadcast %cst_17 : f32 to vector<128x128xf32>
    %32 = arith.maximumf %30, %31 : vector<128x128xf32>
    %33 = arith.truncf %32 : vector<128x128xf32> to vector<128x128xbf16>
    %c0_18 = arith.constant 0 : index
    %c0_19 = arith.constant 0 : index
    %34 = vector.load %arg6[%c0_18, %c0_19] : memref<128x128xbf16, #tpu.memory_space<vmem>>, vector<128x128xbf16>
    %cst_20 = arith.constant dense<0.000000e+00> : vector<128x128xf32>
    %35 = tpu.matmul %33, %34, %cst_20 {dimension_numbers = #tpu.dot_dimension_numbers<[1], [0], [0], [1], [0, 0, 1, 1], [], []>} : vector<128x128xbf16>, vector<128x128xbf16>, vector<128x128xf32> -> vector<128x128xf32>
    %36 = vector.extract_strided_slice %0 {offsets = [4, 0], sizes = [1, 128], strides = [1, 1]} : vector<8x512xf32> to vector<1x128xf32>
    %37 = vector.broadcast %36 : vector<1x128xf32> to vector<128x128xf32>
    %38 = arith.addf %35, %37 : vector<128x128xf32>
    %cst_21 = arith.constant 0.000000e+00 : f32
    %39 = vector.broadcast %cst_21 : f32 to vector<128x128xf32>
    %40 = arith.maximumf %38, %39 : vector<128x128xf32>
    %41 = arith.truncf %40 : vector<128x128xf32> to vector<128x128xbf16>
    %c0_22 = arith.constant 0 : index
    %c0_23 = arith.constant 0 : index
    %42 = vector.load %arg7[%c0_22, %c0_23] : memref<128x256xbf16, #tpu.memory_space<vmem>>, vector<128x256xbf16>
    %cst_24 = arith.constant dense<0.000000e+00> : vector<128x256xf32>
    %43 = tpu.matmul %41, %42, %cst_24 {dimension_numbers = #tpu.dot_dimension_numbers<[1], [0], [0], [1], [0, 0, 1, 1], [], []>} : vector<128x128xbf16>, vector<128x256xbf16>, vector<128x256xf32> -> vector<128x256xf32>
    %44 = vector.extract_strided_slice %0 {offsets = [5, 0], sizes = [1, 256], strides = [1, 1]} : vector<8x512xf32> to vector<1x256xf32>
    %45 = vector.broadcast %44 : vector<1x256xf32> to vector<128x256xf32>
    %46 = arith.addf %43, %45 : vector<128x256xf32>
    %cst_25 = arith.constant 0.000000e+00 : f32
    %47 = vector.broadcast %cst_25 : f32 to vector<128x256xf32>
    %48 = arith.maximumf %46, %47 : vector<128x256xf32>
    %49 = arith.truncf %48 : vector<128x256xf32> to vector<128x256xbf16>
    %c0_26 = arith.constant 0 : index
    %c0_27 = arith.constant 0 : index
    %50 = vector.load %arg8[%c0_26, %c0_27] : memref<256x512xbf16, #tpu.memory_space<vmem>>, vector<256x512xbf16>
    %cst_28 = arith.constant dense<0.000000e+00> : vector<128x512xf32>
    %51 = tpu.matmul %49, %50, %cst_28 {dimension_numbers = #tpu.dot_dimension_numbers<[1], [0], [0], [1], [0, 0, 1, 1], [], []>} : vector<128x256xbf16>, vector<256x512xbf16>, vector<128x512xf32> -> vector<128x512xf32>
    %52 = vector.extract_strided_slice %0 {offsets = [6, 0], sizes = [1, 512], strides = [1, 1]} : vector<8x512xf32> to vector<1x512xf32>
    %53 = vector.broadcast %52 : vector<1x512xf32> to vector<128x512xf32>
    %54 = arith.addf %51, %53 : vector<128x512xf32>
    %cst_29 = arith.constant 0.000000e+00 : f32
    %55 = vector.broadcast %cst_29 : f32 to vector<128x512xf32>
    %56 = arith.maximumf %54, %55 : vector<128x512xf32>
    %57 = arith.truncf %56 : vector<128x512xf32> to vector<128x512xbf16>
    %c0_30 = arith.constant 0 : index
    %c0_31 = arith.constant 0 : index
    %58 = vector.load %arg9[%c0_30, %c0_31] : memref<512x256xbf16, #tpu.memory_space<vmem>>, vector<512x256xbf16>
    %cst_32 = arith.constant dense<0.000000e+00> : vector<128x256xf32>
    %59 = tpu.matmul %57, %58, %cst_32 {dimension_numbers = #tpu.dot_dimension_numbers<[1], [0], [0], [1], [0, 0, 1, 1], [], []>} : vector<128x512xbf16>, vector<512x256xbf16>, vector<128x256xf32> -> vector<128x256xf32>
    %60 = vector.extract_strided_slice %0 {offsets = [7, 0], sizes = [1, 256], strides = [1, 1]} : vector<8x512xf32> to vector<1x256xf32>
    %61 = vector.broadcast %60 : vector<1x256xf32> to vector<128x256xf32>
    %62 = arith.addf %59, %61 : vector<128x256xf32>
    %63 = arith.negf %62 : vector<128x256xf32>
    %64 = math.exp %63 : vector<128x256xf32>
    %cst_33 = arith.constant 1.000000e+00 : f32
    %65 = vector.broadcast %cst_33 : f32 to vector<128x256xf32>
    %66 = arith.addf %65, %64 : vector<128x256xf32>
    %67 = arith.divf %65, %66 : vector<128x256xf32>
    %c0_34 = arith.constant 0 : index
    %c0_35 = arith.constant 0 : index
    %68 = vector.load %arg11[%c0_34, %c0_35] : memref<128x256xf32, #tpu.memory_space<vmem>>, vector<128x256xf32>
    tpu.vector_store %arg11[%c0_34, %c0_35], %67 {strides = array<i32>} : memref<128x256xf32, #tpu.memory_space<vmem>>, vector<128x256xf32>,
    return
  }
  func.func @transform_0(%arg0: i32) -> (i32, i32) {
    %c0_i32 = arith.constant 0 : i32
    %c0_i32_0 = arith.constant 0 : i32
    return %arg0, %c0_i32 : i32, i32
  }
  func.func @transform_1(%arg0: i32) -> (i32, i32) {
    %c0_i32 = arith.constant 0 : i32
    %c0_i32_0 = arith.constant 0 : i32
    %c0_i32_1 = arith.constant 0 : i32
    return %c0_i32, %c0_i32_0 : i32, i32
  }
  func.func @transform_2(%arg0: i32) -> (i32, i32) {
    %c0_i32 = arith.constant 0 : i32
    %c0_i32_0 = arith.constant 0 : i32
    %c0_i32_1 = arith.constant 0 : i32
    return %c0_i32, %c0_i32_0 : i32, i32
  }
  func.func @transform_3(%arg0: i32) -> (i32, i32) {
    %c0_i32 = arith.constant 0 : i32
    %c0_i32_0 = arith.constant 0 : i32
    %c0_i32_1 = arith.constant 0 : i32
    return %c0_i32, %c0_i32_0 : i32, i32
  }
  func.func @transform_4(%arg0: i32) -> (i32, i32) {
    %c0_i32 = arith.constant 0 : i32
    %c0_i32_0 = arith.constant 0 : i32
    %c0_i32_1 = arith.constant 0 : i32
    return %c0_i32, %c0_i32_0 : i32, i32
  }
  func.func @transform_5(%arg0: i32) -> (i32, i32) {
    %c0_i32 = arith.constant 0 : i32
    %c0_i32_0 = arith.constant 0 : i32
    %c0_i32_1 = arith.constant 0 : i32
    return %c0_i32, %c0_i32_0 : i32, i32
  }
  func.func @transform_6(%arg0: i32) -> (i32, i32) {
    %c0_i32 = arith.constant 0 : i32
    %c0_i32_0 = arith.constant 0 : i32
    %c0_i32_1 = arith.constant 0 : i32
    return %c0_i32, %c0_i32_0 : i32, i32
  }
  func.func @transform_7(%arg0: i32) -> (i32, i32) {
    %c0_i32 = arith.constant 0 : i32
    %c0_i32_0 = arith.constant 0 : i32
    %c0_i32_1 = arith.constant 0 : i32
    return %c0_i32, %c0_i32_0 : i32, i32
  }
  func.func @transform_8(%arg0: i32) -> (i32, i32) {
    %c0_i32 = arith.constant 0 : i32
    %c0_i32_0 = arith.constant 0 : i32
    %c0_i32_1 = arith.constant 0 : i32
    return %c0_i32, %c0_i32_0 : i32, i32
  }
  func.func @transform_9(%arg0: i32) -> (i32, i32) {
    %c0_i32 = arith.constant 0 : i32
    %c0_i32_0 = arith.constant 0 : i32
    %c0_i32_1 = arith.constant 0 : i32
    return %c0_i32, %c0_i32_0 : i32, i32
  }
  func.func @transform_10(%arg0: i32) -> (i32, i32) {
    %c0_i32 = arith.constant 0 : i32
    %c0_i32_0 = arith.constant 0 : i32
    return %arg0, %c0_i32 : i32, i32
  }
}

</mosaic_0001>

<bundles_post_ra>
// kernel: autoencoder_forward.1
= control target key start
LH: loop header
LB: loop body
LE: loop exit
PB: predicated region body
PF: predicated region fallthrough
CT: control target
= control target key end

     0   :  { %15 = vsyncpa [#allocation3], 0  ;;  %s6426_s0 = inlined_call_operand.vmem [shape: bf16[128,256], index: 0, kind: input, shape index: {}]   ;;  %s6427_s1 = inlined_call_operand.hbm [shape: bf16[256,512], index: 1, kind: input, shape index: {}]   ;;  %s6428_s2 = inlined_call_operand.hbm [shape: bf16[512,256], index: 2, kind: input, shape index: {}]   ;;  %s6429_s3 = inlined_call_operand.vmem [shape: bf16[256,128], index: 3, kind: input, shape index: {}]   ;;  %s6430_s4 = inlined_call_operand.hbm [shape: bf16[128,128], index: 4, kind: input, shape index: {}]   ;;  %s6431_s5 = inlined_call_operand.hbm [shape: bf16[128,128], index: 5, kind: input, shape index: {}]   ;;  %s6432_s6 = inlined_call_operand.hbm [shape: bf16[128,256], index: 6, kind: input, shape index: {}]   ;;  %s6433_s7 = inlined_call_operand.hbm [shape: bf16[256,512], index: 7, kind: input, shape index: {}]   ;;  %s6434_s8 = inlined_call_operand.hbm [shape: bf16[512,256], index: 8, kind: input, shape index: {}]   ;;  %s6435_s9 = inlined_call_operand.vmem [shape: f32[8,512], index: 9, kind: input, shape index: {}]   ;;  %s6436_s10 = inlined_call_operand.vmem [shape: f32[128,256], index: 10, kind: output, shape index: {}]  }
   0x1   :  { %16 = vsyncpa [#allocation5], 0 }
   0x2   :  { %17 = vsyncpa [#allocation8], 0 }
   0x3   :  { %18 = vsyncpa [#allocation11], 0  ;;  %s5533_s13 = smov [#allocation4]   ;;  %s5371_s17 = scalar_lea.hbm %s6428_s2, 8192 }
   0x4   :  { %s38_s14 = sshll.u32 %s5533_s13, 4  ;;  %p5372_p0 = scmp.ne.s32.totalorder %s6428_s2, %s5371_s17  ;;  %s39_s14 = int_to_ptr.vmem [resolvable:$true] %s38_s14 }
   0x5   :  { %p5375_p1 = scmp.lt.u32.totalorder %s5371_s17, %s6428_s2 }
   0x7   :  { %p5377_p2 = pnand %p5375_p1, %p5372_p0 }
   0x9   :  { %5380 = shalt.err (!%p5377_p2)
}
   0xa   :  { %s5381_s22 = scalar_lea.vmem %s39_s14, 8192  ;;  %p5386_p4 = scmp.lt.s32.totalorder %s39_s14, %s39_s14 }
   0xb   :  { %p5382_p3 = scmp.ne.s32.totalorder %s39_s14, %s5381_s22  ;;  %p5387_p5 = scmp.lt.s32.totalorder %s5381_s22, %s5381_s22 }
   0xd   :  { %p5388_p6 = por %p5387_p5, %p5386_p4 }
   0xf   :  { %p5389_p7 = pnand %p5388_p6, %p5382_p3 }
  0x11   :  { %5392 = shalt.err (!%p5389_p7)
}
  0x12   :  { %s5534_s23 = smov 128   ;;  %s5535_s24 = smov 8  }
  0x13   :  { %44 = dma.hbm_to_vmem [thread:$0]  %s6428_s2, 8192, %s39_s14, [#allocation5], %s5534_s23, %s5534_s23, %s5535_s24  }
  0x14   :  { %s5536_s27 = smov [#allocation7]   ;;  %s5393_s11 = scalar_lea.hbm %s6431_s5, 1024 }
  0x15   :  { %s64_s28 = sshll.u32 %s5536_s27, 4  ;;  %p5394_p8 = scmp.ne.s32.totalorder %s6431_s5, %s5393_s11  ;;  %s65_s28 = int_to_ptr.vmem [resolvable:$true] %s64_s28 }
  0x16   :  { %p5397_p9 = scmp.lt.u32.totalorder %s5393_s11, %s6431_s5 }
  0x18   :  { %p5399_p10 = pnand %p5397_p9, %p5394_p8 }
  0x1a   :  { %5402 = shalt.err (!%p5399_p10)
}
  0x1b   :  { %s5403_s17 = scalar_lea.vmem %s65_s28, 1024  ;;  %p5408_p12 = scmp.lt.s32.totalorder %s65_s28, %s65_s28 }
  0x1c   :  { %p5404_p11 = scmp.ne.s32.totalorder %s65_s28, %s5403_s17  ;;  %p5409_p13 = scmp.lt.s32.totalorder %s5403_s17, %s5403_s17 }
  0x1e   :  { %p5410_p0 = por %p5409_p13, %p5408_p12 }
  0x20   :  { %p5411_p1 = pnand %p5410_p0, %p5404_p11 }
  0x22   :  { %5414 = shalt.err (!%p5411_p1)
}
  0x23   :  { %s5537_s2 = smov 64   ;;  %s5538_s14 = smov 4  }
  0x24   :  { %70 = dma.hbm_to_vmem [thread:$0]  %s6431_s5, 1024, %s65_s28, [#allocation8], %s5537_s2, %s5537_s2, %s5538_s14  }
  0x25   :  { %s5539_s20 = smov [#allocation10]   ;;  %s5540_s22 = smov [#allocation2]  }
  0x26   :  { %s88_s21 = sshll.u32 %s5539_s20, 4  ;;  %s26_s25 = sshll.u32 %s5540_s22, 4  ;;  %s89_s21 = int_to_ptr.vmem [resolvable:$true] %s88_s21  ;;  %s5632_s25 = int_to_ptr.vmem [resolvable:$true] %s26_s25 }
  0x27   :  { %s5415_s29 = scalar_lea.hbm %s6433_s7, 8192 }
  0x28   :  { %p5416_p2 = scmp.ne.s32.totalorder %s6433_s7, %s5415_s29  ;;  %p5419_p3 = scmp.lt.u32.totalorder %s5415_s29, %s6433_s7 }
  0x2a   :  { %p5421_p4 = pnand %p5419_p3, %p5416_p2 }
  0x2c   :  { %5424 = shalt.err (!%p5421_p4)
}
  0x2d   :  { %s5425_s5 = scalar_lea.vmem %s89_s21, 8192  ;;  %p5430_p6 = scmp.lt.s32.totalorder %s89_s21, %s89_s21 }
  0x2e   :  { %p5426_p5 = scmp.ne.s32.totalorder %s89_s21, %s5425_s5  ;;  %p5431_p7 = scmp.lt.s32.totalorder %s5425_s5, %s5425_s5 }
  0x30   :  { %p5432_p8 = por %p5431_p7, %p5430_p6 }
  0x32   :  { %p5433_p9 = pnand %p5432_p8, %p5426_p5 }
  0x34   :  { %5436 = shalt.err (!%p5433_p9)
}
  0x35   :  { %s5541_s28 = smov 256   ;;  %s5542_s15 = smov 16  }
  0x36   :  { %94 = dma.hbm_to_vmem [thread:$0]  %s6433_s7, 8192, %s89_s21, [#allocation11], %s5541_s28, %s5541_s28, %s5542_s15  }
  0x37   :  { %s5437_s20 = scalar_lea.hbm %s6427_s1, 8192 }
  0x38   :  { %p5438_p10 = scmp.ne.s32.totalorder %s6427_s1, %s5437_s20  ;;  %p5441_p11 = scmp.lt.u32.totalorder %s5437_s20, %s6427_s1 }
  0x3a   :  { %p5443_p12 = pnand %p5441_p11, %p5438_p10 }
  0x3c   :  { %5446 = shalt.err (!%p5443_p12)
}
  0x3d   :  { %s5447_s30 = scalar_lea.vmem %s5632_s25, 8192  ;;  %p5452_p0 = scmp.lt.s32.totalorder %s5632_s25, %s5632_s25 }
  0x3e   :  { %p5448_p13 = scmp.ne.s32.totalorder %s5632_s25, %s5447_s30  ;;  %p5453_p1 = scmp.lt.s32.totalorder %s5447_s30, %s5447_s30 }
  0x40   :  { %p5454_p2 = por %p5453_p1, %p5452_p0 }
  0x42   :  { %p5455_p3 = pnand %p5454_p2, %p5448_p13 }
  0x44   :  { %5458 = shalt.err (!%p5455_p3)
}
  0x45   :  { %32 = dma.hbm_to_vmem [thread:$0]  %s6427_s1, 8192, %s5632_s25, [#allocation3], %s5541_s28, %s5541_s28, %s5542_s15  }
  0x46   :  { %s5543_s11 = smov [#allocation6]   ;;  %s5544_s13 = smov [#allocation9]  }
  0x47   :  { %s52_s12 = sshll.u32 %s5543_s11, 4  ;;  %s76_s5 = sshll.u32 %s5544_s13, 4  ;;  %s53_s12 = int_to_ptr.vmem [resolvable:$true] %s52_s12  ;;  %s5663_s5 = int_to_ptr.vmem [resolvable:$true] %s76_s5 }
  0x48   :  { %s5459_s18 = scalar_lea.hbm %s6430_s4, 1024 }
  0x49   :  { %p5460_p4 = scmp.ne.s32.totalorder %s6430_s4, %s5459_s18  ;;  %p5463_p5 = scmp.lt.u32.totalorder %s5459_s18, %s6430_s4 }
  0x4b   :  { %p5465_p6 = pnand %p5463_p5, %p5460_p4 }
  0x4d   :  { %5468 = shalt.err (!%p5465_p6)
}
  0x4e   :  { %s5469_s1 = scalar_lea.vmem %s53_s12, 1024  ;;  %p5474_p8 = scmp.lt.s32.totalorder %s53_s12, %s53_s12 }
  0x4f   :  { %p5470_p7 = scmp.ne.s32.totalorder %s53_s12, %s5469_s1  ;;  %p5475_p9 = scmp.lt.s32.totalorder %s5469_s1, %s5469_s1 }
  0x51   :  { %p5476_p10 = por %p5475_p9, %p5474_p8 }
  0x53   :  { %p5477_p11 = pnand %p5476_p10, %p5470_p7 }
  0x55   :  { %5480 = shalt.err (!%p5477_p11)
}
  0x56   :  { %58 = dma.hbm_to_vmem [thread:$0]  %s6430_s4, 1024, %s53_s12, [#allocation5], %s5537_s2, %s5537_s2, %s5538_s14  }
  0x57   :  { %s5481_s29 = scalar_lea.hbm %s6432_s6, 2048 }
  0x58   :  { %p5482_p12 = scmp.ne.s32.totalorder %s6432_s6, %s5481_s29  ;;  %p5485_p13 = scmp.lt.u32.totalorder %s5481_s29, %s6432_s6 }
  0x5a   :  { %p5487_p0 = pnand %p5485_p13, %p5482_p12 }
  0x5c   :  { %5490 = shalt.err (!%p5487_p0)
}
  0x5d   :  { %s5491_s13 = scalar_lea.vmem %s5663_s5, 2048  ;;  %p5496_p2 = scmp.lt.s32.totalorder %s5663_s5, %s5663_s5 }
  0x5e   :  { %p5492_p1 = scmp.ne.s32.totalorder %s5663_s5, %s5491_s13  ;;  %p5497_p3 = scmp.lt.s32.totalorder %s5491_s13, %s5491_s13 }
  0x60   :  { %p5498_p4 = por %p5497_p3, %p5496_p2 }
  0x62   :  { %p5499_p5 = pnand %p5498_p4, %p5492_p1 }
  0x64   :  { %5502 = shalt.err (!%p5499_p5)
}
  0x65   :  { %82 = dma.hbm_to_vmem [thread:$0]  %s6432_s6, 2048, %s5663_s5, [#allocation8], %s5534_s23, %s5534_s23, %s5535_s24  }
  0x66   :  { %s5545_s14 = smov [#allocation12]   ;;  %s5503_s18 = scalar_lea.hbm %s6434_s8, 8192 }
  0x67   :  { %s100_s12 = sshll.u32 %s5545_s14, 4  ;;  %p5504_p6 = scmp.ne.s32.totalorder %s6434_s8, %s5503_s18  ;;  %s101_s12 = int_to_ptr.vmem [resolvable:$true] %s100_s12 }
  0x68   :  { %p5507_p7 = scmp.lt.u32.totalorder %s5503_s18, %s6434_s8 }
  0x6a   :  { %p5509_p8 = pnand %p5507_p7, %p5504_p6 }
  0x6c   :  { %5512 = shalt.err (!%p5509_p8)
}
  0x6d   :  { %s5513_s1 = scalar_lea.vmem %s101_s12, 8192  ;;  %p5518_p10 = scmp.lt.s32.totalorder %s101_s12, %s101_s12 }
  0x6e   :  { %p5514_p9 = scmp.ne.s32.totalorder %s101_s12, %s5513_s1  ;;  %p5519_p11 = scmp.lt.s32.totalorder %s5513_s1, %s5513_s1 }
  0x70   :  { %p5520_p12 = por %p5519_p11, %p5518_p10 }
  0x72   :  { %p5521_p13 = pnand %p5520_p12, %p5514_p9 }
  0x74   :  { %5524 = shalt.err (!%p5521_p13)
}
  0x75   :  { %106 = dma.hbm_to_vmem [thread:$0]  %s6434_s8, 8192, %s101_s12, [#allocation11], %s5534_s23, %s5534_s23, %s5535_s24  }
  0x76   :  { %5525 = dma.done.wait [#allocation3], 8192  }
  0x77   :  { %5526 = vsyncadd [#allocation3], 4294959104 }
  0x78   :  { %5527 = dma.done.wait [#allocation5], 9216  }
  0x79   :  { %5528 = vsyncadd [#allocation5], 4294958080 }
  0x7a   :  { %5529 = dma.done.wait [#allocation8], 3072  }
  0x7b   :  { %5530 = vsyncadd [#allocation8], 4294964224 }
  0x7c   :  { %5531 = dma.done.wait [#allocation11], 16384  }
  0x7d   :  { %5532 = vsyncadd [#allocation11], 4294950912  ;;  %v4773_v0 = vld [vmem:[#allocation2 + $0x4] ss:$16 sps:$4 sm:$0xff]   ;;  %v4775_v1 = vld [vmem:[#allocation2] ss:$16 sps:$4 sm:$0xff]  }
  0x7e   :  { %631 = vmatprep.subr.bf16.mxu0 %v4773_v0  ;;  %v4776_v2 = vld [vmem:[#allocation2 + $0x24] ss:$16 sps:$4 sm:$0xff]   ;;  %v4778_v3 = vld [vmem:[#allocation2 + $0x20] ss:$16 sps:$4 sm:$0xff]   ;;  %v4821_v14 = vld [vmem:[#allocation2 + $0xc] ss:$16 sps:$4 sm:$0xff]  }
  0x7f   :  { %632 = vmatpush1.bf16.msra.mxu0 %v4775_v1  ;;  %v4779_v4 = vld [vmem:[#allocation2 + $0x44] ss:$16 sps:$4 sm:$0xff]   ;;  %v4781_v5 = vld [vmem:[#allocation2 + $0x40] ss:$16 sps:$4 sm:$0xff]   ;;  %v4823_v15 = vld [vmem:[#allocation2 + $0x8] ss:$16 sps:$4 sm:$0xff]   ;;  %744 = vmatprep.subr.bf16.mxu1 %v4821_v14 }
  0x80   :  { %633 = vmatprep.subr.bf16.mxu0 %v4776_v2  ;;  %v4782_v6 = vld [vmem:[#allocation2 + $0x64] ss:$16 sps:$4 sm:$0xff]   ;;  %v4784_v7 = vld [vmem:[#allocation2 + $0x60] ss:$16 sps:$4 sm:$0xff]   ;;  %v4827_v18 = vld [vmem:[#allocation2 + $0x2c] ss:$16 sps:$4 sm:$0xff]   ;;  %745 = vmatpush1.bf16.msra.mxu1 %v4823_v15 }
  0x81   :  { %v4785_v8 = vld [vmem:[#allocation2 + $0x84] ss:$16 sps:$4 sm:$0xff]   ;;  %v4787_v9 = vld [vmem:[#allocation2 + $0x80] ss:$16 sps:$4 sm:$0xff]   ;;  %v4829_v19 = vld [vmem:[#allocation2 + $0x28] ss:$16 sps:$4 sm:$0xff]   ;;  %746 = vmatprep.subr.bf16.mxu1 %v4827_v18 }
  0x82   :  { %v4788_v10 = vld [vmem:[#allocation2 + $0xa4] ss:$16 sps:$4 sm:$0xff]   ;;  %v4790_v11 = vld [vmem:[#allocation2 + $0xa0] ss:$16 sps:$4 sm:$0xff]   ;;  %v4830_v20 = vld [vmem:[#allocation2 + $0x4c] ss:$16 sps:$4 sm:$0xff]  }
  0x83   :  { %634 = vmatpush1.bf16.msra.mxu0 %v4778_v3  ;;  %v4791_v12 = vld [vmem:[#allocation2 + $0xc4] ss:$16 sps:$4 sm:$0xff]   ;;  %v4793_v13 = vld [vmem:[#allocation2 + $0xc0] ss:$16 sps:$4 sm:$0xff]   ;;  %v4832_v23 = vld [vmem:[#allocation2 + $0x48] ss:$16 sps:$4 sm:$0xff]  }
  0x84   :  { %635 = vmatprep.subr.bf16.mxu0 %v4779_v4  ;;  %v4794_v16 = vld [vmem:[#allocation2 + $0xe4] ss:$16 sps:$4 sm:$0xff]   ;;  %v4796_v21 = vld [vmem:[#allocation2 + $0xe0] ss:$16 sps:$4 sm:$0xff]   ;;  %747 = vmatpush1.bf16.msra.mxu1 %v4829_v19  ;;  %v4836_v24 = vld [vmem:[#allocation2 + $0x6c] ss:$16 sps:$4 sm:$0xff]  }
  0x85   :  { %v4826_v17 = vld [vmem:[%s6426_s0 + $0x4] ss:$8 sps:$4 sm:$0xff]   ;;  %748 = vmatprep.subr.bf16.mxu1 %v4830_v20  ;;  %v4799_v25 = vld [vmem:[#allocation2 + $0x100] ss:$16 sps:$4 sm:$0xff]   ;;  %v4838_v27 = vld [vmem:[#allocation2 + $0x68] ss:$16 sps:$4 sm:$0xff]  }
  0x86   :  { %663 = vmatprep.mubr.bf16.mxu0 %v4826_v17  ;;  %776 = vmatprep.mubr.bf16.mxu1 %v4826_v17  ;;  %v4797_v22 = vld [vmem:[#allocation2 + $0x104] ss:$16 sps:$4 sm:$0xff]   ;;  %v4839_v28 = vld [vmem:[#allocation2 + $0x8c] ss:$16 sps:$4 sm:$0xff]   ;;  %v4802_v29 = vld [vmem:[#allocation2 + $0x120] ss:$16 sps:$4 sm:$0xff]  }
  0x87   :  { %636 = vmatpush1.bf16.msra.mxu0 %v4781_v5  ;;  %v4800_v26 = vld [vmem:[#allocation2 + $0x124] ss:$16 sps:$4 sm:$0xff]   ;;  %v4841_v31 = vld [vmem:[#allocation2 + $0x88] ss:$16 sps:$4 sm:$0xff]   ;;  %v4845_v32 = vld [vmem:[#allocation2 + $0xac] ss:$16 sps:$4 sm:$0xff]  }
  0x88   :  { %637 = vmatprep.subr.bf16.mxu0 %v4782_v6  ;;  %749 = vmatpush1.bf16.msra.mxu1 %v4832_v23  ;;  %v4803_v30 = vld [vmem:[#allocation2 + $0x144] ss:$16 sps:$4 sm:$0xff]   ;;  %v4805_v33 = vld [vmem:[#allocation2 + $0x140] ss:$16 sps:$4 sm:$0xff]   ;;  %v4847_v35 = vld [vmem:[#allocation2 + $0xa8] ss:$16 sps:$4 sm:$0xff]  }
  0x89   :  { %750 = vmatprep.subr.bf16.mxu1 %v4836_v24  ;;  %v4806_v34 = vld [vmem:[#allocation2 + $0x164] ss:$16 sps:$4 sm:$0xff]   ;;  %v4848_v36 = vld [vmem:[#allocation2 + $0xcc] ss:$16 sps:$4 sm:$0xff]   ;;  %v4808_v37 = vld [vmem:[#allocation2 + $0x160] ss:$16 sps:$4 sm:$0xff]  }
  0x8a   :  { %v4809_v38 = vld [vmem:[#allocation2 + $0x184] ss:$16 sps:$4 sm:$0xff]   ;;  %v4850_v39 = vld [vmem:[#allocation2 + $0xc8] ss:$16 sps:$4 sm:$0xff]   ;;  %v4854_v40 = vld [vmem:[#allocation2 + $0xec] ss:$16 sps:$4 sm:$0xff]  }
  0x8b   :  { %638 = vmatpush1.bf16.msra.mxu0 %v4784_v7  ;;  %v4811_v41 = vld [vmem:[#allocation2 + $0x180] ss:$16 sps:$4 sm:$0xff]   ;;  %v4812_v42 = vld [vmem:[#allocation2 + $0x1a4] ss:$16 sps:$4 sm:$0xff]   ;;  %v4856_v43 = vld [vmem:[#allocation2 + $0xe8] ss:$16 sps:$4 sm:$0xff]  }
  0x8c   :  { %639 = vmatprep.subr.bf16.mxu0 %v4785_v8  ;;  %751 = vmatpush1.bf16.msra.mxu1 %v4838_v27  ;;  %v4857_v44 = vld [vmem:[#allocation2 + $0x10c] ss:$16 sps:$4 sm:$0xff]   ;;  %v4814_v45 = vld [vmem:[#allocation2 + $0x1a0] ss:$16 sps:$4 sm:$0xff]   ;;  %v4815_v46 = vld [vmem:[#allocation2 + $0x1c4] ss:$16 sps:$4 sm:$0xff]  }
  0x8d   :  { %752 = vmatprep.subr.bf16.mxu1 %v4839_v28  ;;  %v4859_v47 = vld [vmem:[#allocation2 + $0x108] ss:$16 sps:$4 sm:$0xff]   ;;  %v4863_v48 = vld [vmem:[#allocation2 + $0x12c] ss:$16 sps:$4 sm:$0xff]   ;;  %v4817_v49 = vld [vmem:[#allocation2 + $0x1c0] ss:$16 sps:$4 sm:$0xff]  }
  0x8e   :  { %v4818_v50 = vld [vmem:[#allocation2 + $0x1e4] ss:$16 sps:$4 sm:$0xff]   ;;  %v4865_v51 = vld [vmem:[#allocation2 + $0x128] ss:$16 sps:$4 sm:$0xff]   ;;  %v4866_v52 = vld [vmem:[#allocation2 + $0x14c] ss:$16 sps:$4 sm:$0xff]  }
  0x8f   :  { %640 = vmatpush1.bf16.msra.mxu0 %v4787_v9  ;;  %v4820_v53 = vld [vmem:[#allocation2 + $0x1e0] ss:$16 sps:$4 sm:$0xff]   ;;  %v4895_v54 = vld [vmem:[#allocation4 + $0x4] ss:$8 sps:$4 sm:$0xff]   ;;  %v4868_v55 = vld [vmem:[#allocation2 + $0x148] ss:$16 sps:$4 sm:$0xff]  }
  0x90   :  { %641 = vmatprep.subr.bf16.mxu0 %v4788_v10  ;;  %753 = vmatpush1.bf16.msra.mxu1 %v4841_v31  ;;  %v4824_v56 = vld [vmem:[%s6426_s0] ss:$8 sps:$4 sm:$0xff]   ;;  %v4872_v57 = vld [vmem:[#allocation2 + $0x16c] ss:$16 sps:$4 sm:$0xff]   ;;  %v4896_v63 = vld [vmem:[#allocation4 + $0x10] ss:$8 sps:$4 sm:$0xff]  }
  0x91   :  { %754 = vmatprep.subr.bf16.mxu1 %v4845_v32  ;;  %v4833_v58 = vld [vmem:[%s6426_s0 + $0x14] ss:$8 sps:$4 sm:$0xff]   ;;  %v4893_v59 = vld [vmem:[#allocation4] ss:$8 sps:$4 sm:$0xff]   ;;  %v4835_v0 = vld [vmem:[%s6426_s0 + $0x10] ss:$8 sps:$4 sm:$0xff]  }
  0x92   :  { %v4898_v60 = vld [vmem:[#allocation4 + $0x14] ss:$8 sps:$4 sm:$0xff]   ;;  %v4874_v61 = vld [vmem:[#allocation2 + $0x168] ss:$16 sps:$4 sm:$0xff]   ;;  %v4901_v1 = vld [vmem:[#allocation4 + $0x24] ss:$8 sps:$4 sm:$0xff]  }
  0x93   :  { %642 = vmatpush1.bf16.msra.mxu0 %v4790_v11  ;;  %v4875_v62 = vld [vmem:[#allocation2 + $0x18c] ss:$16 sps:$4 sm:$0xff]   ;;  %v4877_v2 = vld [vmem:[#allocation2 + $0x188] ss:$16 sps:$4 sm:$0xff]  }
  0x94   :  { %643 = vmatprep.subr.bf16.mxu0 %v4791_v12  ;;  %755 = vmatpush1.bf16.msra.mxu1 %v4847_v35  ;;  %v4842_v3 = vld [vmem:[%s6426_s0 + $0x24] ss:$8 sps:$4 sm:$0xff]   ;;  %v4883_v5 = vld [vmem:[#allocation2 + $0x1a8] ss:$16 sps:$4 sm:$0xff]   ;;  %v4904_v8 = vld [vmem:[#allocation4 + $0x34] ss:$8 sps:$4 sm:$0xff]  }
  0x95   :  { %756 = vmatprep.subr.bf16.mxu1 %v4848_v36  ;;  %v4881_v4 = vld [vmem:[#allocation2 + $0x1ac] ss:$16 sps:$4 sm:$0xff]   ;;  %v4899_v6 = vld [vmem:[#allocation4 + $0x20] ss:$8 sps:$4 sm:$0xff]   ;;  %v4902_v9 = vld [vmem:[#allocation4 + $0x30] ss:$8 sps:$4 sm:$0xff]  }
  0x96   :  { %v4884_v7 = vld [vmem:[#allocation2 + $0x1cc] ss:$16 sps:$4 sm:$0xff]   ;;  %v4886_v11 = vld [vmem:[#allocation2 + $0x1c8] ss:$16 sps:$4 sm:$0xff]  }
  0x97   :  { %644 = vmatpush1.bf16.msra.mxu0 %v4793_v13  ;;  %v4907_v10 = vld [vmem:[#allocation4 + $0x44] ss:$8 sps:$4 sm:$0xff]   ;;  %v4844_v12 = vld [vmem:[%s6426_s0 + $0x20] ss:$8 sps:$4 sm:$0xff]   ;;  %v4851_v14 = vld [vmem:[%s6426_s0 + $0x34] ss:$8 sps:$4 sm:$0xff]  }
  0x98   :  { %645 = vmatprep.subr.bf16.mxu0 %v4794_v16  ;;  %757 = vmatpush1.bf16.msra.mxu1 %v4850_v39  ;;  %v4890_v13 = vld [vmem:[#allocation2 + $0x1ec] ss:$16 sps:$4 sm:$0xff]   ;;  %v4905_v15 = vld [vmem:[#allocation4 + $0x40] ss:$8 sps:$4 sm:$0xff]   ;;  %v4908_v18 = vld [vmem:[#allocation4 + $0x50] ss:$8 sps:$4 sm:$0xff]  }
  0x99   :  { %758 = vmatprep.subr.bf16.mxu1 %v4854_v40  ;;  %v4910_v16 = vld [vmem:[#allocation4 + $0x54] ss:$8 sps:$4 sm:$0xff]   ;;  %v4892_v17 = vld [vmem:[#allocation2 + $0x1e8] ss:$16 sps:$4 sm:$0xff]   ;;  %v4913_v19 = vld [vmem:[#allocation4 + $0x64] ss:$8 sps:$4 sm:$0xff]  }
  0x9a   :  { %v4853_v20 = vld [vmem:[%s6426_s0 + $0x30] ss:$8 sps:$4 sm:$0xff]   ;;  %v4916_v23 = vld [vmem:[#allocation4 + $0x74] ss:$8 sps:$4 sm:$0xff]   ;;  %v4917_v28 = vld [vmem:[#allocation4 + $0x80] ss:$8 sps:$4 sm:$0xff]  }
  0x9b   :  { %646 = vmatpush1.bf16.msra.mxu0 %v4796_v21  ;;  %v4860_v21 = vld [vmem:[%s6426_s0 + $0x44] ss:$8 sps:$4 sm:$0xff]   ;;  %v4914_v24 = vld [vmem:[#allocation4 + $0x70] ss:$8 sps:$4 sm:$0xff]   ;;  %v4869_v27 = vld [vmem:[%s6426_s0 + $0x54] ss:$8 sps:$4 sm:$0xff]  }
  0x9c   :  { %647 = vmatprep.subr.bf16.mxu0 %v4797_v22  ;;  %759 = vmatpush1.bf16.msra.mxu1 %v4856_v43  ;;  %v4911_v22 = vld [vmem:[#allocation4 + $0x60] ss:$8 sps:$4 sm:$0xff]   ;;  %v4925_v31 = vld [vmem:[#allocation4 + $0xa4] ss:$8 sps:$4 sm:$0xff]   ;;  %v4871_v32 = vld [vmem:[%s6426_s0 + $0x50] ss:$8 sps:$4 sm:$0xff]  }
  0x9d   :  { %760 = vmatprep.subr.bf16.mxu1 %v4857_v44  ;;  %v4928_v35 = vld [vmem:[#allocation4 + $0xb4] ss:$8 sps:$4 sm:$0xff]   ;;  %v4926_v36 = vld [vmem:[#allocation4 + $0xb0] ss:$8 sps:$4 sm:$0xff]   ;;  %v4929_v40 = vld [vmem:[#allocation4 + $0xc0] ss:$8 sps:$4 sm:$0xff]  }
  0x9e   :  { %v4887_v39 = vld [vmem:[%s6426_s0 + $0x74] ss:$8 sps:$4 sm:$0xff]   ;;  %v4889_v43 = vld [vmem:[%s6426_s0 + $0x70] ss:$8 sps:$4 sm:$0xff]   ;;  %v4937_v44 = vld [vmem:[#allocation4 + $0xe4] ss:$8 sps:$4 sm:$0xff]  }
  0x9f   :  { %648 = vmatpush1.bf16.msra.mxu0 %v4799_v25  ;;  %v4919_v25 = vld [vmem:[#allocation4 + $0x84] ss:$8 sps:$4 sm:$0xff]  }
  0xa0   :  { %649 = vmatprep.subr.bf16.mxu0 %v4800_v26  ;;  %761 = vmatpush1.bf16.msra.mxu1 %v4859_v47  ;;  %v4862_v26 = vld [vmem:[%s6426_s0 + $0x40] ss:$8 sps:$4 sm:$0xff]   ;;  %v4938_v47 = vld [vmem:[#allocation4 + $0xf0] ss:$8 sps:$4 sm:$0xff]  }
  0xa1   :  { %762 = vmatprep.subr.bf16.mxu1 %v4863_v48  ;;  %v4943_v48 = vld [vmem:[#allocation4 + $0x104] ss:$8 sps:$4 sm:$0xff]  }
  0xa3   :  { %650 = vmatpush1.bf16.msra.mxu0 %v4802_v29  ;;  %v4922_v29 = vld [vmem:[#allocation4 + $0x94] ss:$8 sps:$4 sm:$0xff]  }
  0xa4   :  { %651 = vmatprep.subr.bf16.mxu0 %v4803_v30  ;;  %763 = vmatpush1.bf16.msra.mxu1 %v4865_v51  ;;  %v4920_v30 = vld [vmem:[#allocation4 + $0x90] ss:$8 sps:$4 sm:$0xff]  }
  0xa5   :  { %764 = vmatprep.subr.bf16.mxu1 %v4866_v52  ;;  %v5771_v52 = vld [vmem:[%s6435_s9] sm:$0xff] }
  0xa7   :  { %652 = vmatpush1.bf16.msra.mxu0 %v4805_v33  ;;  %v4878_v33 = vld [vmem:[%s6426_s0 + $0x64] ss:$8 sps:$4 sm:$0xff]  }
  0xa8   :  { %653 = vmatprep.subr.bf16.mxu0 %v4806_v34  ;;  %765 = vmatpush1.bf16.msra.mxu1 %v4868_v55  ;;  %v4923_v34 = vld [vmem:[#allocation4 + $0xa0] ss:$8 sps:$4 sm:$0xff]  }
  0xa9   :  { %766 = vmatprep.subr.bf16.mxu1 %v4872_v57 }
  0xab   :  { %654 = vmatpush1.bf16.msra.mxu0 %v4808_v37  ;;  %v4931_v37 = vld [vmem:[#allocation4 + $0xc4] ss:$8 sps:$4 sm:$0xff]  }
  0xac   :  { %655 = vmatprep.subr.bf16.mxu0 %v4809_v38  ;;  %767 = vmatpush1.bf16.msra.mxu1 %v4874_v61  ;;  %v4880_v38 = vld [vmem:[%s6426_s0 + $0x60] ss:$8 sps:$4 sm:$0xff]  }
  0xad   :  { %768 = vmatprep.subr.bf16.mxu1 %v4875_v62 }
  0xaf   :  { %656 = vmatpush1.bf16.msra.mxu0 %v4811_v41  ;;  %v4934_v41 = vld [vmem:[#allocation4 + $0xd4] ss:$8 sps:$4 sm:$0xff]  }
  0xb0   :  { %657 = vmatprep.subr.bf16.mxu0 %v4812_v42  ;;  %769 = vmatpush1.bf16.msra.mxu1 %v4877_v2  ;;  %v4932_v42 = vld [vmem:[#allocation4 + $0xd0] ss:$8 sps:$4 sm:$0xff]  }
  0xb1   :  { %770 = vmatprep.subr.bf16.mxu1 %v4881_v4 }
  0xb3   :  { %658 = vmatpush1.bf16.msra.mxu0 %v4814_v45  ;;  %v4935_v45 = vld [vmem:[#allocation4 + $0xe0] ss:$8 sps:$4 sm:$0xff]  }
  0xb4   :  { %659 = vmatprep.subr.bf16.mxu0 %v4815_v46  ;;  %771 = vmatpush1.bf16.msra.mxu1 %v4883_v5  ;;  %v4940_v46 = vld [vmem:[#allocation4 + $0xf4] ss:$8 sps:$4 sm:$0xff]  }
  0xb5   :  { %772 = vmatprep.subr.bf16.mxu1 %v4884_v7  ;;  %v4992_v7 = vld [vmem:[%s6429_s3 + $0x8] sm:$0xff]  }
  0xb7   :  { %660 = vmatpush1.bf16.msra.mxu0 %v4817_v49  ;;  %v215_v49 = vlaneseq }
  0xb8   :  { %661 = vmatprep.subr.bf16.mxu0 %v4818_v50  ;;  %773 = vmatpush1.bf16.msra.mxu1 %v4886_v11 }
  0xb9   :  { %774 = vmatprep.subr.bf16.mxu1 %v4890_v13  ;;  %v5763_v50 = vshrl.u32 %v215_v49, 7 }
  0xbb   :  { %662 = vmatpush1.bf16.msra.mxu0 %v4820_v53  ;;  %v5766_v51 = vsub.s32 0, %v5763_v50  ;;  %v5776_v53 = vld [vmem:[%s6435_s9 + $0x8] sm:$0xff] }
  0xbc   :  { %1345 = vmatprep.subr.bf16.mxu0 %v4895_v54  ;;  %775 = vmatpush1.bf16.msra.mxu1 %v4892_v17 }
  0xbd   :  { %v5780_v54 = vrot.slane %v5771_v52, %v5766_v51  ;;  %v5784_v55 = vrot.slane %v5776_v53, %v5766_v51 }
  0xbe   :  { %664 = vmatmul.mubr.bf16.vlgmr.msra.gmra.mrb[0].mxu0 %v4824_v56 }
  0xbf   :  { %673 = vmatprep.mubr.bf16.mxu0 %v4833_v58  ;;  %1346 = vmatpush1.bf16.msra.mxu0 %v4893_v59 }
  0xc0   :  { %1347 = vmatprep.subr.bf16.mxu0 %v4898_v60  ;;  %777 = vmatmul.mubr.bf16.vlgmr.msra.gmra.mrb[0].mxu1 %v4824_v56 }
  0xc1   :  { %786 = vmatprep.mubr.bf16.mxu1 %v4833_v58 }
  0xc3   :  { %1348 = vmatpush1.bf16.msra.mxu0 %v4896_v63  ;;  %v4989_v63 = vld [vmem:[%s6429_s3 + $0x40] sm:$0xff]  }
  0xc4   :  { %1349 = vmatprep.subr.bf16.mxu0 %v4901_v1  ;;  %v4991_v1 = vld [vmem:[%s6429_s3 + $0x48] sm:$0xff]   ;;  %4439 = vmatprep.subr.bf16.mxu1 %v4989_v63 }
  0xc6   :  { %674 = vmatmul.mubr.bf16.gmra.mrb[4].mxu0 %v4835_v0 }
  0xc7   :  { %683 = vmatprep.mubr.bf16.mxu0 %v4842_v3  ;;  %1350 = vmatpush1.bf16.msra.mxu0 %v4899_v6 }
  0xc8   :  { %1351 = vmatprep.subr.bf16.mxu0 %v4904_v8  ;;  %787 = vmatmul.mubr.bf16.gmra.mrb[4].mxu1 %v4835_v0  ;;  %v4990_v0 = vld [vmem:[%s6429_s3] sm:$0xff]  }
  0xc9   :  { %796 = vmatprep.mubr.bf16.mxu1 %v4842_v3  ;;  %4440 = vmatpush3.bf16.msra.mxu1 %v4990_v0 }
  0xca   :  { %4441 = vmatprep.subr.bf16.mxu1 %v4991_v1 }
  0xcb   :  { %1352 = vmatpush1.bf16.msra.mxu0 %v4902_v9  ;;  %v4993_v9 = vld [vmem:[%s6429_s3 + $0x50] sm:$0xff]  }
  0xcc   :  { %1353 = vmatprep.subr.bf16.mxu0 %v4907_v10 }
  0xcd   :  { %4442 = vmatpush3.bf16.msra.mxu1 %v4992_v7 }
  0xce   :  { %684 = vmatmul.mubr.bf16.gmra.mrb[8].mxu0 %v4844_v12  ;;  %4443 = vmatprep.subr.bf16.mxu1 %v4993_v9  ;;  %v4958_v9 = vld [vmem:[#allocation4 + $0x154] ss:$8 sps:$4 sm:$0xff]  }
  0xcf   :  { %693 = vmatprep.mubr.bf16.mxu0 %v4851_v14  ;;  %1354 = vmatpush1.bf16.msra.mxu0 %v4905_v15  ;;  %v4946_v15 = vld [vmem:[#allocation4 + $0x114] ss:$8 sps:$4 sm:$0xff]  }
  0xd0   :  { %1355 = vmatprep.subr.bf16.mxu0 %v4910_v16  ;;  %797 = vmatmul.mubr.bf16.gmra.mrb[8].mxu1 %v4844_v12  ;;  %v4941_v12 = vld [vmem:[#allocation4 + $0x100] ss:$8 sps:$4 sm:$0xff]  }
  0xd1   :  { %806 = vmatprep.mubr.bf16.mxu1 %v4851_v14 }
  0xd3   :  { %1356 = vmatpush1.bf16.msra.mxu0 %v4908_v18  ;;  %v4994_v18 = vld [vmem:[%s6429_s3 + $0x10] sm:$0xff]  }
  0xd4   :  { %1357 = vmatprep.subr.bf16.mxu0 %v4913_v19  ;;  %4444 = vmatpush3.bf16.msra.mxu1 %v4994_v18 }
  0xd6   :  { %694 = vmatmul.mubr.bf16.gmra.mrb[12].mxu0 %v4853_v20 }
  0xd7   :  { %703 = vmatprep.mubr.bf16.mxu0 %v4860_v21  ;;  %1358 = vmatpush1.bf16.msra.mxu0 %v4911_v22 }
  0xd8   :  { %1359 = vmatprep.subr.bf16.mxu0 %v4916_v23  ;;  %807 = vmatmul.mubr.bf16.gmra.mrb[12].mxu1 %v4853_v20  ;;  %v4944_v23 = vld [vmem:[#allocation4 + $0x110] ss:$8 sps:$4 sm:$0xff]  }
  0xd9   :  { %816 = vmatprep.mubr.bf16.mxu1 %v4860_v21  ;;  %v4995_v21 = vld [vmem:[%s6429_s3 + $0x58] sm:$0xff]  }
  0xda   :  { %4445 = vmatprep.subr.bf16.mxu1 %v4995_v21 }
  0xdb   :  { %1360 = vmatpush1.bf16.msra.mxu0 %v4914_v24 }
  0xdc   :  { %1361 = vmatprep.subr.bf16.mxu0 %v4919_v25 }
  0xde   :  { %704 = vmatmul.mubr.bf16.gmra.mrb[16].mxu0 %v4862_v26 }
  0xdf   :  { %713 = vmatprep.mubr.bf16.mxu0 %v4869_v27  ;;  %1362 = vmatpush1.bf16.msra.mxu0 %v4917_v28 }
  0xe0   :  { %1363 = vmatprep.subr.bf16.mxu0 %v4922_v29  ;;  %817 = vmatmul.mubr.bf16.gmra.mrb[16].mxu1 %v4862_v26  ;;  %v4949_v26 = vld [vmem:[#allocation4 + $0x124] ss:$8 sps:$4 sm:$0xff]   ;;  %v4996_v29 = vld [vmem:[%s6429_s3 + $0x18] sm:$0xff]  }
  0xe1   :  { %826 = vmatprep.mubr.bf16.mxu1 %v4869_v27  ;;  %4446 = vmatpush3.bf16.msra.mxu1 %v4996_v29 }
  0xe3   :  { %1364 = vmatpush1.bf16.msra.mxu0 %v4920_v30 }
  0xe4   :  { %1365 = vmatprep.subr.bf16.mxu0 %v4925_v31  ;;  %v4997_v31 = vld [vmem:[%s6429_s3 + $0x60] sm:$0xff]  }
  0xe5   :  { %4447 = vmatprep.subr.bf16.mxu1 %v4997_v31 }
  0xe6   :  { %714 = vmatmul.mubr.bf16.gmra.mrb[20].mxu0 %v4871_v32 }
  0xe7   :  { %723 = vmatprep.mubr.bf16.mxu0 %v4878_v33  ;;  %1366 = vmatpush1.bf16.msra.mxu0 %v4923_v34  ;;  %v4947_v34 = vld [vmem:[#allocation4 + $0x120] ss:$8 sps:$4 sm:$0xff]  }
  0xe8   :  { %1367 = vmatprep.subr.bf16.mxu0 %v4928_v35  ;;  %827 = vmatmul.mubr.bf16.gmra.mrb[20].mxu1 %v4871_v32  ;;  %v133_v35 = vld [vmem:[%s6435_s9 + $0x10] sm:$0xff] }
  0xe9   :  { %836 = vmatprep.mubr.bf16.mxu1 %v4878_v33 }
  0xeb   :  { %1368 = vmatpush1.bf16.msra.mxu0 %v4926_v36 }
  0xec   :  { %1369 = vmatprep.subr.bf16.mxu0 %v4931_v37 }
  0xee   :  { %724 = vmatmul.mubr.bf16.gmra.mrb[24].mxu0 %v4880_v38 }
  0xef   :  { %733 = vmatprep.mubr.bf16.mxu0 %v4887_v39  ;;  %1370 = vmatpush1.bf16.msra.mxu0 %v4929_v40 }
  0xf0   :  { %1371 = vmatprep.subr.bf16.mxu0 %v4934_v41  ;;  %837 = vmatmul.mubr.bf16.gmra.mrb[24].mxu1 %v4880_v38  ;;  %v4952_v38 = vld [vmem:[#allocation4 + $0x134] ss:$8 sps:$4 sm:$0xff]  }
  0xf1   :  { %846 = vmatprep.mubr.bf16.mxu1 %v4887_v39  ;;  %v134_v39 = vld [vmem:[%s6435_s9 + $0x18] sm:$0xff] }
  0xf2   :  { %v5841_v49 = vrot.slane %v134_v39, %v5766_v51 }
  0xf3   :  { %1372 = vmatpush1.bf16.msra.mxu0 %v4932_v42  ;;  %v4998_v42 = vld [vmem:[%s6429_s3 + $0x20] sm:$0xff]  }
  0xf4   :  { %1373 = vmatprep.subr.bf16.mxu0 %v4937_v44  ;;  %4448 = vmatpush3.bf16.msra.mxu1 %v4998_v42  ;;  %v4964_v42 = vld [vmem:[#allocation4 + $0x174] ss:$8 sps:$4 sm:$0xff]  }
  0xf6   :  { %734 = vmatmul.mubr.bf16.gmra.mrb[28].mxu0 %v4889_v43 }
  0xf7   :  { %1374 = vmatpush1.bf16.msra.mxu0 %v4935_v45  ;;  %v5834_v45 = vrot.slane %v133_v35, %v5766_v51  ;;  %v5001_v51 = vld [vmem:[%s6429_s3 + $0x70] sm:$0xff]  }
  0xf8   :  { %847 = vmatmul.mubr.bf16.gmra.mrb[28].mxu1 %v4889_v43  ;;  %1375 = vmatprep.subr.bf16.mxu0 %v4940_v46  ;;  %v4999_v46 = vld [vmem:[%s6429_s3 + $0x68] sm:$0xff]  }
  0xf9   :  { %4449 = vmatprep.subr.bf16.mxu1 %v4999_v46 }
  0xfb   :  { %1376 = vmatpush1.bf16.msra.mxu0 %v4938_v47 }
  0xfc   :  { %1458 = vmatprep.subr.bf16.mxu0 %v4943_v48  ;;  %v4950_v48 = vld [vmem:[#allocation4 + $0x130] ss:$8 sps:$4 sm:$0xff]  }
 0x191   :  { %v665_v56 = vpop.f32.mrb[0].mxu0 }
 0x192   :  { %v666_v57 = vadd.f32 %v665_v56, %v5780_v54  ;;  %v667_v58 = vpop.f32.mrb[1].mxu0 }
 0x193   :  { %v668_v59 = vadd.f32 %v667_v58, %v5784_v55  ;;  %v669_v60 = vpop.f32.mrb[2].mxu0  ;;  %v4955_v58 = vld [vmem:[#allocation4 + $0x144] ss:$8 sps:$4 sm:$0xff]  }
 0x194   :  { %v670_v61 = vadd.f32 %v669_v60, %v5780_v54  ;;  %v671_v62 = vpop.f32.mrb[3].mxu0  ;;  %v857_v3 = vmax.f32 %v666_v57, 0.0 }
 0x195   :  { %v672_v2 = vadd.f32 %v671_v62, %v5784_v55  ;;  %v858_v5 = vmax.f32 %v668_v59, 0.0  ;;  %v5000_v62 = vld [vmem:[%s6429_s3 + $0x28] sm:$0xff]  }
 0x196   :  { %v861_v4 = vmax.f32 %v670_v61, 0.0  ;;  %v778_v61 = vpop.f32.mrb[0].mxu1  ;;  %4450 = vmatpush3.bf16.msra.mxu1 %v5000_v62  ;;  %v4962_v62 = vld [vmem:[#allocation4 + $0x170] ss:$8 sps:$4 sm:$0xff]  }
 0x197   :  { %v862_v6 = vmax.f32 %v672_v2, 0.0  ;;  %v779_v0 = vadd.f32 %v778_v61, %v5834_v45  ;;  %v780_v1 = vpop.f32.mrb[1].mxu1  ;;  %4451 = vmatprep.subr.bf16.mxu1 %v5001_v51  ;;  %v4967_v51 = vld [vmem:[#allocation4 + $0x184] ss:$8 sps:$4 sm:$0xff]  }
 0x198   :  { %v921_v8 = vpack.c.bf16 %v861_v4, %v857_v3  ;;  %v4953_v4 = vld [vmem:[#allocation4 + $0x140] ss:$8 sps:$4 sm:$0xff]  }
 0x199   :  { %v922_v10 = vpack.c.bf16 %v862_v6, %v858_v5  ;;  %v675_v11 = vpop.f32.mrb[4].mxu0  ;;  %v781_v5 = vadd.f32 %v780_v1, %v5841_v49  ;;  %v782_v6 = vpop.f32.mrb[2].mxu1 }
 0x19a   :  { %v676_v13 = vadd.f32 %v675_v11, %v5780_v54  ;;  %v677_v14 = vpop.f32.mrb[5].mxu0  ;;  %v783_v11 = vadd.f32 %v782_v6, %v5834_v45 }
 0x19b   :  { %v678_v16 = vadd.f32 %v677_v14, %v5784_v55  ;;  %v679_v17 = vpop.f32.mrb[6].mxu0  ;;  %1377 = vmatprep.mubr.bf16.mxu0 %v922_v10  ;;  %v859_v10 = vmax.f32 %v779_v0, 0.0 }
 0x19c   :  { %v680_v19 = vadd.f32 %v679_v17, %v5780_v54  ;;  %v681_v20 = vpop.f32.mrb[7].mxu0  ;;  %1378 = vmatmul.mubr.bf16.vlgmr.msra.gmra.mrb[32].mxu0 %v921_v8  ;;  %v865_v24 = vmax.f32 %v676_v13, 0.0  ;;  %v5002_v17 = vld [vmem:[%s6429_s3 + $0x30] sm:$0xff]  }
 0x19d   :  { %v682_v22 = vadd.f32 %v681_v20, %v5784_v55  ;;  %1459 = vmatpush1.bf16.msra.mxu0 %v4941_v12  ;;  %v866_v27 = vmax.f32 %v678_v16, 0.0  ;;  %v784_v12 = vpop.f32.mrb[3].mxu1  ;;  %v863_v20 = vmax.f32 %v783_v11, 0.0  ;;  %4452 = vmatpush3.bf16.msra.mxu1 %v5002_v17  ;;  %v4970_v17 = vld [vmem:[#allocation4 + $0x194] ss:$8 sps:$4 sm:$0xff]  }
 0x19e   :  { %v869_v25 = vmax.f32 %v680_v19, 0.0  ;;  %1460 = vmatprep.subr.bf16.mxu0 %v4946_v15  ;;  %v860_v15 = vmax.f32 %v781_v5, 0.0  ;;  %v785_v16 = vadd.f32 %v784_v12, %v5841_v49  ;;  %v788_v31 = vpop.f32.mrb[4].mxu1  ;;  %v4965_v12 = vld [vmem:[#allocation4 + $0x180] ss:$8 sps:$4 sm:$0xff]  }
 0x19f   :  { %v870_v28 = vmax.f32 %v682_v22, 0.0  ;;  %v4956_v22 = vld [vmem:[#allocation4 + $0x150] ss:$8 sps:$4 sm:$0xff]  }
 0x1a0   :  { %v925_v30 = vpack.c.bf16 %v869_v25, %v865_v24 }
 0x1a1   :  { %v926_v32 = vpack.c.bf16 %v870_v28, %v866_v27  ;;  %1461 = vmatpush1.bf16.msra.mxu0 %v4944_v23  ;;  %v685_v33 = vpop.f32.mrb[8].mxu0  ;;  %v864_v23 = vmax.f32 %v785_v16, 0.0  ;;  %v5860_v27 = vpack.c.bf16 %v863_v20, %v859_v10 }
 0x1a2   :  { %v686_v36 = vadd.f32 %v685_v33, %v5780_v54  ;;  %v687_v37 = vpop.f32.mrb[9].mxu0  ;;  %1462 = vmatprep.subr.bf16.mxu0 %v4949_v26  ;;  %v4961_v26 = vld [vmem:[#allocation4 + $0x164] ss:$8 sps:$4 sm:$0xff]   ;;  %v789_v33 = vadd.f32 %v788_v31, %v5834_v45  ;;  %v4968_v31 = vld [vmem:[#allocation4 + $0x190] ss:$8 sps:$4 sm:$0xff]  }
 0x1a3   :  { %v688_v40 = vadd.f32 %v687_v37, %v5784_v55  ;;  %v689_v41 = vpop.f32.mrb[10].mxu0  ;;  %1387 = vmatprep.mubr.bf16.mxu0 %v926_v32  ;;  %v4959_v37 = vld [vmem:[#allocation4 + $0x160] ss:$8 sps:$4 sm:$0xff]  }
 0x1a4   :  { %v690_v43 = vadd.f32 %v689_v41, %v5780_v54  ;;  %v691_v44 = vpop.f32.mrb[11].mxu0  ;;  %1388 = vmatmul.mubr.bf16.gmra.mrb[36].mxu0 %v925_v30  ;;  %v873_v56 = vmax.f32 %v686_v36, 0.0  ;;  %v5862_v30 = vpack.c.bf16 %v864_v23, %v860_v15 }
 0x1a5   :  { %v692_v47 = vadd.f32 %v691_v44, %v5784_v55  ;;  %1463 = vmatpush1.bf16.msra.mxu0 %v4947_v34  ;;  %v874_v59 = vmax.f32 %v688_v40, 0.0  ;;  %v790_v34 = vpop.f32.mrb[5].mxu1 }
 0x1a6   :  { %v877_v57 = vmax.f32 %v690_v43, 0.0  ;;  %1464 = vmatprep.subr.bf16.mxu0 %v4952_v38  ;;  %v791_v38 = vadd.f32 %v790_v34, %v5841_v49  ;;  %v792_v39 = vpop.f32.mrb[6].mxu1  ;;  %v867_v43 = vmax.f32 %v789_v33, 0.0 }
 0x1a7   :  { %v878_v60 = vmax.f32 %v692_v47, 0.0  ;;  %v793_v44 = vadd.f32 %v792_v39, %v5834_v45  ;;  %v794_v46 = vpop.f32.mrb[7].mxu1 }
 0x1a8   :  { %v929_v63 = vpack.c.bf16 %v877_v57, %v873_v56  ;;  %v868_v56 = vmax.f32 %v791_v38, 0.0  ;;  %v795_v57 = vadd.f32 %v794_v46, %v5841_v49  ;;  %v798_v6 = vpop.f32.mrb[8].mxu1 }
 0x1a9   :  { %v930_v2 = vpack.c.bf16 %v878_v60, %v874_v59  ;;  %1465 = vmatpush1.bf16.msra.mxu0 %v4950_v48  ;;  %v695_v3 = vpop.f32.mrb[12].mxu0  ;;  %v871_v60 = vmax.f32 %v793_v44, 0.0 }
 0x1aa   :  { %v696_v7 = vadd.f32 %v695_v3, %v5780_v54  ;;  %v697_v8 = vpop.f32.mrb[13].mxu0  ;;  %1466 = vmatprep.subr.bf16.mxu0 %v4955_v58 }
 0x1ab   :  { %v698_v13 = vadd.f32 %v697_v8, %v5784_v55  ;;  %v699_v14 = vpop.f32.mrb[14].mxu0  ;;  %1397 = vmatprep.mubr.bf16.mxu0 %v930_v2  ;;  %v5872_v2 = vpack.c.bf16 %v871_v60, %v867_v43  ;;  %v799_v8 = vadd.f32 %v798_v6, %v5834_v45 }
 0x1ac   :  { %v700_v18 = vadd.f32 %v699_v14, %v5780_v54  ;;  %v701_v19 = vpop.f32.mrb[15].mxu0  ;;  %1398 = vmatmul.mubr.bf16.gmra.mrb[40].mxu0 %v929_v63  ;;  %v881_v24 = vmax.f32 %v696_v7, 0.0  ;;  %v872_v63 = vmax.f32 %v795_v57, 0.0 }
 0x1ad   :  { %v702_v21 = vadd.f32 %v701_v19, %v5784_v55  ;;  %1467 = vmatpush1.bf16.msra.mxu0 %v4953_v4  ;;  %v882_v28 = vmax.f32 %v698_v13, 0.0 }
 0x1ae   :  { %v885_v25 = vmax.f32 %v700_v18, 0.0  ;;  %1468 = vmatprep.subr.bf16.mxu0 %v4958_v9  ;;  %v5874_v5 = vpack.c.bf16 %v872_v63, %v868_v56  ;;  %v800_v9 = vpop.f32.mrb[9].mxu1  ;;  %v875_v18 = vmax.f32 %v799_v8, 0.0  ;;  %v4974_v8 = vld [vmem:[#allocation4 + $0x1b0] ss:$8 sps:$4 sm:$0xff]  }
 0x1af   :  { %v886_v29 = vmax.f32 %v702_v21, 0.0  ;;  %v801_v13 = vadd.f32 %v800_v9, %v5841_v49  ;;  %v802_v14 = vpop.f32.mrb[10].mxu1 }
 0x1b0   :  { %v933_v32 = vpack.c.bf16 %v885_v25, %v881_v24  ;;  %v803_v19 = vadd.f32 %v802_v14, %v5834_v45  ;;  %v804_v20 = vpop.f32.mrb[11].mxu1 }
 0x1b1   :  { %v934_v35 = vpack.c.bf16 %v886_v29, %v882_v28  ;;  %1469 = vmatpush1.bf16.msra.mxu0 %v4956_v22  ;;  %v705_v36 = vpop.f32.mrb[16].mxu0  ;;  %v876_v23 = vmax.f32 %v801_v13, 0.0  ;;  %v805_v24 = vadd.f32 %v804_v20, %v5841_v49 }
 0x1b2   :  { %v706_v40 = vadd.f32 %v705_v36, %v5780_v54  ;;  %v707_v41 = vpop.f32.mrb[17].mxu0  ;;  %1470 = vmatprep.subr.bf16.mxu0 %v4961_v26  ;;  %v879_v28 = vmax.f32 %v803_v19, 0.0 }
 0x1b3   :  { %v708_v47 = vadd.f32 %v707_v41, %v5784_v55  ;;  %v709_v48 = vpop.f32.mrb[18].mxu0  ;;  %1407 = vmatprep.mubr.bf16.mxu0 %v934_v35  ;;  %v4973_v35 = vld [vmem:[#allocation4 + $0x1a4] ss:$8 sps:$4 sm:$0xff]  }
 0x1b4   :  { %v710_v58 = vadd.f32 %v709_v48, %v5780_v54  ;;  %v711_v59 = vpop.f32.mrb[19].mxu0  ;;  %1408 = vmatmul.mubr.bf16.gmra.mrb[44].mxu0 %v933_v32  ;;  %v889_v0 = vmax.f32 %v706_v40, 0.0  ;;  %v880_v32 = vmax.f32 %v805_v24, 0.0  ;;  %v5884_v36 = vpack.c.bf16 %v879_v28, %v875_v18  ;;  %v808_v40 = vpop.f32.mrb[12].mxu1 }
 0x1b5   :  { %v712_v61 = vadd.f32 %v711_v59, %v5784_v55  ;;  %1471 = vmatpush1.bf16.msra.mxu0 %v4959_v37  ;;  %v890_v3 = vmax.f32 %v708_v47, 0.0  ;;  %v810_v43 = vpop.f32.mrb[13].mxu1  ;;  %v4971_v47 = vld [vmem:[#allocation4 + $0x1a0] ss:$8 sps:$4 sm:$0xff]   ;;  %v4976_v59 = vld [vmem:[#allocation4 + $0x1b4] ss:$8 sps:$4 sm:$0xff]  }
 0x1b6   :  { %v893_v1 = vmax.f32 %v710_v58, 0.0  ;;  %1472 = vmatprep.subr.bf16.mxu0 %v4964_v42  ;;  %v5886_v39 = vpack.c.bf16 %v880_v32, %v876_v23  ;;  %v809_v42 = vadd.f32 %v808_v40, %v5834_v45  ;;  %v811_v48 = vadd.f32 %v810_v43, %v5841_v49  ;;  %v812_v56 = vpop.f32.mrb[14].mxu1  ;;  %v4977_v23 = vld [vmem:[#allocation4 + $0x1c0] ss:$8 sps:$4 sm:$0xff]  }
 0x1b7   :  { %v894_v4 = vmax.f32 %v712_v61, 0.0  ;;  %v813_v61 = vadd.f32 %v812_v56, %v5834_v45  ;;  %v4985_v56 = vld [vmem:[#allocation4 + $0x1e4] ss:$8 sps:$4 sm:$0xff]  }
 0x1b8   :  { %v937_v7 = vpack.c.bf16 %v893_v1, %v889_v0  ;;  %v883_v60 = vmax.f32 %v809_v42, 0.0  ;;  %v884_v1 = vmax.f32 %v811_v48, 0.0 }
 0x1b9   :  { %v938_v10 = vpack.c.bf16 %v894_v4, %v890_v3  ;;  %1473 = vmatpush1.bf16.msra.mxu0 %v4962_v62  ;;  %v715_v11 = vpop.f32.mrb[20].mxu0  ;;  %v814_v62 = vpop.f32.mrb[15].mxu1  ;;  %v887_v6 = vmax.f32 %v813_v61, 0.0 }
 0x1ba   :  { %v716_v15 = vadd.f32 %v715_v11, %v5780_v54  ;;  %v717_v16 = vpop.f32.mrb[21].mxu0  ;;  %1474 = vmatprep.subr.bf16.mxu0 %v4967_v51  ;;  %v815_v51 = vadd.f32 %v814_v62, %v5841_v49 }
 0x1bb   :  { %v718_v21 = vadd.f32 %v717_v16, %v5784_v55  ;;  %v719_v22 = vpop.f32.mrb[22].mxu0  ;;  %1417 = vmatprep.mubr.bf16.mxu0 %v938_v10  ;;  %v5896_v13 = vpack.c.bf16 %v887_v6, %v883_v60 }
 0x1bc   :  { %v720_v25 = vadd.f32 %v719_v22, %v5780_v54  ;;  %v721_v26 = vpop.f32.mrb[23].mxu0  ;;  %1418 = vmatmul.mubr.bf16.gmra.mrb[48].mxu0 %v937_v7  ;;  %v897_v33 = vmax.f32 %v716_v15, 0.0  ;;  %v888_v9 = vmax.f32 %v815_v51, 0.0 }
 0x1bd   :  { %v722_v29 = vadd.f32 %v721_v26, %v5784_v55  ;;  %1475 = vmatpush1.bf16.msra.mxu0 %v4965_v12  ;;  %v898_v37 = vmax.f32 %v718_v21, 0.0  ;;  %v4979_v12 = vld [vmem:[#allocation4 + $0x1c4] ss:$8 sps:$4 sm:$0xff]  }
 0x1be   :  { %v901_v34 = vmax.f32 %v720_v25, 0.0  ;;  %1476 = vmatprep.subr.bf16.mxu0 %v4970_v17  ;;  %v5898_v16 = vpack.c.bf16 %v888_v9, %v884_v1  ;;  %v818_v17 = vpop.f32.mrb[16].mxu1 }
 0x1bf   :  { %v902_v38 = vmax.f32 %v722_v29, 0.0  ;;  %v819_v19 = vadd.f32 %v818_v17, %v5834_v45  ;;  %v820_v20 = vpop.f32.mrb[17].mxu1  ;;  %v4982_v29 = vld [vmem:[#allocation4 + $0x1d4] ss:$8 sps:$4 sm:$0xff]  }
 0x1c0   :  { %v941_v41 = vpack.c.bf16 %v901_v34, %v897_v33  ;;  %v821_v24 = vadd.f32 %v820_v20, %v5841_v49  ;;  %v822_v25 = vpop.f32.mrb[18].mxu1 }
 0x1c1   :  { %v942_v44 = vpack.c.bf16 %v902_v38, %v898_v37  ;;  %1477 = vmatpush1.bf16.msra.mxu0 %v4968_v31  ;;  %v725_v46 = vpop.f32.mrb[24].mxu0  ;;  %v891_v31 = vmax.f32 %v819_v19, 0.0  ;;  %v823_v32 = vadd.f32 %v822_v25, %v5834_v45  ;;  %v824_v33 = vpop.f32.mrb[19].mxu1 }
 0x1c2   :  { %v726_v57 = vadd.f32 %v725_v46, %v5780_v54  ;;  %v727_v58 = vpop.f32.mrb[25].mxu0  ;;  %1478 = vmatprep.subr.bf16.mxu0 %v4973_v35  ;;  %v892_v37 = vmax.f32 %v821_v24, 0.0  ;;  %v825_v38 = vadd.f32 %v824_v33, %v5841_v49  ;;  %v828_v61 = vpop.f32.mrb[20].mxu1 }
 0x1c3   :  { %v728_v63 = vadd.f32 %v727_v58, %v5784_v55  ;;  %v729_v0 = vpop.f32.mrb[26].mxu0  ;;  %1427 = vmatprep.mubr.bf16.mxu0 %v942_v44  ;;  %v895_v42 = vmax.f32 %v823_v32, 0.0  ;;  %v4980_v44 = vld [vmem:[#allocation4 + $0x1d0] ss:$8 sps:$4 sm:$0xff]  }
 0x1c4   :  { %v730_v3 = vadd.f32 %v729_v0, %v5780_v54  ;;  %v731_v4 = vpop.f32.mrb[27].mxu0  ;;  %1428 = vmatmul.mubr.bf16.gmra.mrb[52].mxu0 %v941_v41  ;;  %v905_v10 = vmax.f32 %v726_v57, 0.0  ;;  %v896_v46 = vmax.f32 %v825_v38, 0.0 }
 0x1c5   :  { %v732_v7 = vadd.f32 %v731_v4, %v5784_v55  ;;  %1479 = vmatpush1.bf16.msra.mxu0 %v4971_v47  ;;  %v906_v14 = vmax.f32 %v728_v63, 0.0  ;;  %v5908_v57 = vpack.c.bf16 %v895_v42, %v891_v31  ;;  %v830_v63 = vpop.f32.mrb[21].mxu1 }
 0x1c6   :  { %v909_v11 = vmax.f32 %v730_v3, 0.0  ;;  %1480 = vmatprep.subr.bf16.mxu0 %v4976_v59  ;;  %v940_v60 = vpack.c.bf16 %v896_v46, %v892_v37  ;;  %v831_v1 = vadd.f32 %v830_v63, %v5841_v49  ;;  %v832_v51 = vpop.f32.mrb[22].mxu1  ;;  %v4988_v3 = vld [vmem:[#allocation4 + $0x1f4] ss:$8 sps:$4 sm:$0xff]  }
 0x1c7   :  { %v910_v15 = vmax.f32 %v732_v7, 0.0  ;;  %v833_v6 = vadd.f32 %v832_v51, %v5834_v45  ;;  %v834_v7 = vpop.f32.mrb[23].mxu1  ;;  %v5006_v51 = vld [vmem:[#allocation6 + $0x8] sm:$0xff]  }
 0x1c8   :  { %v945_v18 = vpack.c.bf16 %v909_v11, %v905_v10  ;;  %v835_v9 = vadd.f32 %v834_v7, %v5841_v49  ;;  %v4986_v11 = vld [vmem:[#allocation4 + $0x1f0] ss:$8 sps:$4 sm:$0xff]   ;;  %v838_v17 = vpop.f32.mrb[24].mxu1 }
 0x1c9   :  { %v946_v21 = vpack.c.bf16 %v910_v15, %v906_v14  ;;  %1481 = vmatpush1.bf16.msra.mxu0 %v4974_v8  ;;  %v735_v22 = vpop.f32.mrb[28].mxu0  ;;  %v900_v8 = vmax.f32 %v831_v1, 0.0  ;;  %v903_v10 = vmax.f32 %v833_v6, 0.0  ;;  %v840_v19 = vpop.f32.mrb[25].mxu1 }
 0x1ca   :  { %v736_v26 = vadd.f32 %v735_v22, %v5780_v54  ;;  %v737_v28 = vpop.f32.mrb[29].mxu0  ;;  %1482 = vmatprep.subr.bf16.mxu0 %v4979_v12  ;;  %v904_v12 = vmax.f32 %v835_v9, 0.0  ;;  %v841_v20 = vadd.f32 %v840_v19, %v5841_v49 }
 0x1cb   :  { %v738_v34 = vadd.f32 %v737_v28, %v5784_v55  ;;  %v739_v35 = vpop.f32.mrb[30].mxu0  ;;  %1437 = vmatprep.mubr.bf16.mxu0 %v946_v21  ;;  %v842_v21 = vpop.f32.mrb[26].mxu1 }
 0x1cc   :  { %v740_v40 = vadd.f32 %v739_v35, %v5780_v54  ;;  %v741_v41 = vpop.f32.mrb[31].mxu0  ;;  %1438 = vmatmul.mubr.bf16.gmra.mrb[56].mxu0 %v945_v18  ;;  %v913_v47 = vmax.f32 %v736_v26, 0.0  ;;  %v829_v54 = vadd.f32 %v828_v61, %v5834_v45  ;;  %v944_v15 = vpack.c.bf16 %v904_v12, %v900_v8  ;;  %v844_v24 = vpop.f32.mrb[27].mxu1 }
 0x1cd   :  { %v742_v43 = vadd.f32 %v741_v41, %v5784_v55  ;;  %1483 = vmatpush1.bf16.msra.mxu0 %v4977_v23  ;;  %v914_v58 = vmax.f32 %v738_v34, 0.0  ;;  %v4983_v55 = vld [vmem:[#allocation4 + $0x1e0] ss:$8 sps:$4 sm:$0xff]   ;;  %v839_v18 = vadd.f32 %v838_v17, %v5834_v45  ;;  %v843_v23 = vadd.f32 %v842_v21, %v5834_v45  ;;  %v848_v32 = vpop.f32.mrb[28].mxu1  ;;  %v5008_v21 = vld [vmem:[#allocation6 + $0x18] sm:$0xff]  }
 0x1ce   :  { %v917_v48 = vmax.f32 %v740_v40, 0.0  ;;  %1484 = vmatprep.subr.bf16.mxu0 %v4982_v29  ;;  %v899_v4 = vmax.f32 %v829_v54, 0.0  ;;  %v908_v25 = vmax.f32 %v841_v20, 0.0  ;;  %v845_v26 = vadd.f32 %v844_v24, %v5841_v49  ;;  %v850_v34 = vpop.f32.mrb[29].mxu1 }
 0x1cf   :  { %v918_v59 = vmax.f32 %v742_v43, 0.0  ;;  %v907_v22 = vmax.f32 %v839_v18, 0.0  ;;  %v849_v33 = vadd.f32 %v848_v32, %v5834_v45  ;;  %v851_v35 = vadd.f32 %v850_v34, %v5841_v49  ;;  %v852_v37 = vpop.f32.mrb[30].mxu1 }
 0x1d0   :  { %v949_v62 = vpack.c.bf16 %v917_v48, %v913_v47  ;;  %v943_v14 = vpack.c.bf16 %v903_v10, %v899_v4  ;;  %v912_v28 = vmax.f32 %v845_v26, 0.0  ;;  %v853_v40 = vadd.f32 %v852_v37, %v5834_v45  ;;  %v854_v41 = vpop.f32.mrb[31].mxu1  ;;  %v5003_v45 = vld [vmem:[%s6429_s3 + $0x78] sm:$0xff]  }
 0x1d1   :  { %v950_v0 = vpack.c.bf16 %v918_v59, %v914_v58  ;;  %1485 = vmatpush1.bf16.msra.mxu0 %v4980_v44  ;;  %v915_v38 = vmax.f32 %v849_v33, 0.0  ;;  %v916_v42 = vmax.f32 %v851_v35, 0.0  ;;  %4453 = vmatprep.subr.bf16.mxu1 %v5003_v45 }
 0x1d2   :  { %1486 = vmatprep.subr.bf16.mxu0 %v4985_v56  ;;  %v948_v31 = vpack.c.bf16 %v912_v28, %v908_v25 }
 0x1d3   :  { %1447 = vmatprep.mubr.bf16.mxu0 %v950_v0 }
 0x1d4   :  { %1448 = vmatmul.mubr.bf16.gmra.mrb[60].mxu0 %v949_v62 }
 0x1d5   :  { %1487 = vmatpush1.bf16.msra.mxu0 %v4983_v55  ;;  %1490 = vmatprep.mubr.bf16.mxu0 %v5862_v30  ;;  %v911_v30 = vmax.f32 %v843_v23, 0.0 }
 0x1d6   :  { %1488 = vmatprep.subr.bf16.mxu0 %v4988_v3 }
 0x1d7   :  { %v947_v29 = vpack.c.bf16 %v911_v30, %v907_v22 }
 0x1d9   :  { %1489 = vmatpush1.bf16.msra.mxu0 %v4986_v11  ;;  %v5007_v11 = vld [vmem:[#allocation6 + $0x10] sm:$0xff]  }
 0x1dc   :  { %1491 = vmatmul.mubr.bf16.vlgmr.msra.gmra.mrb[32].mxu0 %v5860_v27  ;;  %v855_v27 = vadd.f32 %v854_v41, %v5841_v49  ;;  %v5004_v49 = vld [vmem:[%s6429_s3 + $0x38] sm:$0xff]  }
 0x1dd   :  { %1500 = vmatprep.mubr.bf16.mxu0 %v5874_v5  ;;  %v919_v5 = vmax.f32 %v853_v40, 0.0  ;;  %4454 = vmatpush3.bf16.msra.mxu1 %v5004_v49  ;;  %v5010_v40 = vld [vmem:[#allocation6 + $0x28] sm:$0xff]  }
 0x1de   :  { %v920_v43 = vmax.f32 %v855_v27, 0.0 }
 0x1df   :  { %v951_v44 = vpack.c.bf16 %v919_v5, %v915_v38 }
 0x1e0   :  { %v952_v46 = vpack.c.bf16 %v920_v43, %v916_v42 }
 0x1e4   :  { %1501 = vmatmul.mubr.bf16.gmra.mrb[36].mxu0 %v5872_v2  ;;  %v5005_v2 = vld [vmem:[#allocation6] sm:$0xff]  }
 0x1e5   :  { %1510 = vmatprep.mubr.bf16.mxu0 %v5886_v39  ;;  %4535 = vmatprep.subr.bf16.mxu1 %v5005_v2 }
 0x1ec   :  { %1511 = vmatmul.mubr.bf16.gmra.mrb[40].mxu0 %v5884_v36  ;;  %v1019_v36 = vsub.s32 1, %v5763_v50 }
 0x1ed   :  { %1520 = vmatprep.mubr.bf16.mxu0 %v5898_v16 }
 0x1ee   :  { %v5939_v39 = vrot.slane %v5771_v52, %v1019_v36 }
 0x1f4   :  { %1521 = vmatmul.mubr.bf16.gmra.mrb[44].mxu0 %v5896_v13  ;;  %v5942_v13 = vrot.slane %v5776_v53, %v1019_v36 }
 0x1f5   :  { %1530 = vmatprep.mubr.bf16.mxu0 %v940_v60 }
 0x1fc   :  { %1531 = vmatmul.mubr.bf16.gmra.mrb[48].mxu0 %v5908_v57 }
 0x1fd   :  { %1540 = vmatprep.mubr.bf16.mxu0 %v944_v15 }
 0x204   :  { %1541 = vmatmul.mubr.bf16.gmra.mrb[52].mxu0 %v943_v14 }
 0x205   :  { %1550 = vmatprep.mubr.bf16.mxu0 %v948_v31 }
 0x20c   :  { %1551 = vmatmul.mubr.bf16.gmra.mrb[56].mxu0 %v947_v29  ;;  %v5009_v29 = vld [vmem:[#allocation6 + $0x20] sm:$0xff]  }
 0x20d   :  { %1560 = vmatprep.mubr.bf16.mxu0 %v952_v46 }
 0x214   :  { %1561 = vmatmul.mubr.bf16.gmra.mrb[60].mxu0 %v951_v44 }
 0x2af   :  { %v1492_v16 = vpop.f32.mrb[32].mxu0 }
 0x2b0   :  { %v4631_v47 = vadd.f32 %v1492_v16, %v5939_v39  ;;  %v1494_v48 = vpop.f32.mrb[33].mxu0 }
 0x2b1   :  { %v4632_v56 = vadd.f32 %v1494_v48, %v5942_v13  ;;  %v1496_v57 = vpop.f32.mrb[34].mxu0 }
 0x2b2   :  { %v4633_v58 = vadd.f32 %v1496_v57, %v5939_v39  ;;  %v1498_v59 = vpop.f32.mrb[35].mxu0  ;;  %v1571_v61 = vmax.f32 %v4631_v47, 0.0 }
 0x2b3   :  { %v4634_v60 = vadd.f32 %v1498_v59, %v5942_v13  ;;  %v1572_v54 = vmax.f32 %v4632_v56, 0.0 }
 0x2b4   :  { %v1573_v62 = vmax.f32 %v4633_v58, 0.0 }
 0x2b5   :  { %v1574_v52 = vmax.f32 %v4634_v60, 0.0 }
 0x2b6   :  { %v1603_v63 = vpack.c.bf16 %v1573_v62, %v1571_v61 }
 0x2b7   :  { %v1604_v0 = vpack.c.bf16 %v1574_v52, %v1572_v54  ;;  %v1502_v53 = vpop.f32.mrb[36].mxu0 }
 0x2b8   :  { %v4635_v55 = vadd.f32 %v1502_v53, %v5939_v39  ;;  %v1504_v1 = vpop.f32.mrb[37].mxu0 }
 0x2b9   :  { %v4636_v3 = vadd.f32 %v1504_v1, %v5942_v13  ;;  %v1506_v4 = vpop.f32.mrb[38].mxu0  ;;  %1783 = vmatprep.mubr.bf16.mxu1 %v1604_v0 }
 0x2ba   :  { %v4637_v6 = vadd.f32 %v1506_v4, %v5939_v39  ;;  %v1508_v7 = vpop.f32.mrb[39].mxu0  ;;  %1784 = vmatmul.mubr.bf16.vlgmr.msra.gmra.mrb[32].mxu1 %v1603_v63  ;;  %v1575_v9 = vmax.f32 %v4635_v55, 0.0 }
 0x2bb   :  { %v4638_v8 = vadd.f32 %v1508_v7, %v5942_v13  ;;  %4536 = vmatpush3.bf16.msra.mxu1 %v5005_v2  ;;  %v1576_v12 = vmax.f32 %v4636_v3, 0.0 }
 0x2bc   :  { %v1577_v10 = vmax.f32 %v4637_v6, 0.0  ;;  %4537 = vmatprep.subr.bf16.mxu1 %v5006_v51 }
 0x2bd   :  { %v1578_v14 = vmax.f32 %v4638_v8, 0.0 }
 0x2be   :  { %v1605_v15 = vpack.c.bf16 %v1577_v10, %v1575_v9 }
 0x2bf   :  { %v1606_v17 = vpack.c.bf16 %v1578_v14, %v1576_v12  ;;  %v1512_v18 = vpop.f32.mrb[40].mxu0  ;;  %4538 = vmatpush3.bf16.msra.mxu1 %v5006_v51 }
 0x2c0   :  { %v4639_v19 = vadd.f32 %v1512_v18, %v5939_v39  ;;  %v1514_v20 = vpop.f32.mrb[41].mxu0  ;;  %4539 = vmatprep.subr.bf16.mxu1 %v5007_v11 }
 0x2c1   :  { %v4640_v22 = vadd.f32 %v1514_v20, %v5942_v13  ;;  %v1516_v23 = vpop.f32.mrb[42].mxu0  ;;  %1791 = vmatprep.mubr.bf16.mxu1 %v1606_v17 }
 0x2c2   :  { %v4641_v24 = vadd.f32 %v1516_v23, %v5939_v39  ;;  %v1518_v25 = vpop.f32.mrb[43].mxu0  ;;  %1792 = vmatmul.mubr.bf16.gmra.mrb[36].mxu1 %v1605_v15  ;;  %v1579_v30 = vmax.f32 %v4639_v19, 0.0 }
 0x2c3   :  { %v4642_v26 = vadd.f32 %v1518_v25, %v5942_v13  ;;  %4540 = vmatpush3.bf16.msra.mxu1 %v5007_v11  ;;  %v1580_v31 = vmax.f32 %v4640_v22, 0.0 }
 0x2c4   :  { %v1581_v28 = vmax.f32 %v4641_v24, 0.0  ;;  %4541 = vmatprep.subr.bf16.mxu1 %v5008_v21 }
 0x2c5   :  { %v1582_v32 = vmax.f32 %v4642_v26, 0.0 }
 0x2c6   :  { %v1607_v33 = vpack.c.bf16 %v1581_v28, %v1579_v30 }
 0x2c7   :  { %v1608_v34 = vpack.c.bf16 %v1582_v32, %v1580_v31  ;;  %v1522_v35 = vpop.f32.mrb[44].mxu0  ;;  %4542 = vmatpush3.bf16.msra.mxu1 %v5008_v21 }
 0x2c8   :  { %v4643_v37 = vadd.f32 %v1522_v35, %v5939_v39  ;;  %v1524_v38 = vpop.f32.mrb[45].mxu0  ;;  %4543 = vmatprep.subr.bf16.mxu1 %v5009_v29 }
 0x2c9   :  { %v4644_v41 = vadd.f32 %v1524_v38, %v5942_v13  ;;  %v1526_v42 = vpop.f32.mrb[46].mxu0  ;;  %1799 = vmatprep.mubr.bf16.mxu1 %v1608_v34 }
 0x2ca   :  { %v4645_v27 = vadd.f32 %v1526_v42, %v5939_v39  ;;  %v1528_v5 = vpop.f32.mrb[47].mxu0  ;;  %1800 = vmatmul.mubr.bf16.gmra.mrb[40].mxu1 %v1607_v33  ;;  %v1583_v44 = vmax.f32 %v4643_v37, 0.0 }
 0x2cb   :  { %v4646_v43 = vadd.f32 %v1528_v5, %v5942_v13  ;;  %4544 = vmatpush3.bf16.msra.mxu1 %v5009_v29  ;;  %v1584_v45 = vmax.f32 %v4644_v41, 0.0 }
 0x2cc   :  { %v1585_v46 = vmax.f32 %v4645_v27, 0.0  ;;  %4545 = vmatprep.subr.bf16.mxu1 %v5010_v40 }
 0x2cd   :  { %v1586_v49 = vmax.f32 %v4646_v43, 0.0 }
 0x2ce   :  { %v1609_v2 = vpack.c.bf16 %v1585_v46, %v1583_v44  ;;  %v5011_v46 = vld [vmem:[#allocation6 + $0x30] sm:$0xff]  }
 0x2cf   :  { %v1610_v36 = vpack.c.bf16 %v1586_v49, %v1584_v45  ;;  %v1532_v16 = vpop.f32.mrb[48].mxu0  ;;  %4546 = vmatpush3.bf16.msra.mxu1 %v5010_v40  ;;  %v5012_v45 = vld [vmem:[#allocation6 + $0x38] sm:$0xff]   ;;  %v5013_v49 = vld [vmem:[#allocation7] sm:$0xff]  }
 0x2d0   :  { %v4647_v47 = vadd.f32 %v1532_v16, %v5939_v39  ;;  %v1534_v48 = vpop.f32.mrb[49].mxu0  ;;  %4547 = vmatprep.subr.bf16.mxu1 %v5011_v46 }
 0x2d1   :  { %v4648_v56 = vadd.f32 %v1534_v48, %v5942_v13  ;;  %v1536_v57 = vpop.f32.mrb[50].mxu0  ;;  %1807 = vmatprep.mubr.bf16.mxu1 %v1610_v36 }
 0x2d2   :  { %v4649_v58 = vadd.f32 %v1536_v57, %v5939_v39  ;;  %v1538_v59 = vpop.f32.mrb[51].mxu0  ;;  %1808 = vmatmul.mubr.bf16.gmra.mrb[44].mxu1 %v1609_v2  ;;  %v1587_v61 = vmax.f32 %v4647_v47, 0.0 }
 0x2d3   :  { %v4650_v60 = vadd.f32 %v1538_v59, %v5942_v13  ;;  %v1588_v54 = vmax.f32 %v4648_v56, 0.0  ;;  %4548 = vmatpush3.bf16.msra.mxu1 %v5011_v46 }
 0x2d4   :  { %v1589_v62 = vmax.f32 %v4649_v58, 0.0  ;;  %4549 = vmatprep.subr.bf16.mxu1 %v5012_v45 }
 0x2d5   :  { %v1590_v52 = vmax.f32 %v4650_v60, 0.0 }
 0x2d6   :  { %v1611_v63 = vpack.c.bf16 %v1589_v62, %v1587_v61 }
 0x2d7   :  { %v1612_v0 = vpack.c.bf16 %v1590_v52, %v1588_v54  ;;  %v1542_v53 = vpop.f32.mrb[52].mxu0  ;;  %4550 = vmatpush3.bf16.msra.mxu1 %v5012_v45 }
 0x2d8   :  { %v4651_v55 = vadd.f32 %v1542_v53, %v5939_v39  ;;  %v1544_v1 = vpop.f32.mrb[53].mxu0  ;;  %4567 = vmatprep.subr.bf16.mxu1 %v5013_v49 }
 0x2d9   :  { %v4652_v51 = vadd.f32 %v1544_v1, %v5942_v13  ;;  %v1546_v3 = vpop.f32.mrb[54].mxu0  ;;  %1815 = vmatprep.mubr.bf16.mxu1 %v1612_v0 }
 0x2da   :  { %v4653_v4 = vadd.f32 %v1546_v3, %v5939_v39  ;;  %v1548_v6 = vpop.f32.mrb[55].mxu0  ;;  %1816 = vmatmul.mubr.bf16.gmra.mrb[48].mxu1 %v1611_v63  ;;  %v1591_v8 = vmax.f32 %v4651_v55, 0.0 }
 0x2db   :  { %v4654_v7 = vadd.f32 %v1548_v6, %v5942_v13  ;;  %v1592_v10 = vmax.f32 %v4652_v51, 0.0 }
 0x2dc   :  { %v1593_v9 = vmax.f32 %v4653_v4, 0.0 }
 0x2dd   :  { %v1594_v11 = vmax.f32 %v4654_v7, 0.0 }
 0x2de   :  { %v1613_v12 = vpack.c.bf16 %v1593_v9, %v1591_v8 }
 0x2df   :  { %v1614_v14 = vpack.c.bf16 %v1594_v11, %v1592_v10  ;;  %v1552_v15 = vpop.f32.mrb[56].mxu0  ;;  %v5014_v11 = vld [vmem:[#allocation7 + $0x8] sm:$0xff]  }
 0x2e0   :  { %v4655_v17 = vadd.f32 %v1552_v15, %v5939_v39  ;;  %v1554_v18 = vpop.f32.mrb[57].mxu0 }
 0x2e1   :  { %v4656_v19 = vadd.f32 %v1554_v18, %v5942_v13  ;;  %v1556_v20 = vpop.f32.mrb[58].mxu0  ;;  %1823 = vmatprep.mubr.bf16.mxu1 %v1614_v14  ;;  %v5015_v18 = vld [vmem:[#allocation7 + $0x10] sm:$0xff]  }
 0x2e2   :  { %v4657_v21 = vadd.f32 %v1556_v20, %v5939_v39  ;;  %v1558_v22 = vpop.f32.mrb[59].mxu0  ;;  %1824 = vmatmul.mubr.bf16.gmra.mrb[52].mxu1 %v1613_v12  ;;  %v1595_v24 = vmax.f32 %v4655_v17, 0.0 }
 0x2e3   :  { %v4658_v23 = vadd.f32 %v1558_v22, %v5942_v13  ;;  %v1596_v26 = vmax.f32 %v4656_v19, 0.0 }
 0x2e4   :  { %v1597_v25 = vmax.f32 %v4657_v21, 0.0 }
 0x2e5   :  { %v1598_v30 = vmax.f32 %v4658_v23, 0.0 }
 0x2e6   :  { %v1615_v28 = vpack.c.bf16 %v1597_v25, %v1595_v24 }
 0x2e7   :  { %v1616_v29 = vpack.c.bf16 %v1598_v30, %v1596_v26  ;;  %v1562_v31 = vpop.f32.mrb[60].mxu0  ;;  %v5016_v26 = vld [vmem:[#allocation7 + $0x18] sm:$0xff]  }
 0x2e8   :  { %v4659_v32 = vadd.f32 %v1562_v31, %v5939_v39  ;;  %v1564_v33 = vpop.f32.mrb[61].mxu0 }
 0x2e9   :  { %v4660_v34 = vadd.f32 %v1564_v33, %v5942_v13  ;;  %v1566_v35 = vpop.f32.mrb[62].mxu0  ;;  %1831 = vmatprep.mubr.bf16.mxu1 %v1616_v29 }
 0x2ea   :  { %v4661_v37 = vadd.f32 %v1566_v35, %v5939_v39  ;;  %v1568_v38 = vpop.f32.mrb[63].mxu0  ;;  %1832 = vmatmul.mubr.bf16.gmra.mrb[56].mxu1 %v1615_v28  ;;  %v1599_v41 = vmax.f32 %v4659_v32, 0.0  ;;  %v1653_v39 = vsub.s32 2, %v5763_v50  ;;  %v5017_v32 = vld [vmem:[#allocation7 + $0x20] sm:$0xff]  }
 0x2eb   :  { %v4662_v40 = vadd.f32 %v1568_v38, %v5942_v13  ;;  %v1600_v27 = vmax.f32 %v4660_v34, 0.0  ;;  %v5980_v13 = vld [vmem:[%s6435_s9] sm:$0xff] }
 0x2ec   :  { %v1601_v42 = vmax.f32 %v4661_v37, 0.0  ;;  %v5983_v36 = vrot.slane %v5980_v13, %v1653_v39 }
 0x2ed   :  { %v1602_v5 = vmax.f32 %v4662_v40, 0.0 }
 0x2ee   :  { %v1617_v43 = vpack.c.bf16 %v1601_v42, %v1599_v41  ;;  %v5018_v42 = vld [vmem:[#allocation7 + $0x28] sm:$0xff]  }
 0x2ef   :  { %v1618_v44 = vpack.c.bf16 %v1602_v5, %v1600_v27 }
 0x2f1   :  { %1839 = vmatprep.mubr.bf16.mxu1 %v1618_v44 }
 0x2f2   :  { %1840 = vmatmul.mubr.bf16.gmra.mrb[60].mxu1 %v1617_v43 }
 0x38d   :  { %v4455_v2 = vpop.f32.mrb[32].mxu1 }
 0x38e   :  { %v4456_v16 = vpop.f32.mrb[33].mxu1 }
 0x38f   :  { %v4457_v47 = vadd.f32 %v4456_v16, %v4455_v2  ;;  %v4458_v48 = vpop.f32.mrb[34].mxu1 }
 0x390   :  { %v4459_v56 = vpop.f32.mrb[35].mxu1 }
 0x391   :  { %v1786_v57 = vadd.f32 %v4457_v47, %v5983_v36  ;;  %v4460_v58 = vadd.f32 %v4459_v56, %v4458_v48 }
 0x393   :  { %v1789_v59 = vadd.f32 %v4460_v58, %v5983_v36  ;;  %v1848_v60 = vmax.f32 %v1786_v57, 0.0 }
 0x395   :  { %v1849_v61 = vmax.f32 %v1789_v59, 0.0  ;;  %v4461_v62 = vpop.f32.mrb[36].mxu1 }
 0x396   :  { %v4462_v54 = vpop.f32.mrb[37].mxu1 }
 0x397   :  { %v4463_v52 = vadd.f32 %v4462_v54, %v4461_v62  ;;  %v4464_v63 = vpop.f32.mrb[38].mxu1  ;;  %v1864_v0 = vpack.c.bf16 %v1849_v61, %v1848_v60 }
 0x398   :  { %v4465_v53 = vpop.f32.mrb[39].mxu1 }
 0x399   :  { %v1794_v55 = vadd.f32 %v4463_v52, %v5983_v36  ;;  %v4466_v1 = vadd.f32 %v4465_v53, %v4464_v63  ;;  %4551 = vmatprep.mubr.bf16.mxu1 %v1864_v0 }
 0x39b   :  { %v1797_v51 = vadd.f32 %v4466_v1, %v5983_v36  ;;  %v1850_v3 = vmax.f32 %v1794_v55, 0.0 }
 0x39d   :  { %v1851_v4 = vmax.f32 %v1797_v51, 0.0  ;;  %v4467_v6 = vpop.f32.mrb[40].mxu1 }
 0x39e   :  { %v4468_v7 = vpop.f32.mrb[41].mxu1 }
 0x39f   :  { %v1865_v8 = vpack.c.bf16 %v1851_v4, %v1850_v3  ;;  %v4469_v9 = vadd.f32 %v4468_v7, %v4467_v6  ;;  %v4470_v10 = vpop.f32.mrb[42].mxu1 }
 0x3a0   :  { %v4471_v12 = vpop.f32.mrb[43].mxu1 }
 0x3a1   :  { %v1802_v14 = vadd.f32 %v4469_v9, %v5983_v36  ;;  %v4472_v15 = vadd.f32 %v4471_v12, %v4470_v10  ;;  %4552 = vmatmul.mubr.bf16.vlgmr.msra.gmra.mrb[64].mxu1 %v1865_v8 }
 0x3a2   :  { %4568 = vmatpush3.bf16.msra.mxu1 %v5013_v49 }
 0x3a3   :  { %v1805_v17 = vadd.f32 %v4472_v15, %v5983_v36  ;;  %4569 = vmatprep.subr.bf16.mxu1 %v5014_v11  ;;  %v1852_v19 = vmax.f32 %v1802_v14, 0.0 }
 0x3a5   :  { %v1853_v20 = vmax.f32 %v1805_v17, 0.0  ;;  %v4473_v21 = vpop.f32.mrb[44].mxu1 }
 0x3a6   :  { %v4474_v22 = vpop.f32.mrb[45].mxu1  ;;  %4570 = vmatpush3.bf16.msra.mxu1 %v5014_v11 }
 0x3a7   :  { %v4475_v23 = vadd.f32 %v4474_v22, %v4473_v21  ;;  %v4476_v24 = vpop.f32.mrb[46].mxu1  ;;  %v1866_v25 = vpack.c.bf16 %v1853_v20, %v1852_v19  ;;  %4571 = vmatprep.subr.bf16.mxu1 %v5015_v18  ;;  %v5019_v19 = vld [vmem:[#allocation7 + $0x30] sm:$0xff]   ;;  %v5020_v20 = vld [vmem:[#allocation7 + $0x38] sm:$0xff]   ;;  %v5021_v21 = vld [vmem:[#allocation9] ss:$8 sps:$4 sm:$0xff]  }
 0x3a8   :  { %v4477_v30 = vpop.f32.mrb[47].mxu1  ;;  %v5023_v22 = vld [vmem:[#allocation9 + $0x4] ss:$8 sps:$4 sm:$0xff]  }
 0x3a9   :  { %v1810_v28 = vadd.f32 %v4475_v23, %v5983_v36  ;;  %v4478_v29 = vadd.f32 %v4477_v30, %v4476_v24  ;;  %4555 = vmatprep.mubr.bf16.mxu1 %v1866_v25  ;;  %v5026_v23 = vld [vmem:[#allocation9 + $0x14] ss:$8 sps:$4 sm:$0xff]   ;;  %2354 = vmatprep.subr.bf16.mxu0 %v5023_v22  ;;  %v5024_v24 = vld [vmem:[#allocation9 + $0x10] ss:$8 sps:$4 sm:$0xff]   ;;  %v5029_v25 = vld [vmem:[#allocation9 + $0x24] ss:$8 sps:$4 sm:$0xff]  }
 0x3aa   :  { %4572 = vmatpush3.bf16.msra.mxu1 %v5015_v18  ;;  %2355 = vmatpush1.bf16.msra.mxu0 %v5021_v21  ;;  %v5030_v30 = vld [vmem:[#allocation9 + $0x30] ss:$8 sps:$4 sm:$0xff]  }
 0x3ab   :  { %v1813_v31 = vadd.f32 %v4478_v29, %v5983_v36  ;;  %4573 = vmatprep.subr.bf16.mxu1 %v5016_v26  ;;  %v1854_v33 = vmax.f32 %v1810_v28, 0.0  ;;  %2356 = vmatprep.subr.bf16.mxu0 %v5026_v23  ;;  %v5035_v28 = vld [vmem:[#allocation9 + $0x44] ss:$8 sps:$4 sm:$0xff]   ;;  %v5033_v29 = vld [vmem:[#allocation9 + $0x40] ss:$8 sps:$4 sm:$0xff]  }
 0x3ad   :  { %v1855_v34 = vmax.f32 %v1813_v31, 0.0  ;;  %v4479_v35 = vpop.f32.mrb[48].mxu1  ;;  %v5038_v31 = vld [vmem:[#allocation9 + $0x54] ss:$8 sps:$4 sm:$0xff]  }
 0x3ae   :  { %v4480_v37 = vpop.f32.mrb[49].mxu1  ;;  %4574 = vmatpush3.bf16.msra.mxu1 %v5016_v26  ;;  %2357 = vmatpush1.bf16.msra.mxu0 %v5024_v24  ;;  %v5032_v26 = vld [vmem:[#allocation9 + $0x34] ss:$8 sps:$4 sm:$0xff]  }
 0x3af   :  { %v4481_v38 = vadd.f32 %v4480_v37, %v4479_v35  ;;  %v4482_v40 = vpop.f32.mrb[50].mxu1  ;;  %v1867_v41 = vpack.c.bf16 %v1855_v34, %v1854_v33  ;;  %4575 = vmatprep.subr.bf16.mxu1 %v5017_v32  ;;  %2358 = vmatprep.subr.bf16.mxu0 %v5029_v25  ;;  %v5041_v33 = vld [vmem:[#allocation9 + $0x64] ss:$8 sps:$4 sm:$0xff]   ;;  %v5039_v34 = vld [vmem:[#allocation9 + $0x60] ss:$8 sps:$4 sm:$0xff]   ;;  %v1890_v35 = vsub.s32 3, %v5763_v50 }
 0x3b0   :  { %v4483_v27 = vpop.f32.mrb[51].mxu1 }
 0x3b1   :  { %v1818_v5 = vadd.f32 %v4481_v38, %v5983_v36  ;;  %v4484_v43 = vadd.f32 %v4483_v27, %v4482_v40  ;;  %4556 = vmatmul.mubr.bf16.gmra.mrb[68].mxu1 %v1867_v41  ;;  %v1891_v37 = vrot.slane %v5980_v13, %v1890_v35  ;;  %v5047_v35 = vld [vmem:[#allocation10 + $0x4] ss:$16 sps:$4 sm:$0xff]  }
 0x3b2   :  { %4576 = vmatpush3.bf16.msra.mxu1 %v5017_v32  ;;  %v5036_v32 = vld [vmem:[#allocation9 + $0x50] ss:$8 sps:$4 sm:$0xff]  }
 0x3b3   :  { %v1821_v44 = vadd.f32 %v4484_v43, %v5983_v36  ;;  %4577 = vmatprep.subr.bf16.mxu1 %v5018_v42  ;;  %v1856_v46 = vmax.f32 %v1818_v5, 0.0 }
 0x3b5   :  { %v1857_v45 = vmax.f32 %v1821_v44, 0.0  ;;  %v4485_v49 = vpop.f32.mrb[52].mxu1 }
 0x3b6   :  { %v4486_v39 = vpop.f32.mrb[53].mxu1  ;;  %4578 = vmatpush3.bf16.msra.mxu1 %v5018_v42 }
 0x3b7   :  { %v4487_v2 = vadd.f32 %v4486_v39, %v4485_v49  ;;  %v4488_v16 = vpop.f32.mrb[54].mxu1  ;;  %v1868_v47 = vpack.c.bf16 %v1857_v45, %v1856_v46  ;;  %4579 = vmatprep.subr.bf16.mxu1 %v5019_v19 }
 0x3b8   :  { %v4489_v48 = vpop.f32.mrb[55].mxu1 }
 0x3b9   :  { %v1826_v56 = vadd.f32 %v4487_v2, %v5983_v36  ;;  %v4490_v57 = vadd.f32 %v4489_v48, %v4488_v16  ;;  %4559 = vmatprep.mubr.bf16.mxu1 %v1868_v47 }
 0x3ba   :  { %4580 = vmatpush3.bf16.msra.mxu1 %v5019_v19 }
 0x3bb   :  { %v1829_v58 = vadd.f32 %v4490_v57, %v5983_v36  ;;  %v1858_v59 = vmax.f32 %v1826_v56, 0.0  ;;  %4581 = vmatprep.subr.bf16.mxu1 %v5020_v20 }
 0x3bd   :  { %v1859_v60 = vmax.f32 %v1829_v58, 0.0  ;;  %v4491_v61 = vpop.f32.mrb[56].mxu1 }
 0x3be   :  { %v4492_v62 = vpop.f32.mrb[57].mxu1  ;;  %4582 = vmatpush3.bf16.msra.mxu1 %v5020_v20 }
 0x3bf   :  { %v4493_v54 = vadd.f32 %v4492_v62, %v4491_v61  ;;  %v4494_v52 = vpop.f32.mrb[58].mxu1  ;;  %v1869_v63 = vpack.c.bf16 %v1859_v60, %v1858_v59  ;;  %2915 = vmatprep.subr.bf16.mxu1 %v5047_v35 }
 0x3c0   :  { %v4495_v0 = vpop.f32.mrb[59].mxu1 }
 0x3c1   :  { %v1834_v53 = vadd.f32 %v4493_v54, %v5983_v36  ;;  %v4496_v55 = vadd.f32 %v4495_v0, %v4494_v52  ;;  %4560 = vmatmul.mubr.bf16.gmra.mrb[72].mxu1 %v1869_v63 }
 0x3c3   :  { %v1837_v1 = vadd.f32 %v4496_v55, %v5983_v36  ;;  %v1860_v51 = vmax.f32 %v1834_v53, 0.0 }
 0x3c5   :  { %v1861_v3 = vmax.f32 %v1837_v1, 0.0  ;;  %v4497_v4 = vpop.f32.mrb[60].mxu1 }
 0x3c6   :  { %v4498_v6 = vpop.f32.mrb[61].mxu1 }
 0x3c7   :  { %v4499_v7 = vadd.f32 %v4498_v6, %v4497_v4  ;;  %v4500_v8 = vpop.f32.mrb[62].mxu1  ;;  %v1870_v9 = vpack.c.bf16 %v1861_v3, %v1860_v51 }
 0x3c8   :  { %v4501_v10 = vpop.f32.mrb[63].mxu1 }
 0x3c9   :  { %v1842_v11 = vadd.f32 %v4499_v7, %v5983_v36  ;;  %v4502_v12 = vadd.f32 %v4501_v10, %v4500_v8  ;;  %4563 = vmatprep.mubr.bf16.mxu1 %v1870_v9 }
 0x3cb   :  { %v1845_v14 = vadd.f32 %v4502_v12, %v5983_v36  ;;  %v1862_v15 = vmax.f32 %v1842_v11, 0.0  ;;  %v5027_v36 = vld [vmem:[#allocation9 + $0x20] ss:$8 sps:$4 sm:$0xff]  }
 0x3cc   :  { %2359 = vmatpush1.bf16.msra.mxu0 %v5027_v36 }
 0x3cd   :  { %v1863_v17 = vmax.f32 %v1845_v14, 0.0  ;;  %2360 = vmatprep.subr.bf16.mxu0 %v5032_v26 }
 0x3cf   :  { %v1871_v18 = vpack.c.bf16 %v1863_v17, %v1862_v15 }
 0x3d0   :  { %2361 = vmatpush1.bf16.msra.mxu0 %v5030_v30 }
 0x3d1   :  { %4564 = vmatmul.mubr.bf16.gmra.mrb[76].mxu1 %v1871_v18  ;;  %2362 = vmatprep.subr.bf16.mxu0 %v5035_v28 }
 0x3d4   :  { %2363 = vmatpush1.bf16.msra.mxu0 %v5033_v29 }
 0x3d5   :  { %2364 = vmatprep.subr.bf16.mxu0 %v5038_v31  ;;  %v5042_v31 = vld [vmem:[#allocation9 + $0x70] ss:$8 sps:$4 sm:$0xff]  }
 0x3d8   :  { %2365 = vmatpush1.bf16.msra.mxu0 %v5036_v32  ;;  %v5044_v32 = vld [vmem:[#allocation9 + $0x74] ss:$8 sps:$4 sm:$0xff]  }
 0x3d9   :  { %2366 = vmatprep.subr.bf16.mxu0 %v5041_v33  ;;  %v5546_v33 = vmov 0  }
 0x3da   :  { %2386 = vmatprep.mubr.bf16.mxu0 %v5546_v33 }
 0x3dc   :  { %2367 = vmatpush1.bf16.msra.mxu0 %v5039_v34  ;;  %v5045_v34 = vld [vmem:[#allocation10] ss:$16 sps:$4 sm:$0xff]  }
 0x3dd   :  { %2368 = vmatprep.subr.bf16.mxu0 %v5044_v32  ;;  %v5074_v32 = vld [vmem:[#allocation10 + $0x8c] ss:$16 sps:$4 sm:$0xff]  }
 0x3e0   :  { %2369 = vmatpush1.bf16.msra.mxu0 %v5042_v31 }
 0x474   :  { %v4553_v38 = vpop.f32.mrb[64].mxu1 }
 0x475   :  { %v1983_v40 = vadd.f32 %v4553_v38, %v1891_v37  ;;  %v1974_v41 = vpop.f32.mrb[65].mxu1  ;;  %v5050_v38 = vld [vmem:[#allocation10 + $0xc] ss:$16 sps:$4 sm:$0xff]  }
 0x476   :  { %v1975_v42 = vadd.f32 %v1974_v41, %v1891_v37  ;;  %v4554_v27 = vpop.f32.mrb[66].mxu1  ;;  %3028 = vmatprep.subr.bf16.mxu0 %v5050_v38  ;;  %v5059_v41 = vld [vmem:[#allocation10 + $0x44] ss:$16 sps:$4 sm:$0xff]  }
 0x477   :  { %v1986_v5 = vadd.f32 %v4554_v27, %v1891_v37  ;;  %v1977_v43 = vpop.f32.mrb[67].mxu1  ;;  %v2039_v46 = vmax.f32 %v1983_v40, 0.0  ;;  %v5053_v40 = vld [vmem:[#allocation10 + $0x24] ss:$16 sps:$4 sm:$0xff]  }
 0x478   :  { %v1978_v44 = vadd.f32 %v1977_v43, %v1891_v37  ;;  %v2037_v49 = vmax.f32 %v1975_v42, 0.0  ;;  %v5057_v42 = vld [vmem:[#allocation10 + $0x40] ss:$16 sps:$4 sm:$0xff]   ;;  %v5065_v27 = vld [vmem:[#allocation10 + $0x64] ss:$16 sps:$4 sm:$0xff]  }
 0x479   :  { %v2040_v45 = vmax.f32 %v1986_v5, 0.0  ;;  %v5063_v5 = vld [vmem:[#allocation10 + $0x60] ss:$16 sps:$4 sm:$0xff]   ;;  %v5071_v43 = vld [vmem:[#allocation10 + $0x84] ss:$16 sps:$4 sm:$0xff]  }
 0x47a   :  { %v2038_v39 = vmax.f32 %v1978_v44, 0.0  ;;  %v5069_v44 = vld [vmem:[#allocation10 + $0x80] ss:$16 sps:$4 sm:$0xff]  }
 0x47b   :  { %v2054_v2 = vpack.c.bf16 %v2040_v45, %v2039_v46  ;;  %v5077_v46 = vld [vmem:[#allocation10 + $0xa4] ss:$16 sps:$4 sm:$0xff]   ;;  %v5075_v45 = vld [vmem:[#allocation10 + $0xa0] ss:$16 sps:$4 sm:$0xff]  }
 0x47c   :  { %v2053_v16 = vpack.c.bf16 %v2038_v39, %v2037_v49  ;;  %v5083_v49 = vld [vmem:[#allocation10 + $0xc4] ss:$16 sps:$4 sm:$0xff]   ;;  %v5081_v39 = vld [vmem:[#allocation10 + $0xc0] ss:$16 sps:$4 sm:$0xff]  }
 0x47e   :  { %4583 = vmatprep.mubr.bf16.mxu1 %v2053_v16  ;;  %v5087_v16 = vld [vmem:[#allocation10 + $0xe0] ss:$16 sps:$4 sm:$0xff]  }
 0x47f   :  { %4584 = vmatmul.mubr.bf16.vlgmr.msra.gmra.mrb[80].mxu1 %v2054_v2  ;;  %v5089_v2 = vld [vmem:[#allocation10 + $0xe4] ss:$16 sps:$4 sm:$0xff]  }
 0x480   :  { %2916 = vmatpush1.bf16.msra.mxu1 %v5045_v34 }
 0x481   :  { %2917 = vmatprep.subr.bf16.mxu1 %v5053_v40 }
 0x484   :  { %v4557_v47 = vpop.f32.mrb[68].mxu1 }
 0x485   :  { %v1999_v48 = vadd.f32 %v4557_v47, %v1891_v37  ;;  %v1990_v56 = vpop.f32.mrb[69].mxu1  ;;  %v5095_v47 = vld [vmem:[#allocation10 + $0x104] ss:$16 sps:$4 sm:$0xff]  }
 0x486   :  { %v1991_v57 = vadd.f32 %v1990_v56, %v1891_v37  ;;  %v4558_v58 = vpop.f32.mrb[70].mxu1  ;;  %v5101_v56 = vld [vmem:[#allocation10 + $0x124] ss:$16 sps:$4 sm:$0xff]  }
 0x487   :  { %v2002_v59 = vadd.f32 %v4558_v58, %v1891_v37  ;;  %v1993_v60 = vpop.f32.mrb[71].mxu1  ;;  %v2043_v62 = vmax.f32 %v1999_v48, 0.0  ;;  %v5093_v48 = vld [vmem:[#allocation10 + $0x100] ss:$16 sps:$4 sm:$0xff]   ;;  %v5107_v58 = vld [vmem:[#allocation10 + $0x144] ss:$16 sps:$4 sm:$0xff]  }
 0x488   :  { %v1994_v61 = vadd.f32 %v1993_v60, %v1891_v37  ;;  %v2041_v52 = vmax.f32 %v1991_v57, 0.0  ;;  %v5099_v57 = vld [vmem:[#allocation10 + $0x120] ss:$16 sps:$4 sm:$0xff]   ;;  %v5113_v60 = vld [vmem:[#allocation10 + $0x164] ss:$16 sps:$4 sm:$0xff]  }
 0x489   :  { %v2044_v54 = vmax.f32 %v2002_v59, 0.0  ;;  %v5105_v59 = vld [vmem:[#allocation10 + $0x140] ss:$16 sps:$4 sm:$0xff]  }
 0x48a   :  { %v2042_v63 = vmax.f32 %v1994_v61, 0.0  ;;  %v5111_v61 = vld [vmem:[#allocation10 + $0x160] ss:$16 sps:$4 sm:$0xff]  }
 0x48b   :  { %v2056_v0 = vpack.c.bf16 %v2044_v54, %v2043_v62  ;;  %v5119_v62 = vld [vmem:[#allocation10 + $0x184] ss:$16 sps:$4 sm:$0xff]   ;;  %v5117_v54 = vld [vmem:[#allocation10 + $0x180] ss:$16 sps:$4 sm:$0xff]  }
 0x48c   :  { %v2055_v53 = vpack.c.bf16 %v2042_v63, %v2041_v52  ;;  %v5125_v52 = vld [vmem:[#allocation10 + $0x1a4] ss:$16 sps:$4 sm:$0xff]   ;;  %v5123_v63 = vld [vmem:[#allocation10 + $0x1a0] ss:$16 sps:$4 sm:$0xff]  }
 0x48e   :  { %4587 = vmatprep.mubr.bf16.mxu1 %v2055_v53 }
 0x48f   :  { %4588 = vmatmul.mubr.bf16.gmra.mrb[84].mxu1 %v2056_v0  ;;  %v2079_v0 = vsub.s32 4, %v5763_v50 }
 0x491   :  { %v6006_v53 = vrot.slane %v5980_v13, %v2079_v0  ;;  %v5104_v0 = vld [vmem:[#allocation10 + $0x12c] ss:$16 sps:$4 sm:$0xff]  }
 0x494   :  { %v4561_v55 = vpop.f32.mrb[72].mxu1 }
 0x495   :  { %v2015_v1 = vadd.f32 %v4561_v55, %v1891_v37  ;;  %v2006_v51 = vpop.f32.mrb[73].mxu1 }
 0x496   :  { %v2007_v3 = vadd.f32 %v2006_v51, %v1891_v37  ;;  %v4562_v4 = vpop.f32.mrb[74].mxu1 }
 0x497   :  { %v2018_v6 = vadd.f32 %v4562_v4, %v1891_v37  ;;  %v2009_v7 = vpop.f32.mrb[75].mxu1  ;;  %v2047_v9 = vmax.f32 %v2015_v1, 0.0 }
 0x498   :  { %v2010_v8 = vadd.f32 %v2009_v7, %v1891_v37  ;;  %v2045_v11 = vmax.f32 %v2007_v3, 0.0 }
 0x499   :  { %v2048_v10 = vmax.f32 %v2018_v6, 0.0 }
 0x49a   :  { %v2046_v12 = vmax.f32 %v2010_v8, 0.0 }
 0x49b   :  { %v2058_v14 = vpack.c.bf16 %v2048_v10, %v2047_v9 }
 0x49c   :  { %v2057_v15 = vpack.c.bf16 %v2046_v12, %v2045_v11 }
 0x49e   :  { %4591 = vmatprep.mubr.bf16.mxu1 %v2057_v15  ;;  %v5048_v15 = vld [vmem:[#allocation10 + $0x8] ss:$16 sps:$4 sm:$0xff]  }
 0x49f   :  { %4592 = vmatmul.mubr.bf16.gmra.mrb[88].mxu1 %v2058_v14 }
 0x4a4   :  { %v4565_v17 = vpop.f32.mrb[76].mxu1 }
 0x4a5   :  { %v2031_v18 = vadd.f32 %v4565_v17, %v1891_v37  ;;  %v2022_v19 = vpop.f32.mrb[77].mxu1 }
 0x4a6   :  { %v2023_v20 = vadd.f32 %v2022_v19, %v1891_v37  ;;  %v4566_v21 = vpop.f32.mrb[78].mxu1  ;;  %v5054_v19 = vld [vmem:[#allocation10 + $0x28] ss:$16 sps:$4 sm:$0xff]  }
 0x4a7   :  { %v2034_v22 = vadd.f32 %v4566_v21, %v1891_v37  ;;  %v2025_v23 = vpop.f32.mrb[79].mxu1  ;;  %v2051_v25 = vmax.f32 %v2031_v18, 0.0  ;;  %v5056_v18 = vld [vmem:[#allocation10 + $0x2c] ss:$16 sps:$4 sm:$0xff]   ;;  %v5060_v21 = vld [vmem:[#allocation10 + $0x48] ss:$16 sps:$4 sm:$0xff]  }
 0x4a8   :  { %v2026_v24 = vadd.f32 %v2025_v23, %v1891_v37  ;;  %v2049_v26 = vmax.f32 %v2023_v20, 0.0  ;;  %v5051_v37 = vld [vmem:[#allocation10 + $0x20] ss:$16 sps:$4 sm:$0xff]   ;;  %v5062_v20 = vld [vmem:[#allocation10 + $0x4c] ss:$16 sps:$4 sm:$0xff]  }
 0x4a9   :  { %v2052_v36 = vmax.f32 %v2034_v22, 0.0  ;;  %2918 = vmatpush1.bf16.msra.mxu1 %v5051_v37  ;;  %v5068_v23 = vld [vmem:[#allocation10 + $0x6c] ss:$16 sps:$4 sm:$0xff]  }
 0x4aa   :  { %v2050_v30 = vmax.f32 %v2026_v24, 0.0  ;;  %2919 = vmatprep.subr.bf16.mxu1 %v5059_v41  ;;  %v5072_v41 = vld [vmem:[#allocation10 + $0x88] ss:$16 sps:$4 sm:$0xff]  }
 0x4ab   :  { %v2060_v28 = vpack.c.bf16 %v2052_v36, %v2051_v25 }
 0x4ac   :  { %v2059_v29 = vpack.c.bf16 %v2050_v30, %v2049_v26 }
 0x4ad   :  { %2920 = vmatpush1.bf16.msra.mxu1 %v5057_v42 }
 0x4ae   :  { %4595 = vmatprep.mubr.bf16.mxu1 %v2059_v29  ;;  %2921 = vmatprep.subr.bf16.mxu1 %v5065_v27  ;;  %v5066_v29 = vld [vmem:[#allocation10 + $0x68] ss:$16 sps:$4 sm:$0xff]   ;;  %v5080_v27 = vld [vmem:[#allocation10 + $0xac] ss:$16 sps:$4 sm:$0xff]  }
 0x4af   :  { %4596 = vmatmul.mubr.bf16.gmra.mrb[92].mxu1 %v2060_v28 }
 0x4b1   :  { %2922 = vmatpush1.bf16.msra.mxu1 %v5063_v5  ;;  %v5078_v5 = vld [vmem:[#allocation10 + $0xa8] ss:$16 sps:$4 sm:$0xff]  }
 0x4b2   :  { %2923 = vmatprep.subr.bf16.mxu1 %v5071_v43  ;;  %v5086_v43 = vld [vmem:[#allocation10 + $0xcc] ss:$16 sps:$4 sm:$0xff]  }
 0x4b5   :  { %2924 = vmatpush1.bf16.msra.mxu1 %v5069_v44  ;;  %v5084_v44 = vld [vmem:[#allocation10 + $0xc8] ss:$16 sps:$4 sm:$0xff]  }
 0x4b6   :  { %2925 = vmatprep.subr.bf16.mxu1 %v5077_v46 }
 0x4b9   :  { %2926 = vmatpush1.bf16.msra.mxu1 %v5075_v45  ;;  %v5092_v45 = vld [vmem:[#allocation10 + $0xec] ss:$16 sps:$4 sm:$0xff]  }
 0x4ba   :  { %2927 = vmatprep.subr.bf16.mxu1 %v5083_v49 }
 0x4bd   :  { %2928 = vmatpush1.bf16.msra.mxu1 %v5081_v39 }
 0x4be   :  { %2929 = vmatprep.subr.bf16.mxu1 %v5089_v2 }
 0x4c1   :  { %2930 = vmatpush1.bf16.msra.mxu1 %v5087_v16 }
 0x4c2   :  { %2931 = vmatprep.subr.bf16.mxu1 %v5095_v47 }
 0x4c5   :  { %2932 = vmatpush1.bf16.msra.mxu1 %v5093_v48 }
 0x4c6   :  { %2933 = vmatprep.subr.bf16.mxu1 %v5101_v56  ;;  %v5090_v56 = vld [vmem:[#allocation10 + $0xe8] ss:$16 sps:$4 sm:$0xff]  }
 0x4c9   :  { %2934 = vmatpush1.bf16.msra.mxu1 %v5099_v57 }
 0x4ca   :  { %2935 = vmatprep.subr.bf16.mxu1 %v5107_v58  ;;  %v5098_v58 = vld [vmem:[#allocation10 + $0x10c] ss:$16 sps:$4 sm:$0xff]  }
 0x4cd   :  { %2936 = vmatpush1.bf16.msra.mxu1 %v5105_v59 }
 0x4ce   :  { %2937 = vmatprep.subr.bf16.mxu1 %v5113_v60 }
 0x4d1   :  { %2938 = vmatpush1.bf16.msra.mxu1 %v5111_v61 }
 0x4d2   :  { %2939 = vmatprep.subr.bf16.mxu1 %v5119_v62 }
 0x4d5   :  { %2940 = vmatpush1.bf16.msra.mxu1 %v5117_v54 }
 0x4d6   :  { %2941 = vmatprep.subr.bf16.mxu1 %v5125_v52  ;;  %v5096_v52 = vld [vmem:[#allocation10 + $0x108] ss:$16 sps:$4 sm:$0xff]  }
 0x4d9   :  { %2942 = vmatpush1.bf16.msra.mxu1 %v5123_v63 }
 0x552   :  { %v4585_v55 = vpop.f32.mrb[80].mxu1 }
 0x553   :  { %v2172_v1 = vadd.f32 %v4585_v55, %v6006_v53  ;;  %v2163_v51 = vpop.f32.mrb[81].mxu1  ;;  %v5102_v55 = vld [vmem:[#allocation10 + $0x128] ss:$16 sps:$4 sm:$0xff]  }
 0x554   :  { %v2164_v3 = vadd.f32 %v2163_v51, %v6006_v53  ;;  %v4586_v4 = vpop.f32.mrb[82].mxu1  ;;  %v5108_v51 = vld [vmem:[#allocation10 + $0x148] ss:$16 sps:$4 sm:$0xff]  }
 0x555   :  { %v2175_v6 = vadd.f32 %v4586_v4, %v6006_v53  ;;  %v2166_v7 = vpop.f32.mrb[83].mxu1  ;;  %v2228_v9 = vmax.f32 %v2172_v1, 0.0  ;;  %v5110_v1 = vld [vmem:[#allocation10 + $0x14c] ss:$16 sps:$4 sm:$0xff]  }
 0x556   :  { %v2167_v8 = vadd.f32 %v2166_v7, %v6006_v53  ;;  %v2226_v11 = vmax.f32 %v2164_v3, 0.0  ;;  %v5116_v4 = vld [vmem:[#allocation10 + $0x16c] ss:$16 sps:$4 sm:$0xff]  }
 0x557   :  { %v2229_v10 = vmax.f32 %v2175_v6, 0.0 }
 0x558   :  { %v2227_v12 = vmax.f32 %v2167_v8, 0.0 }
 0x559   :  { %v2243_v14 = vpack.c.bf16 %v2229_v10, %v2228_v9 }
 0x55a   :  { %v2242_v17 = vpack.c.bf16 %v2227_v12, %v2226_v11  ;;  %v5114_v12 = vld [vmem:[#allocation10 + $0x168] ss:$16 sps:$4 sm:$0xff]  }
 0x55c   :  { %2387 = vmatmul.mubr.bf16.vlgmr.msra.gmra.mrb[64].mxu0 %v2242_v17 }
 0x55d   :  { %2396 = vmatprep.mubr.bf16.mxu0 %v5546_v33  ;;  %3029 = vmatpush1.bf16.msra.mxu0 %v5048_v15  ;;  %v5122_v15 = vld [vmem:[#allocation10 + $0x18c] ss:$16 sps:$4 sm:$0xff]  }
 0x55e   :  { %3030 = vmatprep.subr.bf16.mxu0 %v5056_v18 }
 0x561   :  { %3031 = vmatpush1.bf16.msra.mxu0 %v5054_v19 }
 0x562   :  { %v4589_v22 = vpop.f32.mrb[84].mxu1  ;;  %3032 = vmatprep.subr.bf16.mxu0 %v5062_v20 }
 0x563   :  { %v2188_v24 = vadd.f32 %v4589_v22, %v6006_v53  ;;  %v2179_v25 = vpop.f32.mrb[85].mxu1  ;;  %v5120_v22 = vld [vmem:[#allocation10 + $0x188] ss:$16 sps:$4 sm:$0xff]  }
 0x564   :  { %v2180_v36 = vadd.f32 %v2179_v25, %v6006_v53  ;;  %v4590_v26 = vpop.f32.mrb[86].mxu1  ;;  %2397 = vmatmul.mubr.bf16.gmra.mrb[68].mxu0 %v2243_v14  ;;  %v5126_v25 = vld [vmem:[#allocation10 + $0x1a8] ss:$16 sps:$4 sm:$0xff]  }
 0x565   :  { %v2191_v30 = vadd.f32 %v4590_v26, %v6006_v53  ;;  %v2182_v28 = vpop.f32.mrb[87].mxu1  ;;  %2406 = vmatprep.mubr.bf16.mxu0 %v5546_v33  ;;  %3033 = vmatpush1.bf16.msra.mxu0 %v5060_v21  ;;  %v2232_v34 = vmax.f32 %v2188_v24, 0.0  ;;  %v5128_v24 = vld [vmem:[#allocation10 + $0x1ac] ss:$16 sps:$4 sm:$0xff]   ;;  %v5129_v26 = vld [vmem:[#allocation10 + $0x1c0] ss:$16 sps:$4 sm:$0xff]  }
 0x566   :  { %v2183_v31 = vadd.f32 %v2182_v28, %v6006_v53  ;;  %3034 = vmatprep.subr.bf16.mxu0 %v5068_v23  ;;  %v2230_v38 = vmax.f32 %v2180_v36, 0.0  ;;  %v5134_v36 = vld [vmem:[#allocation10 + $0x1cc] ss:$16 sps:$4 sm:$0xff]   ;;  %v5137_v28 = vld [vmem:[#allocation10 + $0x1e4] ss:$16 sps:$4 sm:$0xff]  }
 0x567   :  { %v2233_v35 = vmax.f32 %v2191_v30, 0.0  ;;  %v5132_v30 = vld [vmem:[#allocation10 + $0x1c8] ss:$16 sps:$4 sm:$0xff]  }
 0x568   :  { %v2231_v40 = vmax.f32 %v2183_v31, 0.0  ;;  %v5135_v31 = vld [vmem:[#allocation10 + $0x1e0] ss:$16 sps:$4 sm:$0xff]  }
 0x569   :  { %v2245_v37 = vpack.c.bf16 %v2233_v35, %v2232_v34  ;;  %3035 = vmatpush1.bf16.msra.mxu0 %v5066_v29  ;;  %v5140_v29 = vld [vmem:[#allocation10 + $0x1ec] ss:$16 sps:$4 sm:$0xff]   ;;  %v2268_v35 = vsub.s32 5, %v5763_v50 }
 0x56a   :  { %v2244_v42 = vpack.c.bf16 %v2231_v40, %v2230_v38  ;;  %3036 = vmatprep.subr.bf16.mxu0 %v5074_v32  ;;  %v5138_v32 = vld [vmem:[#allocation10 + $0x1e8] ss:$16 sps:$4 sm:$0xff]   ;;  %v6031_v34 = vld [vmem:[#allocation12 + $0x104] ss:$8 sps:$4 sm:$0xff]  }
 0x56b   :  { %v6036_v38 = vrot.slane %v5980_v13, %v2268_v35  ;;  %v6041_v40 = vld [vmem:[%s6435_s9 + $0x8] sm:$0xff] }
 0x56c   :  { %2407 = vmatmul.mubr.bf16.gmra.mrb[72].mxu0 %v2244_v42 }
 0x56d   :  { %2416 = vmatprep.mubr.bf16.mxu0 %v5546_v33  ;;  %3037 = vmatpush1.bf16.msra.mxu0 %v5072_v41 }
 0x56e   :  { %3038 = vmatprep.subr.bf16.mxu0 %v5080_v27 }
 0x571   :  { %3039 = vmatpush1.bf16.msra.mxu0 %v5078_v5 }
 0x572   :  { %v4593_v46 = vpop.f32.mrb[88].mxu1  ;;  %3040 = vmatprep.subr.bf16.mxu0 %v5086_v43 }
 0x573   :  { %v2204_v49 = vadd.f32 %v4593_v46, %v6006_v53  ;;  %v2195_v39 = vpop.f32.mrb[89].mxu1 }
 0x574   :  { %v2196_v2 = vadd.f32 %v2195_v39, %v6006_v53  ;;  %v4594_v16 = vpop.f32.mrb[90].mxu1  ;;  %2417 = vmatmul.mubr.bf16.gmra.mrb[76].mxu0 %v2245_v37  ;;  %v6044_v37 = vrot.slane %v6041_v40, %v2268_v35 }
 0x575   :  { %v2207_v47 = vadd.f32 %v4594_v16, %v6006_v53  ;;  %v2198_v48 = vpop.f32.mrb[91].mxu1  ;;  %2426 = vmatprep.mubr.bf16.mxu0 %v5546_v33  ;;  %3041 = vmatpush1.bf16.msra.mxu0 %v5084_v44  ;;  %v2236_v59 = vmax.f32 %v2204_v49, 0.0 }
 0x576   :  { %v2199_v57 = vadd.f32 %v2198_v48, %v6006_v53  ;;  %3042 = vmatprep.subr.bf16.mxu0 %v5092_v45  ;;  %v2234_v61 = vmax.f32 %v2196_v2, 0.0 }
 0x577   :  { %v2237_v60 = vmax.f32 %v2207_v47, 0.0 }
 0x578   :  { %v2235_v62 = vmax.f32 %v2199_v57, 0.0  ;;  %v6050_v57 = vld [vmem:[#allocation12 + $0x100] ss:$8 sps:$4 sm:$0xff]  }
 0x579   :  { %v2247_v54 = vpack.c.bf16 %v2237_v60, %v2236_v59  ;;  %3043 = vmatpush1.bf16.msra.mxu0 %v5090_v56  ;;  %v5141_v56 = vld [vmem:[#allocation12] ss:$8 sps:$4 sm:$0xff]   ;;  %v5149_v60 = vld [vmem:[#allocation12 + $0x14] ss:$8 sps:$4 sm:$0xff]  }
 0x57a   :  { %v2246_v63 = vpack.c.bf16 %v2235_v62, %v2234_v61  ;;  %3044 = vmatprep.subr.bf16.mxu0 %v5098_v58  ;;  %v6053_v61 = vld [vmem:[#allocation12 + $0x114] ss:$8 sps:$4 sm:$0xff]  }
 0x57c   :  { %2427 = vmatmul.mubr.bf16.gmra.mrb[80].mxu0 %v2246_v63 }
 0x57d   :  { %2436 = vmatprep.mubr.bf16.mxu0 %v5546_v33  ;;  %3045 = vmatpush1.bf16.msra.mxu0 %v5096_v52 }
 0x57e   :  { %3046 = vmatprep.subr.bf16.mxu0 %v5104_v0 }
 0x581   :  { %3047 = vmatpush1.bf16.msra.mxu0 %v5102_v55  ;;  %v5147_v55 = vld [vmem:[#allocation12 + $0x10] ss:$8 sps:$4 sm:$0xff]  }
 0x582   :  { %v4597_v3 = vpop.f32.mrb[92].mxu1  ;;  %3048 = vmatprep.subr.bf16.mxu0 %v5110_v1  ;;  %v6059_v1 = vld [vmem:[#allocation12 + $0x110] ss:$8 sps:$4 sm:$0xff]  }
 0x583   :  { %v2220_v6 = vadd.f32 %v4597_v3, %v6006_v53  ;;  %v2211_v7 = vpop.f32.mrb[93].mxu1 }
 0x584   :  { %v2212_v8 = vadd.f32 %v2211_v7, %v6006_v53  ;;  %v4598_v9 = vpop.f32.mrb[94].mxu1  ;;  %2437 = vmatmul.mubr.bf16.gmra.mrb[84].mxu0 %v2247_v54 }
 0x585   :  { %v2223_v10 = vadd.f32 %v4598_v9, %v6006_v53  ;;  %v2214_v11 = vpop.f32.mrb[95].mxu1  ;;  %2446 = vmatprep.mubr.bf16.mxu0 %v5546_v33  ;;  %3049 = vmatpush1.bf16.msra.mxu0 %v5108_v51  ;;  %v2240_v17 = vmax.f32 %v2220_v6, 0.0  ;;  %v6062_v6 = vld [vmem:[#allocation12 + $0x124] ss:$8 sps:$4 sm:$0xff]  }
 0x586   :  { %v2215_v14 = vadd.f32 %v2214_v11, %v6006_v53  ;;  %3050 = vmatprep.subr.bf16.mxu0 %v5116_v4  ;;  %v2238_v19 = vmax.f32 %v2212_v8, 0.0  ;;  %v5131_v53 = vld [vmem:[#allocation10 + $0x1c4] ss:$16 sps:$4 sm:$0xff]  }
 0x587   :  { %v2241_v18 = vmax.f32 %v2223_v10, 0.0  ;;  %2943 = vmatprep.subr.bf16.mxu1 %v5131_v53  ;;  %v5155_v4 = vld [vmem:[#allocation12 + $0x24] ss:$8 sps:$4 sm:$0xff]   ;;  %v6075_v53 = vld [vmem:[#allocation12 + $0x130] ss:$8 sps:$4 sm:$0xff]  }
 0x588   :  { %v2239_v20 = vmax.f32 %v2215_v14, 0.0  ;;  %2944 = vmatpush1.bf16.msra.mxu1 %v5129_v26  ;;  %v6065_v14 = vld [vmem:[#allocation12 + $0x120] ss:$8 sps:$4 sm:$0xff]  }
 0x589   :  { %v2249_v21 = vpack.c.bf16 %v2241_v18, %v2240_v17  ;;  %3051 = vmatpush1.bf16.msra.mxu0 %v5114_v12  ;;  %2945 = vmatprep.subr.bf16.mxu1 %v5137_v28  ;;  %v5153_v12 = vld [vmem:[#allocation12 + $0x20] ss:$8 sps:$4 sm:$0xff]   ;;  %v5161_v18 = vld [vmem:[#allocation12 + $0x34] ss:$8 sps:$4 sm:$0xff]   ;;  %v6078_v28 = vld [vmem:[#allocation12 + $0x144] ss:$8 sps:$4 sm:$0xff]  }
 0x58a   :  { %v2248_v23 = vpack.c.bf16 %v2239_v20, %v2238_v19  ;;  %3052 = vmatprep.subr.bf16.mxu0 %v5122_v15  ;;  %v6069_v19 = vld [vmem:[#allocation12 + $0x134] ss:$8 sps:$4 sm:$0xff]  }
 0x58c   :  { %2447 = vmatmul.mubr.bf16.gmra.mrb[88].mxu0 %v2248_v23  ;;  %2946 = vmatpush1.bf16.msra.mxu1 %v5135_v31 }
 0x58d   :  { %2456 = vmatprep.mubr.bf16.mxu0 %v5546_v33  ;;  %3053 = vmatpush1.bf16.msra.mxu0 %v5120_v22  ;;  %v5143_v33 = vld [vmem:[#allocation12 + $0x4] ss:$8 sps:$4 sm:$0xff]  }
 0x58e   :  { %3054 = vmatprep.subr.bf16.mxu0 %v5128_v24  ;;  %3629 = vmatprep.subr.bf16.mxu1 %v5143_v33 }
 0x591   :  { %3055 = vmatpush1.bf16.msra.mxu0 %v5126_v25  ;;  %v5159_v25 = vld [vmem:[#allocation12 + $0x30] ss:$8 sps:$4 sm:$0xff]  }
 0x592   :  { %3056 = vmatprep.subr.bf16.mxu0 %v5134_v36 }
 0x594   :  { %2457 = vmatmul.mubr.bf16.gmra.mrb[92].mxu0 %v2249_v21 }
 0x595   :  { %3057 = vmatpush1.bf16.msra.mxu0 %v5132_v30  ;;  %v5167_v30 = vld [vmem:[#allocation12 + $0x44] ss:$8 sps:$4 sm:$0xff]  }
 0x596   :  { %3058 = vmatprep.subr.bf16.mxu0 %v5140_v29 }
 0x599   :  { %3059 = vmatpush1.bf16.msra.mxu0 %v5138_v32 }
 0x59a   :  { %3742 = vmatprep.subr.bf16.mxu0 %v6031_v34 }
 0x62f   :  { %v2388_v41 = vpop.f32.mrb[64].mxu0 }
 0x630   :  { %v2389_v42 = vadd.f32 %v2388_v41, %v6036_v38  ;;  %v2390_v27 = vpop.f32.mrb[65].mxu0  ;;  %v5165_v41 = vld [vmem:[#allocation12 + $0x40] ss:$8 sps:$4 sm:$0xff]  }
 0x631   :  { %v2391_v5 = vadd.f32 %v2390_v27, %v6044_v37  ;;  %v2392_v43 = vpop.f32.mrb[66].mxu0 }
 0x632   :  { %v2393_v44 = vadd.f32 %v2392_v43, %v6036_v38  ;;  %v2394_v46 = vpop.f32.mrb[67].mxu0  ;;  %v2467_v45 = vmax.f32 %v2389_v42, 0.0  ;;  %v6081_v42 = vld [vmem:[#allocation12 + $0x140] ss:$8 sps:$4 sm:$0xff]   ;;  %v5173_v43 = vld [vmem:[#allocation12 + $0x54] ss:$8 sps:$4 sm:$0xff]  }
 0x633   :  { %v2395_v13 = vadd.f32 %v2394_v46, %v6044_v37  ;;  %v2468_v39 = vmax.f32 %v2391_v5, 0.0 }
 0x634   :  { %v2469_v49 = vmax.f32 %v2393_v44, 0.0  ;;  %v6085_v44 = vld [vmem:[#allocation12 + $0x154] ss:$8 sps:$4 sm:$0xff]  }
 0x635   :  { %v2470_v2 = vmax.f32 %v2395_v13, 0.0 }
 0x636   :  { %v2499_v16 = vpack.c.bf16 %v2469_v49, %v2467_v45 }
 0x637   :  { %v2500_v47 = vpack.c.bf16 %v2470_v2, %v2468_v39  ;;  %v2398_v48 = vpop.f32.mrb[68].mxu0  ;;  %v5171_v2 = vld [vmem:[#allocation12 + $0x50] ss:$8 sps:$4 sm:$0xff]  }
 0x638   :  { %v2399_v58 = vadd.f32 %v2398_v48, %v6036_v38  ;;  %v2400_v59 = vpop.f32.mrb[69].mxu0 }
 0x639   :  { %v2401_v62 = vadd.f32 %v2400_v59, %v6044_v37  ;;  %v2402_v54 = vpop.f32.mrb[70].mxu0  ;;  %2947 = vmatprep.mubr.bf16.mxu1 %v2500_v47  ;;  %3060 = vmatprep.mubr.bf16.mxu0 %v2500_v47 }
 0x63a   :  { %v2403_v52 = vadd.f32 %v2402_v54, %v6036_v38  ;;  %v2404_v63 = vpop.f32.mrb[71].mxu0  ;;  %2948 = vmatmul.mubr.bf16.vlgmr.msra.gmra.mrb[96].mxu1 %v2499_v16  ;;  %3061 = vmatmul.mubr.bf16.vlgmr.msra.gmra.mrb[96].mxu0 %v2499_v16  ;;  %v2471_v51 = vmax.f32 %v2399_v58, 0.0  ;;  %v6091_v16 = vld [vmem:[#allocation12 + $0x150] ss:$8 sps:$4 sm:$0xff]   ;;  %v6094_v58 = vld [vmem:[#allocation12 + $0x164] ss:$8 sps:$4 sm:$0xff]  }
 0x63b   :  { %v2405_v0 = vadd.f32 %v2404_v63, %v6044_v37  ;;  %3630 = vmatpush1.bf16.msra.mxu1 %v5141_v56  ;;  %3743 = vmatpush1.bf16.msra.mxu0 %v6050_v57  ;;  %v2472_v7 = vmax.f32 %v2401_v62, 0.0  ;;  %v5179_v56 = vld [vmem:[#allocation12 + $0x64] ss:$8 sps:$4 sm:$0xff]   ;;  %v5177_v63 = vld [vmem:[#allocation12 + $0x60] ss:$8 sps:$4 sm:$0xff]  }
 0x63c   :  { %v2473_v3 = vmax.f32 %v2403_v52, 0.0  ;;  %3631 = vmatprep.subr.bf16.mxu1 %v5149_v60  ;;  %3744 = vmatprep.subr.bf16.mxu0 %v6053_v61 }
 0x63d   :  { %v2474_v8 = vmax.f32 %v2405_v0, 0.0  ;;  %v6097_v0 = vld [vmem:[#allocation12 + $0x160] ss:$8 sps:$4 sm:$0xff]  }
 0x63e   :  { %v2501_v9 = vpack.c.bf16 %v2473_v3, %v2471_v51  ;;  %v5185_v3 = vld [vmem:[#allocation12 + $0x74] ss:$8 sps:$4 sm:$0xff]  }
 0x63f   :  { %v2502_v10 = vpack.c.bf16 %v2474_v8, %v2472_v7  ;;  %v2408_v11 = vpop.f32.mrb[72].mxu0  ;;  %3632 = vmatpush1.bf16.msra.mxu1 %v5147_v55  ;;  %3745 = vmatpush1.bf16.msra.mxu0 %v6059_v1 }
 0x640   :  { %v2409_v15 = vadd.f32 %v2408_v11, %v6036_v38  ;;  %v2410_v17 = vpop.f32.mrb[73].mxu0  ;;  %3633 = vmatprep.subr.bf16.mxu1 %v5155_v4  ;;  %3746 = vmatprep.subr.bf16.mxu0 %v6062_v6  ;;  %v6101_v4 = vld [vmem:[#allocation12 + $0x174] ss:$8 sps:$4 sm:$0xff]  }
 0x641   :  { %v2411_v20 = vadd.f32 %v2410_v17, %v6044_v37  ;;  %v2412_v21 = vpop.f32.mrb[74].mxu0  ;;  %2957 = vmatprep.mubr.bf16.mxu1 %v2502_v10  ;;  %3070 = vmatprep.mubr.bf16.mxu0 %v2502_v10 }
 0x642   :  { %v2413_v22 = vadd.f32 %v2412_v21, %v6036_v38  ;;  %v2414_v23 = vpop.f32.mrb[75].mxu0  ;;  %2958 = vmatmul.mubr.bf16.gmra.mrb[100].mxu1 %v2501_v9  ;;  %3071 = vmatmul.mubr.bf16.gmra.mrb[100].mxu0 %v2501_v9  ;;  %v2475_v36 = vmax.f32 %v2409_v15, 0.0  ;;  %v6107_v15 = vld [vmem:[#allocation12 + $0x170] ss:$8 sps:$4 sm:$0xff]   ;;  %v6110_v21 = vld [vmem:[#allocation12 + $0x184] ss:$8 sps:$4 sm:$0xff]  }
 0x643   :  { %v2415_v24 = vadd.f32 %v2414_v23, %v6044_v37  ;;  %3634 = vmatpush1.bf16.msra.mxu1 %v5153_v12  ;;  %3747 = vmatpush1.bf16.msra.mxu0 %v6065_v14  ;;  %v2476_v29 = vmax.f32 %v2411_v20, 0.0  ;;  %v5183_v12 = vld [vmem:[#allocation12 + $0x70] ss:$8 sps:$4 sm:$0xff]   ;;  %v5191_v20 = vld [vmem:[#allocation12 + $0x84] ss:$8 sps:$4 sm:$0xff]  }
 0x644   :  { %v2477_v26 = vmax.f32 %v2413_v22, 0.0  ;;  %3635 = vmatprep.subr.bf16.mxu1 %v5161_v18  ;;  %3748 = vmatprep.subr.bf16.mxu0 %v6069_v19 }
 0x645   :  { %v2478_v31 = vmax.f32 %v2415_v24, 0.0 }
 0x646   :  { %v2503_v32 = vpack.c.bf16 %v2477_v26, %v2475_v36  ;;  %v5189_v26 = vld [vmem:[#allocation12 + $0x80] ss:$8 sps:$4 sm:$0xff]  }
 0x647   :  { %v2504_v33 = vpack.c.bf16 %v2478_v31, %v2476_v29  ;;  %v2418_v35 = vpop.f32.mrb[76].mxu0  ;;  %3636 = vmatpush1.bf16.msra.mxu1 %v5159_v25  ;;  %3749 = vmatpush1.bf16.msra.mxu0 %v6075_v53 }
 0x648   :  { %v2419_v27 = vadd.f32 %v2418_v35, %v6036_v38  ;;  %v2420_v5 = vpop.f32.mrb[77].mxu0  ;;  %3637 = vmatprep.subr.bf16.mxu1 %v5167_v30  ;;  %3750 = vmatprep.subr.bf16.mxu0 %v6078_v28  ;;  %v6113_v30 = vld [vmem:[#allocation12 + $0x180] ss:$8 sps:$4 sm:$0xff]  }
 0x649   :  { %v2421_v46 = vadd.f32 %v2420_v5, %v6044_v37  ;;  %v2422_v13 = vpop.f32.mrb[78].mxu0  ;;  %2967 = vmatprep.mubr.bf16.mxu1 %v2504_v33  ;;  %3080 = vmatprep.mubr.bf16.mxu0 %v2504_v33  ;;  %v6117_v33 = vld [vmem:[#allocation12 + $0x194] ss:$8 sps:$4 sm:$0xff]  }
 0x64a   :  { %v2423_v45 = vadd.f32 %v2422_v13, %v6036_v38  ;;  %v2424_v49 = vpop.f32.mrb[79].mxu0  ;;  %2968 = vmatmul.mubr.bf16.gmra.mrb[104].mxu1 %v2503_v32  ;;  %3081 = vmatmul.mubr.bf16.gmra.mrb[104].mxu0 %v2503_v32  ;;  %v2479_v47 = vmax.f32 %v2419_v27, 0.0  ;;  %v5197_v32 = vld [vmem:[#allocation12 + $0x94] ss:$8 sps:$4 sm:$0xff]   ;;  %v6123_v13 = vld [vmem:[#allocation12 + $0x190] ss:$8 sps:$4 sm:$0xff]  }
 0x64b   :  { %v2425_v39 = vadd.f32 %v2424_v49, %v6044_v37  ;;  %3638 = vmatpush1.bf16.msra.mxu1 %v5165_v41  ;;  %3751 = vmatpush1.bf16.msra.mxu0 %v6081_v42  ;;  %v2480_v59 = vmax.f32 %v2421_v46, 0.0  ;;  %v5195_v46 = vld [vmem:[#allocation12 + $0x90] ss:$8 sps:$4 sm:$0xff]  }
 0x64c   :  { %v2481_v48 = vmax.f32 %v2423_v45, 0.0  ;;  %3639 = vmatprep.subr.bf16.mxu1 %v5173_v43  ;;  %3752 = vmatprep.subr.bf16.mxu0 %v6085_v44 }
 0x64d   :  { %v2482_v60 = vmax.f32 %v2425_v39, 0.0  ;;  %v5203_v39 = vld [vmem:[#allocation12 + $0xa4] ss:$8 sps:$4 sm:$0xff]  }
 0x64e   :  { %v2505_v62 = vpack.c.bf16 %v2481_v48, %v2479_v47 }
 0x64f   :  { %v2506_v54 = vpack.c.bf16 %v2482_v60, %v2480_v59  ;;  %v2428_v52 = vpop.f32.mrb[80].mxu0  ;;  %3640 = vmatpush1.bf16.msra.mxu1 %v5171_v2  ;;  %3753 = vmatpush1.bf16.msra.mxu0 %v6091_v16  ;;  %v6126_v2 = vld [vmem:[#allocation12 + $0x1a4] ss:$8 sps:$4 sm:$0xff]  }
 0x650   :  { %v2429_v55 = vadd.f32 %v2428_v52, %v6036_v38  ;;  %v2430_v51 = vpop.f32.mrb[81].mxu0  ;;  %3641 = vmatprep.subr.bf16.mxu1 %v5179_v56  ;;  %3754 = vmatprep.subr.bf16.mxu0 %v6094_v58 }
 0x651   :  { %v2431_v7 = vadd.f32 %v2430_v51, %v6044_v37  ;;  %v2432_v8 = vpop.f32.mrb[82].mxu0  ;;  %2977 = vmatprep.mubr.bf16.mxu1 %v2506_v54  ;;  %3090 = vmatprep.mubr.bf16.mxu0 %v2506_v54  ;;  %v6129_v54 = vld [vmem:[#allocation12 + $0x1a0] ss:$8 sps:$4 sm:$0xff]   ;;  %v6133_v51 = vld [vmem:[#allocation12 + $0x1b4] ss:$8 sps:$4 sm:$0xff]  }
 0x652   :  { %v2433_v9 = vadd.f32 %v2432_v8, %v6036_v38  ;;  %v2434_v10 = vpop.f32.mrb[83].mxu0  ;;  %2978 = vmatmul.mubr.bf16.gmra.mrb[108].mxu1 %v2505_v62  ;;  %3091 = vmatmul.mubr.bf16.gmra.mrb[108].mxu0 %v2505_v62  ;;  %v2483_v17 = vmax.f32 %v2429_v55, 0.0  ;;  %v5201_v62 = vld [vmem:[#allocation12 + $0xa0] ss:$8 sps:$4 sm:$0xff]   ;;  %v5209_v55 = vld [vmem:[#allocation12 + $0xb4] ss:$8 sps:$4 sm:$0xff]  }
 0x653   :  { %v2435_v11 = vadd.f32 %v2434_v10, %v6044_v37  ;;  %3642 = vmatpush1.bf16.msra.mxu1 %v5177_v63  ;;  %3755 = vmatpush1.bf16.msra.mxu0 %v6097_v0  ;;  %v2484_v22 = vmax.f32 %v2431_v7, 0.0 }
 0x654   :  { %v2485_v18 = vmax.f32 %v2433_v9, 0.0  ;;  %3643 = vmatprep.subr.bf16.mxu1 %v5185_v3  ;;  %3756 = vmatprep.subr.bf16.mxu0 %v6101_v4 }
 0x655   :  { %v2486_v23 = vmax.f32 %v2435_v11, 0.0  ;;  %v5207_v11 = vld [vmem:[#allocation12 + $0xb0] ss:$8 sps:$4 sm:$0xff]  }
 0x656   :  { %v2507_v24 = vpack.c.bf16 %v2485_v18, %v2483_v17 }
 0x657   :  { %v2508_v25 = vpack.c.bf16 %v2486_v23, %v2484_v22  ;;  %v2438_v36 = vpop.f32.mrb[84].mxu0  ;;  %3644 = vmatpush1.bf16.msra.mxu1 %v5183_v12  ;;  %3757 = vmatpush1.bf16.msra.mxu0 %v6107_v15  ;;  %v6139_v12 = vld [vmem:[#allocation12 + $0x1b0] ss:$8 sps:$4 sm:$0xff]   ;;  %v6142_v22 = vld [vmem:[#allocation12 + $0x1c4] ss:$8 sps:$4 sm:$0xff]  }
 0x658   :  { %v2439_v29 = vadd.f32 %v2438_v36, %v6036_v38  ;;  %v2440_v31 = vpop.f32.mrb[85].mxu0  ;;  %3645 = vmatprep.subr.bf16.mxu1 %v5191_v20  ;;  %3758 = vmatprep.subr.bf16.mxu0 %v6110_v21  ;;  %v5215_v20 = vld [vmem:[#allocation12 + $0xc4] ss:$8 sps:$4 sm:$0xff]  }
 0x659   :  { %v2441_v35 = vadd.f32 %v2440_v31, %v6044_v37  ;;  %v2442_v41 = vpop.f32.mrb[86].mxu0  ;;  %2987 = vmatprep.mubr.bf16.mxu1 %v2508_v25  ;;  %3100 = vmatprep.mubr.bf16.mxu0 %v2508_v25  ;;  %v6145_v31 = vld [vmem:[#allocation12 + $0x1c0] ss:$8 sps:$4 sm:$0xff]  }
 0x65a   :  { %v2443_v27 = vadd.f32 %v2442_v41, %v6036_v38  ;;  %v2444_v5 = vpop.f32.mrb[87].mxu0  ;;  %2988 = vmatmul.mubr.bf16.gmra.mrb[112].mxu1 %v2507_v24  ;;  %3101 = vmatmul.mubr.bf16.gmra.mrb[112].mxu0 %v2507_v24  ;;  %v2487_v45 = vmax.f32 %v2439_v29, 0.0  ;;  %v5213_v29 = vld [vmem:[#allocation12 + $0xc0] ss:$8 sps:$4 sm:$0xff]   ;;  %v5221_v41 = vld [vmem:[#allocation12 + $0xd4] ss:$8 sps:$4 sm:$0xff]  }
 0x65b   :  { %v2445_v43 = vadd.f32 %v2444_v5, %v6044_v37  ;;  %3646 = vmatpush1.bf16.msra.mxu1 %v5189_v26  ;;  %3759 = vmatpush1.bf16.msra.mxu0 %v6113_v30  ;;  %v2488_v47 = vmax.f32 %v2441_v35, 0.0 }
 0x65c   :  { %v2489_v49 = vmax.f32 %v2443_v27, 0.0  ;;  %3647 = vmatprep.subr.bf16.mxu1 %v5197_v32  ;;  %3760 = vmatprep.subr.bf16.mxu0 %v6117_v33  ;;  %v6149_v27 = vld [vmem:[#allocation12 + $0x1d4] ss:$8 sps:$4 sm:$0xff]  }
 0x65d   :  { %v2490_v48 = vmax.f32 %v2445_v43, 0.0 }
 0x65e   :  { %v2509_v56 = vpack.c.bf16 %v2489_v49, %v2487_v45 }
 0x65f   :  { %v2510_v59 = vpack.c.bf16 %v2490_v48, %v2488_v47  ;;  %v2448_v60 = vpop.f32.mrb[88].mxu0  ;;  %3648 = vmatpush1.bf16.msra.mxu1 %v5195_v46  ;;  %3761 = vmatpush1.bf16.msra.mxu0 %v6123_v13  ;;  %v6155_v47 = vld [vmem:[#allocation12 + $0x1d0] ss:$8 sps:$4 sm:$0xff]  }
 0x660   :  { %v2449_v52 = vadd.f32 %v2448_v60, %v6036_v38  ;;  %v2450_v63 = vpop.f32.mrb[89].mxu0  ;;  %3649 = vmatprep.subr.bf16.mxu1 %v5203_v39  ;;  %3762 = vmatprep.subr.bf16.mxu0 %v6126_v2  ;;  %v5219_v39 = vld [vmem:[#allocation12 + $0xd0] ss:$8 sps:$4 sm:$0xff]  }
 0x661   :  { %v2451_v3 = vadd.f32 %v2450_v63, %v6044_v37  ;;  %v2452_v7 = vpop.f32.mrb[90].mxu0  ;;  %2997 = vmatprep.mubr.bf16.mxu1 %v2510_v59  ;;  %3110 = vmatprep.mubr.bf16.mxu0 %v2510_v59  ;;  %v5225_v63 = vld [vmem:[#allocation12 + $0xe0] ss:$8 sps:$4 sm:$0xff]  }
 0x662   :  { %v2453_v8 = vadd.f32 %v2452_v7, %v6036_v38  ;;  %v2454_v9 = vpop.f32.mrb[91].mxu0  ;;  %2998 = vmatmul.mubr.bf16.gmra.mrb[116].mxu1 %v2509_v56  ;;  %3111 = vmatmul.mubr.bf16.gmra.mrb[116].mxu0 %v2509_v56  ;;  %v2491_v17 = vmax.f32 %v2449_v52, 0.0  ;;  %v6159_v52 = vld [vmem:[#allocation12 + $0x1e4] ss:$8 sps:$4 sm:$0xff]   ;;  %v6165_v7 = vld [vmem:[#allocation12 + $0x1f4] ss:$8 sps:$4 sm:$0xff]  }
 0x663   :  { %v2455_v10 = vadd.f32 %v2454_v9, %v6044_v37  ;;  %3650 = vmatpush1.bf16.msra.mxu1 %v5201_v62  ;;  %3763 = vmatpush1.bf16.msra.mxu0 %v6129_v54  ;;  %v2492_v23 = vmax.f32 %v2451_v3, 0.0  ;;  %v5233_v3 = vld [vmem:[#allocation12 + $0xf4] ss:$8 sps:$4 sm:$0xff]   ;;  %v6167_v9 = vld [vmem:[#allocation12 + $0x1f0] ss:$8 sps:$4 sm:$0xff]  }
 0x664   :  { %v2493_v18 = vmax.f32 %v2453_v8, 0.0  ;;  %3651 = vmatprep.subr.bf16.mxu1 %v5209_v55  ;;  %3764 = vmatprep.subr.bf16.mxu0 %v6133_v51  ;;  %v6161_v55 = vld [vmem:[#allocation12 + $0x1e0] ss:$8 sps:$4 sm:$0xff]   ;;  %v5231_v8 = vld [vmem:[#allocation12 + $0xf0] ss:$8 sps:$4 sm:$0xff]  }
 0x665   :  { %v2494_v24 = vmax.f32 %v2455_v10, 0.0  ;;  %v2581_v10 = vsub.s32 6, %v5763_v50 }
 0x666   :  { %v2511_v25 = vpack.c.bf16 %v2493_v18, %v2491_v17  ;;  %v5368_v18 = vld [vmem:[%s6435_s9 + $0x10] sm:$0xff] }
 0x667   :  { %v2512_v36 = vpack.c.bf16 %v2494_v24, %v2492_v23  ;;  %v2458_v26 = vpop.f32.mrb[92].mxu0  ;;  %3652 = vmatpush1.bf16.msra.mxu1 %v5207_v11  ;;  %3765 = vmatpush1.bf16.msra.mxu0 %v6139_v12  ;;  %v6176_v11 = vld [vmem:[%s6435_s9] sm:$0xff]  ;;  %v6187_v23 = vrot.slane %v6041_v40, %v2581_v10 }
 0x668   :  { %v2459_v32 = vadd.f32 %v2458_v26, %v6036_v38  ;;  %v2460_v35 = vpop.f32.mrb[93].mxu0  ;;  %3653 = vmatprep.subr.bf16.mxu1 %v5215_v20  ;;  %3766 = vmatprep.subr.bf16.mxu0 %v6142_v22  ;;  %v6179_v17 = vrot.slane %v6176_v11, %v2581_v10  ;;  %v6184_v20 = vrot.slane %v5368_v18, %v2581_v10 }
 0x669   :  { %v2461_v5 = vadd.f32 %v2460_v35, %v6044_v37  ;;  %v2462_v43 = vpop.f32.mrb[94].mxu0  ;;  %3007 = vmatprep.mubr.bf16.mxu1 %v2512_v36  ;;  %3120 = vmatprep.mubr.bf16.mxu0 %v2512_v36 }
 0x66a   :  { %v2463_v46 = vadd.f32 %v2462_v43, %v6036_v38  ;;  %v2464_v45 = vpop.f32.mrb[95].mxu0  ;;  %3008 = vmatmul.mubr.bf16.gmra.mrb[120].mxu1 %v2511_v25  ;;  %3121 = vmatmul.mubr.bf16.gmra.mrb[120].mxu0 %v2511_v25  ;;  %v2495_v48 = vmax.f32 %v2459_v32, 0.0 }
 0x66b   :  { %v2465_v49 = vadd.f32 %v2464_v45, %v6044_v37  ;;  %3654 = vmatpush1.bf16.msra.mxu1 %v5213_v29  ;;  %3767 = vmatpush1.bf16.msra.mxu0 %v6145_v31  ;;  %v2496_v59 = vmax.f32 %v2461_v5, 0.0  ;;  %v5227_v37 = vld [vmem:[#allocation12 + $0xe4] ss:$8 sps:$4 sm:$0xff]  }
 0x66c   :  { %v2497_v56 = vmax.f32 %v2463_v46, 0.0  ;;  %3655 = vmatprep.subr.bf16.mxu1 %v5221_v41  ;;  %3768 = vmatprep.subr.bf16.mxu0 %v6149_v27 }
 0x66d   :  { %v2498_v60 = vmax.f32 %v2465_v49, 0.0 }
 0x66e   :  { %v2513_v62 = vpack.c.bf16 %v2497_v56, %v2495_v48 }
 0x66f   :  { %v2514_v38 = vpack.c.bf16 %v2498_v60, %v2496_v59  ;;  %3656 = vmatpush1.bf16.msra.mxu1 %v5219_v39  ;;  %3769 = vmatpush1.bf16.msra.mxu0 %v6155_v47 }
 0x670   :  { %3657 = vmatprep.subr.bf16.mxu1 %v5227_v37  ;;  %3770 = vmatprep.subr.bf16.mxu0 %v6159_v52 }
 0x671   :  { %3017 = vmatprep.mubr.bf16.mxu1 %v2514_v38  ;;  %3130 = vmatprep.mubr.bf16.mxu0 %v2514_v38 }
 0x672   :  { %3018 = vmatmul.mubr.bf16.gmra.mrb[124].mxu1 %v2513_v62  ;;  %3131 = vmatmul.mubr.bf16.gmra.mrb[124].mxu0 %v2513_v62 }
 0x673   :  { %3658 = vmatpush1.bf16.msra.mxu1 %v5225_v63  ;;  %3771 = vmatpush1.bf16.msra.mxu0 %v6161_v55 }
 0x674   :  { %3659 = vmatprep.subr.bf16.mxu1 %v5233_v3  ;;  %3772 = vmatprep.subr.bf16.mxu0 %v6165_v7 }
 0x677   :  { %3660 = vmatpush1.bf16.msra.mxu1 %v5231_v8  ;;  %3773 = vmatpush1.bf16.msra.mxu0 %v6167_v9 }
 0x678   :  { %4599 = vmatprep.subr.bf16.mxu1 %v6031_v34  ;;  %v5369_v34 = vld [vmem:[%s6435_s9 + $0x18] sm:$0xff] }
 0x679   :  { %v6192_v24 = vrot.slane %v5369_v34, %v2581_v10 }
 0x70d   :  { %v2949_v25 = vpop.f32.mrb[96].mxu1  ;;  %v3062_v36 = vpop.f32.mrb[96].mxu0 }
 0x70e   :  { %v2950_v26 = vadd.f32 %v2949_v25, %v6179_v17  ;;  %v3063_v29 = vadd.f32 %v3062_v36, %v6184_v20  ;;  %v2951_v32 = vpop.f32.mrb[97].mxu1  ;;  %v3064_v35 = vpop.f32.mrb[97].mxu0 }
 0x70f   :  { %v2952_v41 = vadd.f32 %v2951_v32, %v6187_v23  ;;  %v3065_v5 = vadd.f32 %v3064_v35, %v6192_v24  ;;  %v2953_v40 = vpop.f32.mrb[98].mxu1  ;;  %v3066_v43 = vpop.f32.mrb[98].mxu0 }
 0x710   :  { %v2954_v46 = vadd.f32 %v2953_v40, %v6179_v17  ;;  %v3067_v45 = vadd.f32 %v3066_v43, %v6184_v20  ;;  %v2955_v49 = vpop.f32.mrb[99].mxu1  ;;  %v3068_v39 = vpop.f32.mrb[99].mxu0  ;;  %v3141_v59 = vmax.f32 %v2950_v26, 0.0  ;;  %v3143_v60 = vmax.f32 %v3063_v29, 0.0 }
 0x711   :  { %v2956_v48 = vadd.f32 %v2955_v49, %v6187_v23  ;;  %v3069_v56 = vadd.f32 %v3068_v39, %v6192_v24  ;;  %v3142_v37 = vmax.f32 %v2952_v41, 0.0  ;;  %v3144_v63 = vmax.f32 %v3065_v5, 0.0 }
 0x712   :  { %v3145_v62 = vmax.f32 %v2954_v46, 0.0  ;;  %v3147_v38 = vmax.f32 %v3067_v45, 0.0 }
 0x713   :  { %v3146_v3 = vmax.f32 %v2956_v48, 0.0  ;;  %v3148_v8 = vmax.f32 %v3069_v56, 0.0 }
 0x714   :  { %v3205_v10 = vpack.c.bf16 %v3145_v62, %v3141_v59  ;;  %v3207_v18 = vpack.c.bf16 %v3147_v38, %v3143_v60 }
 0x715   :  { %v3206_v34 = vpack.c.bf16 %v3146_v3, %v3142_v37  ;;  %v3208_v25 = vpack.c.bf16 %v3148_v8, %v3144_v63  ;;  %v2959_v36 = vpop.f32.mrb[100].mxu1  ;;  %v3072_v32 = vpop.f32.mrb[100].mxu0 }
 0x716   :  { %v2960_v35 = vadd.f32 %v2959_v36, %v6179_v17  ;;  %v3073_v40 = vadd.f32 %v3072_v32, %v6184_v20  ;;  %v2961_v43 = vpop.f32.mrb[101].mxu1  ;;  %v3074_v49 = vpop.f32.mrb[101].mxu0 }
 0x717   :  { %v2962_v26 = vadd.f32 %v2961_v43, %v6187_v23  ;;  %v3075_v29 = vadd.f32 %v3074_v49, %v6192_v24  ;;  %v2963_v41 = vpop.f32.mrb[102].mxu1  ;;  %v3076_v5 = vpop.f32.mrb[102].mxu0  ;;  %3661 = vmatprep.mubr.bf16.mxu1 %v3206_v34  ;;  %3774 = vmatprep.mubr.bf16.mxu0 %v3208_v25 }
 0x718   :  { %v2964_v46 = vadd.f32 %v2963_v41, %v6179_v17  ;;  %v3077_v45 = vadd.f32 %v3076_v5, %v6184_v20  ;;  %v2965_v39 = vpop.f32.mrb[103].mxu1  ;;  %v3078_v48 = vpop.f32.mrb[103].mxu0  ;;  %3662 = vmatmul.mubr.bf16.vlgmr.msra.gmra.mrb[128].mxu1 %v3205_v10  ;;  %3775 = vmatmul.mubr.bf16.vlgmr.msra.gmra.mrb[128].mxu0 %v3207_v18  ;;  %v3149_v60 = vmax.f32 %v2960_v35, 0.0  ;;  %v3151_v62 = vmax.f32 %v3073_v40, 0.0 }
 0x719   :  { %v2966_v56 = vadd.f32 %v2965_v39, %v6187_v23  ;;  %v3079_v59 = vadd.f32 %v3078_v48, %v6192_v24  ;;  %4615 = vmatpush1.bf16.msra.mxu1 %v6050_v57  ;;  %v3150_v63 = vmax.f32 %v2962_v26, 0.0  ;;  %v3152_v3 = vmax.f32 %v3075_v29, 0.0 }
 0x71a   :  { %v3153_v38 = vmax.f32 %v2964_v46, 0.0  ;;  %v3155_v37 = vmax.f32 %v3077_v45, 0.0  ;;  %4600 = vmatprep.subr.bf16.mxu1 %v6053_v61 }
 0x71b   :  { %v3154_v8 = vmax.f32 %v2966_v56, 0.0  ;;  %v3156_v34 = vmax.f32 %v3079_v59, 0.0 }
 0x71c   :  { %v3209_v25 = vpack.c.bf16 %v3153_v38, %v3149_v60  ;;  %v3211_v36 = vpack.c.bf16 %v3155_v37, %v3151_v62 }
 0x71d   :  { %v3210_v10 = vpack.c.bf16 %v3154_v8, %v3150_v63  ;;  %v3212_v18 = vpack.c.bf16 %v3156_v34, %v3152_v3  ;;  %4616 = vmatpush1.bf16.msra.mxu1 %v6059_v1  ;;  %v2969_v32 = vpop.f32.mrb[104].mxu1  ;;  %v3082_v43 = vpop.f32.mrb[104].mxu0 }
 0x71e   :  { %v2970_v57 = vadd.f32 %v2969_v32, %v6179_v17  ;;  %v3083_v35 = vadd.f32 %v3082_v43, %v6184_v20  ;;  %v2971_v40 = vpop.f32.mrb[105].mxu1  ;;  %v3084_v49 = vpop.f32.mrb[105].mxu0  ;;  %4601 = vmatprep.subr.bf16.mxu1 %v6062_v6 }
 0x71f   :  { %v2972_v61 = vadd.f32 %v2971_v40, %v6187_v23  ;;  %v3085_v26 = vadd.f32 %v3084_v49, %v6192_v24  ;;  %v2973_v29 = vpop.f32.mrb[106].mxu1  ;;  %v3086_v41 = vpop.f32.mrb[106].mxu0  ;;  %3671 = vmatprep.mubr.bf16.mxu1 %v3210_v10  ;;  %3784 = vmatprep.mubr.bf16.mxu0 %v3212_v18 }
 0x720   :  { %v2974_v1 = vadd.f32 %v2973_v29, %v6179_v17  ;;  %v3087_v5 = vadd.f32 %v3086_v41, %v6184_v20  ;;  %v2975_v46 = vpop.f32.mrb[107].mxu1  ;;  %v3088_v45 = vpop.f32.mrb[107].mxu0  ;;  %3672 = vmatmul.mubr.bf16.gmra.mrb[132].mxu1 %v3209_v25  ;;  %3785 = vmatmul.mubr.bf16.gmra.mrb[132].mxu0 %v3211_v36  ;;  %v3157_v48 = vmax.f32 %v2970_v57, 0.0  ;;  %v3159_v56 = vmax.f32 %v3083_v35, 0.0 }
 0x721   :  { %v2976_v39 = vadd.f32 %v2975_v46, %v6187_v23  ;;  %v3089_v6 = vadd.f32 %v3088_v45, %v6192_v24  ;;  %4617 = vmatpush1.bf16.msra.mxu1 %v6065_v14  ;;  %v3158_v62 = vmax.f32 %v2972_v61, 0.0  ;;  %v3160_v38 = vmax.f32 %v3085_v26, 0.0 }
 0x722   :  { %v3161_v59 = vmax.f32 %v2974_v1, 0.0  ;;  %v3163_v60 = vmax.f32 %v3087_v5, 0.0  ;;  %4602 = vmatprep.subr.bf16.mxu1 %v6069_v19 }
 0x723   :  { %v3162_v37 = vmax.f32 %v2976_v39, 0.0  ;;  %v3164_v63 = vmax.f32 %v3089_v6, 0.0 }
 0x724   :  { %v3213_v3 = vpack.c.bf16 %v3161_v59, %v3157_v48  ;;  %v3215_v8 = vpack.c.bf16 %v3163_v60, %v3159_v56 }
 0x725   :  { %v3214_v34 = vpack.c.bf16 %v3162_v37, %v3158_v62  ;;  %v3216_v25 = vpack.c.bf16 %v3164_v63, %v3160_v38  ;;  %4618 = vmatpush1.bf16.msra.mxu1 %v6075_v53  ;;  %v2979_v36 = vpop.f32.mrb[108].mxu1  ;;  %v3092_v10 = vpop.f32.mrb[108].mxu0 }
 0x726   :  { %v2980_v14 = vadd.f32 %v2979_v36, %v6179_v17  ;;  %v3093_v18 = vadd.f32 %v3092_v10, %v6184_v20  ;;  %v2981_v32 = vpop.f32.mrb[109].mxu1  ;;  %v3094_v43 = vpop.f32.mrb[109].mxu0  ;;  %4603 = vmatprep.subr.bf16.mxu1 %v6078_v28 }
 0x727   :  { %v2982_v19 = vadd.f32 %v2981_v32, %v6187_v23  ;;  %v3095_v57 = vadd.f32 %v3094_v43, %v6192_v24  ;;  %v2983_v35 = vpop.f32.mrb[110].mxu1  ;;  %v3096_v40 = vpop.f32.mrb[110].mxu0  ;;  %3681 = vmatprep.mubr.bf16.mxu1 %v3214_v34  ;;  %3794 = vmatprep.mubr.bf16.mxu0 %v3216_v25 }
 0x728   :  { %v2984_v53 = vadd.f32 %v2983_v35, %v6179_v17  ;;  %v3097_v49 = vadd.f32 %v3096_v40, %v6184_v20  ;;  %v2985_v61 = vpop.f32.mrb[111].mxu1  ;;  %v3098_v26 = vpop.f32.mrb[111].mxu0  ;;  %3682 = vmatmul.mubr.bf16.gmra.mrb[136].mxu1 %v3213_v3  ;;  %3795 = vmatmul.mubr.bf16.gmra.mrb[136].mxu0 %v3215_v8  ;;  %v3165_v41 = vmax.f32 %v2980_v14, 0.0  ;;  %v3167_v1 = vmax.f32 %v3093_v18, 0.0 }
 0x729   :  { %v2986_v29 = vadd.f32 %v2985_v61, %v6187_v23  ;;  %v3099_v28 = vadd.f32 %v3098_v26, %v6192_v24  ;;  %4619 = vmatpush1.bf16.msra.mxu1 %v6081_v42  ;;  %v3166_v45 = vmax.f32 %v2982_v19, 0.0  ;;  %v3168_v39 = vmax.f32 %v3095_v57, 0.0 }
 0x72a   :  { %v3169_v5 = vmax.f32 %v2984_v53, 0.0  ;;  %v3171_v46 = vmax.f32 %v3097_v49, 0.0  ;;  %4604 = vmatprep.subr.bf16.mxu1 %v6085_v44 }
 0x72b   :  { %v3170_v6 = vmax.f32 %v2986_v29, 0.0  ;;  %v3172_v48 = vmax.f32 %v3099_v28, 0.0 }
 0x72c   :  { %v3217_v56 = vpack.c.bf16 %v3169_v5, %v3165_v41  ;;  %v3219_v59 = vpack.c.bf16 %v3171_v46, %v3167_v1 }
 0x72d   :  { %v3218_v60 = vpack.c.bf16 %v3170_v6, %v3166_v45  ;;  %v3220_v62 = vpack.c.bf16 %v3172_v48, %v3168_v39  ;;  %4620 = vmatpush1.bf16.msra.mxu1 %v6091_v16  ;;  %v2989_v38 = vpop.f32.mrb[112].mxu1  ;;  %v3102_v37 = vpop.f32.mrb[112].mxu0 }
 0x72e   :  { %v2990_v42 = vadd.f32 %v2989_v38, %v6179_v17  ;;  %v3103_v63 = vadd.f32 %v3102_v37, %v6184_v20  ;;  %v2991_v3 = vpop.f32.mrb[113].mxu1  ;;  %v3104_v8 = vpop.f32.mrb[113].mxu0  ;;  %4605 = vmatprep.subr.bf16.mxu1 %v6094_v58 }
 0x72f   :  { %v2992_v44 = vadd.f32 %v2991_v3, %v6187_v23  ;;  %v3105_v34 = vadd.f32 %v3104_v8, %v6192_v24  ;;  %v2993_v25 = vpop.f32.mrb[114].mxu1  ;;  %v3106_v36 = vpop.f32.mrb[114].mxu0  ;;  %3691 = vmatprep.mubr.bf16.mxu1 %v3218_v60  ;;  %3804 = vmatprep.mubr.bf16.mxu0 %v3220_v62 }
 0x730   :  { %v2994_v16 = vadd.f32 %v2993_v25, %v6179_v17  ;;  %v3107_v10 = vadd.f32 %v3106_v36, %v6184_v20  ;;  %v2995_v14 = vpop.f32.mrb[115].mxu1  ;;  %v3108_v18 = vpop.f32.mrb[115].mxu0  ;;  %3692 = vmatmul.mubr.bf16.gmra.mrb[140].mxu1 %v3217_v56  ;;  %3805 = vmatmul.mubr.bf16.gmra.mrb[140].mxu0 %v3219_v59  ;;  %v3173_v43 = vmax.f32 %v2990_v42, 0.0  ;;  %v3175_v19 = vmax.f32 %v3103_v63, 0.0 }
 0x731   :  { %v2996_v32 = vadd.f32 %v2995_v14, %v6187_v23  ;;  %v3109_v58 = vadd.f32 %v3108_v18, %v6192_v24  ;;  %4621 = vmatpush1.bf16.msra.mxu1 %v6097_v0  ;;  %v3174_v40 = vmax.f32 %v2992_v44, 0.0  ;;  %v3176_v53 = vmax.f32 %v3105_v34, 0.0 }
 0x732   :  { %v3177_v57 = vmax.f32 %v2994_v16, 0.0  ;;  %v3179_v35 = vmax.f32 %v3107_v10, 0.0  ;;  %4606 = vmatprep.subr.bf16.mxu1 %v6101_v4 }
 0x733   :  { %v3178_v49 = vmax.f32 %v2996_v32, 0.0  ;;  %v3180_v61 = vmax.f32 %v3109_v58, 0.0 }
 0x734   :  { %v3221_v26 = vpack.c.bf16 %v3177_v57, %v3173_v43  ;;  %v3223_v29 = vpack.c.bf16 %v3179_v35, %v3175_v19 }
 0x735   :  { %v3222_v28 = vpack.c.bf16 %v3178_v49, %v3174_v40  ;;  %v3224_v41 = vpack.c.bf16 %v3180_v61, %v3176_v53  ;;  %4622 = vmatpush1.bf16.msra.mxu1 %v6107_v15  ;;  %v2999_v1 = vpop.f32.mrb[116].mxu1  ;;  %v3112_v5 = vpop.f32.mrb[116].mxu0 }
 0x736   :  { %v3000_v0 = vadd.f32 %v2999_v1, %v6179_v17  ;;  %v3113_v46 = vadd.f32 %v3112_v5, %v6184_v20  ;;  %v3001_v45 = vpop.f32.mrb[117].mxu1  ;;  %v3114_v39 = vpop.f32.mrb[117].mxu0  ;;  %4607 = vmatprep.subr.bf16.mxu1 %v6110_v21 }
 0x737   :  { %v3002_v4 = vadd.f32 %v3001_v45, %v6187_v23  ;;  %v3115_v6 = vadd.f32 %v3114_v39, %v6192_v24  ;;  %v3003_v48 = vpop.f32.mrb[118].mxu1  ;;  %v3116_v56 = vpop.f32.mrb[118].mxu0  ;;  %3701 = vmatprep.mubr.bf16.mxu1 %v3222_v28  ;;  %3814 = vmatprep.mubr.bf16.mxu0 %v3224_v41 }
 0x738   :  { %v3004_v15 = vadd.f32 %v3003_v48, %v6179_v17  ;;  %v3117_v59 = vadd.f32 %v3116_v56, %v6184_v20  ;;  %v3005_v60 = vpop.f32.mrb[119].mxu1  ;;  %v3118_v62 = vpop.f32.mrb[119].mxu0  ;;  %3702 = vmatmul.mubr.bf16.gmra.mrb[144].mxu1 %v3221_v26  ;;  %3815 = vmatmul.mubr.bf16.gmra.mrb[144].mxu0 %v3223_v29  ;;  %v3181_v37 = vmax.f32 %v3000_v0, 0.0  ;;  %v3183_v42 = vmax.f32 %v3113_v46, 0.0 }
 0x739   :  { %v3006_v38 = vadd.f32 %v3005_v60, %v6187_v23  ;;  %v3119_v21 = vadd.f32 %v3118_v62, %v6192_v24  ;;  %4623 = vmatpush1.bf16.msra.mxu1 %v6113_v30  ;;  %v3182_v8 = vmax.f32 %v3002_v4, 0.0  ;;  %v3184_v44 = vmax.f32 %v3115_v6, 0.0 }
 0x73a   :  { %v3185_v63 = vmax.f32 %v3004_v15, 0.0  ;;  %v3187_v3 = vmax.f32 %v3117_v59, 0.0  ;;  %4608 = vmatprep.subr.bf16.mxu1 %v6117_v33 }
 0x73b   :  { %v3186_v34 = vmax.f32 %v3006_v38, 0.0  ;;  %v3188_v25 = vmax.f32 %v3119_v21, 0.0 }
 0x73c   :  { %v3225_v36 = vpack.c.bf16 %v3185_v63, %v3181_v37  ;;  %v3227_v16 = vpack.c.bf16 %v3187_v3, %v3183_v42 }
 0x73d   :  { %v3226_v10 = vpack.c.bf16 %v3186_v34, %v3182_v8  ;;  %v3228_v14 = vpack.c.bf16 %v3188_v25, %v3184_v44  ;;  %4624 = vmatpush1.bf16.msra.mxu1 %v6123_v13  ;;  %v3009_v18 = vpop.f32.mrb[120].mxu1  ;;  %v3122_v32 = vpop.f32.mrb[120].mxu0 }
 0x73e   :  { %v3010_v30 = vadd.f32 %v3009_v18, %v6179_v17  ;;  %v3123_v58 = vadd.f32 %v3122_v32, %v6184_v20  ;;  %v3011_v43 = vpop.f32.mrb[121].mxu1  ;;  %v3124_v19 = vpop.f32.mrb[121].mxu0  ;;  %4609 = vmatprep.subr.bf16.mxu1 %v6126_v2 }
 0x73f   :  { %v3012_v33 = vadd.f32 %v3011_v43, %v6187_v23  ;;  %v3125_v57 = vadd.f32 %v3124_v19, %v6192_v24  ;;  %v3013_v35 = vpop.f32.mrb[122].mxu1  ;;  %v3126_v40 = vpop.f32.mrb[122].mxu0  ;;  %3711 = vmatprep.mubr.bf16.mxu1 %v3226_v10  ;;  %3824 = vmatprep.mubr.bf16.mxu0 %v3228_v14 }
 0x740   :  { %v3014_v13 = vadd.f32 %v3013_v35, %v6179_v17  ;;  %v3127_v53 = vadd.f32 %v3126_v40, %v6184_v20  ;;  %v3015_v49 = vpop.f32.mrb[123].mxu1  ;;  %v3128_v61 = vpop.f32.mrb[123].mxu0  ;;  %3712 = vmatmul.mubr.bf16.gmra.mrb[148].mxu1 %v3225_v36  ;;  %3825 = vmatmul.mubr.bf16.gmra.mrb[148].mxu0 %v3227_v16  ;;  %v3189_v29 = vmax.f32 %v3010_v30, 0.0  ;;  %v3191_v28 = vmax.f32 %v3123_v58, 0.0 }
 0x741   :  { %v3016_v26 = vadd.f32 %v3015_v49, %v6187_v23  ;;  %v3129_v2 = vadd.f32 %v3128_v61, %v6192_v24  ;;  %4625 = vmatpush1.bf16.msra.mxu1 %v6129_v54  ;;  %v3190_v5 = vmax.f32 %v3012_v33, 0.0  ;;  %v3192_v0 = vmax.f32 %v3125_v57, 0.0 }
 0x742   :  { %v3193_v41 = vmax.f32 %v3014_v13, 0.0  ;;  %v3195_v1 = vmax.f32 %v3127_v53, 0.0  ;;  %4610 = vmatprep.subr.bf16.mxu1 %v6133_v51 }
 0x743   :  { %v3194_v46 = vmax.f32 %v3016_v26, 0.0  ;;  %v3196_v45 = vmax.f32 %v3129_v2, 0.0 }
 0x744   :  { %v3229_v39 = vpack.c.bf16 %v3193_v41, %v3189_v29  ;;  %v3231_v4 = vpack.c.bf16 %v3195_v1, %v3191_v28 }
 0x745   :  { %v3230_v6 = vpack.c.bf16 %v3194_v46, %v3190_v5  ;;  %v3232_v48 = vpack.c.bf16 %v3196_v45, %v3192_v0  ;;  %4626 = vmatpush1.bf16.msra.mxu1 %v6139_v12  ;;  %v3019_v56 = vpop.f32.mrb[124].mxu1  ;;  %v3132_v15 = vpop.f32.mrb[124].mxu0 }
 0x746   :  { %v3020_v54 = vadd.f32 %v3019_v56, %v6179_v17  ;;  %v3133_v59 = vadd.f32 %v3132_v15, %v6184_v20  ;;  %v3021_v60 = vpop.f32.mrb[125].mxu1  ;;  %v3134_v62 = vpop.f32.mrb[125].mxu0  ;;  %4611 = vmatprep.subr.bf16.mxu1 %v6142_v22 }
 0x747   :  { %v3022_v51 = vadd.f32 %v3021_v60, %v6187_v23  ;;  %v3135_v38 = vadd.f32 %v3134_v62, %v6192_v24  ;;  %v3023_v21 = vpop.f32.mrb[126].mxu1  ;;  %v3136_v37 = vpop.f32.mrb[126].mxu0  ;;  %3721 = vmatprep.mubr.bf16.mxu1 %v3230_v6 }
 0x748   :  { %v3024_v42 = vadd.f32 %v3023_v21, %v6179_v17  ;;  %v3137_v12 = vadd.f32 %v3136_v37, %v6184_v20  ;;  %v3025_v63 = vpop.f32.mrb[127].mxu1  ;;  %v3138_v3 = vpop.f32.mrb[127].mxu0  ;;  %3722 = vmatmul.mubr.bf16.gmra.mrb[152].mxu1 %v3229_v39  ;;  %v3197_v22 = vmax.f32 %v3020_v54, 0.0  ;;  %v3199_v34 = vmax.f32 %v3133_v59, 0.0 }
 0x749   :  { %v3026_v8 = vadd.f32 %v3025_v63, %v6187_v23  ;;  %v3139_v44 = vadd.f32 %v3138_v3, %v6192_v24  ;;  %4627 = vmatpush1.bf16.msra.mxu1 %v6145_v31  ;;  %v3198_v16 = vmax.f32 %v3022_v51, 0.0  ;;  %v3200_v10 = vmax.f32 %v3135_v38, 0.0 }
 0x74a   :  { %v3201_v25 = vmax.f32 %v3024_v42, 0.0  ;;  %v3203_v36 = vmax.f32 %v3137_v12, 0.0  ;;  %4612 = vmatprep.subr.bf16.mxu1 %v6149_v27  ;;  %v3303_v31 = vsub.s32 7, %v5763_v50 }
 0x74b   :  { %v3202_v17 = vmax.f32 %v3026_v8, 0.0  ;;  %v3204_v14 = vmax.f32 %v3139_v44, 0.0 }
 0x74c   :  { %v3233_v20 = vpack.c.bf16 %v3201_v25, %v3197_v22  ;;  %v3235_v18 = vpack.c.bf16 %v3203_v36, %v3199_v34  ;;  %v6291_v27 = vrot.slane %v6176_v11, %v3303_v31 }
 0x74d   :  { %v3234_v32 = vpack.c.bf16 %v3202_v17, %v3198_v16  ;;  %v3236_v30 = vpack.c.bf16 %v3204_v14, %v3200_v10  ;;  %4628 = vmatpush1.bf16.msra.mxu1 %v6155_v47  ;;  %v5370_v47 = vld [vmem:[%s6435_s9 + $0x8] sm:$0xff] }
 0x74e   :  { %4613 = vmatprep.subr.bf16.mxu1 %v6159_v52  ;;  %v6296_v52 = vrot.slane %v5370_v47, %v3303_v31 }
 0x74f   :  { %3731 = vmatprep.mubr.bf16.mxu1 %v3234_v32 }
 0x750   :  { %3732 = vmatmul.mubr.bf16.gmra.mrb[156].mxu1 %v3233_v20 }
 0x751   :  { %4629 = vmatpush1.bf16.msra.mxu1 %v6161_v55  ;;  %3834 = vmatprep.mubr.bf16.mxu1 %v3232_v48 }
 0x752   :  { %4614 = vmatprep.subr.bf16.mxu1 %v6165_v7 }
 0x755   :  { %4630 = vmatpush1.bf16.msra.mxu1 %v6167_v9 }
 0x758   :  { %3835 = vmatmul.mubr.bf16.vlgmr.msra.gmra.mrb[152].mxu1 %v3231_v4 }
 0x759   :  { %3844 = vmatprep.mubr.bf16.mxu1 %v3236_v30 }
 0x760   :  { %3845 = vmatmul.mubr.bf16.gmra.mrb[156].mxu1 %v3235_v18 }
 0x7eb   :  { %v3663_v55 = vpop.f32.mrb[128].mxu1  ;;  %v3776_v23 = vpop.f32.mrb[128].mxu0 }
 0x7ec   :  { %v3664_v7 = vadd.f32 %v3663_v55, %v6291_v27  ;;  %v3665_v24 = vpop.f32.mrb[129].mxu1  ;;  %v3778_v9 = vpop.f32.mrb[129].mxu0 }
 0x7ed   :  { %v3666_v58 = vadd.f32 %v3665_v24, %v6296_v52  ;;  %v3667_v43 = vpop.f32.mrb[130].mxu1  ;;  %v3780_v19 = vpop.f32.mrb[130].mxu0 }
 0x7ee   :  { %v3777_v50 = vadd.f32 %v3776_v23, %v3664_v7  ;;  %v3668_v11 = vadd.f32 %v3667_v43, %v6291_v27  ;;  %v3669_v33 = vpop.f32.mrb[131].mxu1  ;;  %v3782_v57 = vpop.f32.mrb[131].mxu0 }
 0x7ef   :  { %v3779_v35 = vadd.f32 %v3778_v9, %v3666_v58  ;;  %v3670_v40 = vadd.f32 %v3669_v33, %v6296_v52 }
 0x7f0   :  { %v4407_v13 = vmul.f32 -1.442695, %v3777_v50  ;;  %v3781_v53 = vadd.f32 %v3780_v19, %v3668_v11 }
 0x7f1   :  { %v4408_v49 = vmul.f32 -1.442695, %v3779_v35  ;;  %v3783_v61 = vadd.f32 %v3782_v57, %v3670_v40 }
 0x7f2   :  { %5237 = vpow2.f32 %v4407_v13  ;;  %v4409_v26 = vmul.f32 -1.442695, %v3781_v53 }
 0x7f3   :  { %5239 = vpow2.f32 %v4408_v49  ;;  %v4410_v2 = vmul.f32 -1.442695, %v3783_v61  ;;  %v3673_v29 = vpop.f32.mrb[132].mxu1  ;;  %v3786_v28 = vpop.f32.mrb[132].mxu0 }
 0x7f4   :  { %5241 = vpow2.f32 %v4409_v26  ;;  %v3674_v41 = vadd.f32 %v3673_v29, %v6291_v27  ;;  %v3675_v1 = vpop.f32.mrb[133].mxu1  ;;  %v3788_v5 = vpop.f32.mrb[133].mxu0 }
 0x7f5   :  { %5243 = vpow2.f32 %v4410_v2  ;;  %v3676_v0 = vadd.f32 %v3675_v1, %v6296_v52  ;;  %v3677_v46 = vpop.f32.mrb[134].mxu1  ;;  %v3790_v45 = vpop.f32.mrb[134].mxu0 }
 0x7f6   :  { %v3787_v39 = vadd.f32 %v3786_v28, %v3674_v41  ;;  %v3678_v4 = vadd.f32 %v3677_v46, %v6291_v27  ;;  %v3679_v6 = vpop.f32.mrb[135].mxu1  ;;  %v3792_v48 = vpop.f32.mrb[135].mxu0 }
 0x7f7   :  { %v3789_v56 = vadd.f32 %v3788_v5, %v3676_v0  ;;  %v3680_v15 = vadd.f32 %v3679_v6, %v6296_v52 }
 0x7f8   :  { %v4411_v54 = vmul.f32 -1.442695, %v3787_v39  ;;  %v3791_v59 = vadd.f32 %v3790_v45, %v3678_v4 }
 0x7f9   :  { %v4412_v60 = vmul.f32 -1.442695, %v3789_v56  ;;  %v3793_v62 = vadd.f32 %v3792_v48, %v3680_v15 }
 0x7fa   :  { %5245 = vpow2.f32 %v4411_v54  ;;  %v4413_v51 = vmul.f32 -1.442695, %v3791_v59 }
 0x7fb   :  { %5247 = vpow2.f32 %v4412_v60  ;;  %v4414_v38 = vmul.f32 -1.442695, %v3793_v62  ;;  %v3683_v21 = vpop.f32.mrb[136].mxu1  ;;  %v3796_v37 = vpop.f32.mrb[136].mxu0 }
 0x7fc   :  { %v5238_v42 = vpop.eup %5237  ;;  %5249 = vpow2.f32 %v4413_v51  ;;  %v3684_v12 = vadd.f32 %v3683_v21, %v6291_v27  ;;  %v3685_v63 = vpop.f32.mrb[137].mxu1 }
 0x7fd   :  { %v3798_v3 = vpop.f32.mrb[137].mxu0  ;;  %v5240_v8 = vpop.eup %5239  ;;  %v3951_v44 = vadd.f32 1.0, %v5238_v42  ;;  %5251 = vpow2.f32 %v4414_v38  ;;  %v3686_v22 = vadd.f32 %v3685_v63, %v6296_v52 }
 0x7fe   :  { %v3687_v34 = vpop.f32.mrb[138].mxu1  ;;  %v3800_v25 = vpop.f32.mrb[138].mxu0  ;;  %v3952_v16 = vadd.f32 1.0, %v5240_v8  ;;  %v3797_v10 = vadd.f32 %v3796_v37, %v3684_v12 }
 0x7ff   :  { %v5242_v36 = vpop.eup %5241  ;;  %v3688_v17 = vadd.f32 %v3687_v34, %v6291_v27  ;;  %v3689_v14 = vpop.f32.mrb[139].mxu1  ;;  %5253 = vrcp.f32 %v3951_v44  ;;  %v3799_v30 = vadd.f32 %v3798_v3, %v3686_v22 }
 0x800   :  { %v3802_v20 = vpop.f32.mrb[139].mxu0  ;;  %v5244_v18 = vpop.eup %5243  ;;  %v3953_v32 = vadd.f32 1.0, %v5242_v36  ;;  %v3690_v31 = vadd.f32 %v3689_v14, %v6296_v52  ;;  %5255 = vrcp.f32 %v3952_v16  ;;  %v4415_v55 = vmul.f32 -1.442695, %v3797_v10 }
 0x801   :  { %v3954_v47 = vadd.f32 1.0, %v5244_v18  ;;  %v3801_v23 = vadd.f32 %v3800_v25, %v3688_v17  ;;  %v4416_v7 = vmul.f32 -1.442695, %v3799_v30 }
 0x802   :  { %5257 = vrcp.f32 %v3953_v32  ;;  %v3803_v24 = vadd.f32 %v3802_v20, %v3690_v31 }
 0x803   :  { %5259 = vrcp.f32 %v3954_v47  ;;  %v4417_v9 = vmul.f32 -1.442695, %v3801_v23  ;;  %v3693_v43 = vpop.f32.mrb[140].mxu1  ;;  %v3806_v19 = vpop.f32.mrb[140].mxu0 }
 0x804   :  { %5261 = vpow2.f32 %v4415_v55  ;;  %v4418_v58 = vmul.f32 -1.442695, %v3803_v24  ;;  %v5246_v50 = vpop.eup %5245  ;;  %v3694_v11 = vadd.f32 %v3693_v43, %v6291_v27  ;;  %v3695_v33 = vpop.f32.mrb[141].mxu1 }
 0x805   :  { %5263 = vpow2.f32 %v4416_v7  ;;  %v3808_v57 = vpop.f32.mrb[141].mxu0  ;;  %v5248_v35 = vpop.eup %5247  ;;  %v3955_v40 = vadd.f32 1.0, %v5246_v50  ;;  %v3696_v13 = vadd.f32 %v3695_v33, %v6296_v52 }
 0x806   :  { %5265 = vpow2.f32 %v4417_v9  ;;  %v3697_v53 = vpop.f32.mrb[142].mxu1  ;;  %v3810_v49 = vpop.f32.mrb[142].mxu0  ;;  %v3956_v26 = vadd.f32 1.0, %v5248_v35  ;;  %v3807_v2 = vadd.f32 %v3806_v19, %v3694_v11 }
 0x807   :  { %v5250_v61 = vpop.eup %5249  ;;  %5267 = vpow2.f32 %v4418_v58  ;;  %v3698_v29 = vadd.f32 %v3697_v53, %v6291_v27  ;;  %v3699_v28 = vpop.f32.mrb[143].mxu1  ;;  %v3809_v0 = vadd.f32 %v3808_v57, %v3696_v13 }
 0x808   :  { %v3812_v41 = vpop.f32.mrb[143].mxu0  ;;  %v5252_v1 = vpop.eup %5251  ;;  %5269 = vrcp.f32 %v3955_v40  ;;  %v3957_v5 = vadd.f32 1.0, %v5250_v61  ;;  %v3700_v46 = vadd.f32 %v3699_v28, %v6296_v52  ;;  %v4419_v39 = vmul.f32 -1.442695, %v3807_v2 }
 0x809   :  { %5271 = vrcp.f32 %v3956_v26  ;;  %v3958_v45 = vadd.f32 1.0, %v5252_v1  ;;  %v3811_v4 = vadd.f32 %v3810_v49, %v3698_v29  ;;  %v5254_v6 = vpop.eup %5253  ;;  %v4420_v48 = vmul.f32 -1.442695, %v3809_v0 }
 0x80a   :  { %5273 = vrcp.f32 %v3957_v5  ;;  %v3813_v56 = vadd.f32 %v3812_v41, %v3700_v46  ;;  %v5256_v15 = vpop.eup %5255  ;;  %4047 = vst [vmem:[%s6436_s10] sm:$0xff] %v5254_v6 }
 0x80b   :  { %5275 = vrcp.f32 %v3958_v45  ;;  %v4421_v54 = vmul.f32 -1.442695, %v3811_v4  ;;  %4048 = vst [vmem:[%s6436_s10 + $0x8] sm:$0xff] %v5256_v15  ;;  %v3703_v62 = vpop.f32.mrb[144].mxu1  ;;  %v3816_v51 = vpop.f32.mrb[144].mxu0 }
 0x80c   :  { %v5258_v59 = vpop.eup %5257  ;;  %5277 = vpow2.f32 %v4419_v39  ;;  %v4422_v60 = vmul.f32 -1.442695, %v3813_v56  ;;  %v3704_v21 = vadd.f32 %v3703_v62, %v6291_v27  ;;  %v3705_v37 = vpop.f32.mrb[145].mxu1 }
 0x80d   :  { %v5260_v38 = vpop.eup %5259  ;;  %4049 = vst [vmem:[%s6436_s10 + $0x10] sm:$0xff] %v5258_v59  ;;  %5279 = vpow2.f32 %v4420_v48  ;;  %v3818_v42 = vpop.f32.mrb[145].mxu0  ;;  %v3706_v63 = vadd.f32 %v3705_v37, %v6296_v52 }
 0x80e   :  { %v5262_v12 = vpop.eup %5261  ;;  %4050 = vst [vmem:[%s6436_s10 + $0x18] sm:$0xff] %v5260_v38  ;;  %5281 = vpow2.f32 %v4421_v54  ;;  %v3707_v3 = vpop.f32.mrb[146].mxu1  ;;  %v3817_v34 = vadd.f32 %v3816_v51, %v3704_v21 }
 0x80f   :  { %v3820_v8 = vpop.f32.mrb[146].mxu0  ;;  %v5264_v44 = vpop.eup %5263  ;;  %v3959_v22 = vadd.f32 1.0, %v5262_v12  ;;  %5283 = vpow2.f32 %v4422_v60  ;;  %v3708_v25 = vadd.f32 %v3707_v3, %v6291_v27  ;;  %v3819_v14 = vadd.f32 %v3818_v42, %v3706_v63 }
 0x810   :  { %v3709_v36 = vpop.f32.mrb[147].mxu1  ;;  %v3822_v16 = vpop.f32.mrb[147].mxu0  ;;  %v3960_v17 = vadd.f32 1.0, %v5264_v44  ;;  %v4423_v30 = vmul.f32 -1.442695, %v3817_v34 }
 0x811   :  { %v5266_v10 = vpop.eup %5265  ;;  %v3710_v20 = vadd.f32 %v3709_v36, %v6296_v52  ;;  %5285 = vrcp.f32 %v3959_v22  ;;  %v3821_v31 = vadd.f32 %v3820_v8, %v3708_v25  ;;  %v4424_v23 = vmul.f32 -1.442695, %v3819_v14 }
 0x812   :  { %v5268_v18 = vpop.eup %5267  ;;  %v3961_v32 = vadd.f32 1.0, %v5266_v10  ;;  %5287 = vrcp.f32 %v3960_v17 }
 0x813   :  { %v5270_v47 = vpop.eup %5269  ;;  %v3962_v55 = vadd.f32 1.0, %v5268_v18  ;;  %v3823_v7 = vadd.f32 %v3822_v16, %v3710_v20  ;;  %v4425_v9 = vmul.f32 -1.442695, %v3821_v31  ;;  %v3713_v19 = vpop.f32.mrb[148].mxu1 }
 0x814   :  { %v5272_v24 = vpop.eup %5271  ;;  %4051 = vst [vmem:[%s6436_s10 + $0x20] sm:$0xff] %v5270_v47  ;;  %5289 = vrcp.f32 %v3961_v32  ;;  %v3826_v50 = vpop.f32.mrb[148].mxu0  ;;  %v3714_v33 = vadd.f32 %v3713_v19, %v6291_v27 }
 0x815   :  { %v5274_v58 = vpop.eup %5273  ;;  %4052 = vst [vmem:[%s6436_s10 + $0x28] sm:$0xff] %v5272_v24  ;;  %5291 = vrcp.f32 %v3962_v55  ;;  %v4426_v43 = vmul.f32 -1.442695, %v3823_v7  ;;  %v3715_v57 = vpop.f32.mrb[149].mxu1 }
 0x816   :  { %v5276_v11 = vpop.eup %5275  ;;  %4053 = vst [vmem:[%s6436_s10 + $0x30] sm:$0xff] %v5274_v58  ;;  %5293 = vpow2.f32 %v4423_v30  ;;  %v3828_v35 = vpop.f32.mrb[149].mxu0  ;;  %v3716_v13 = vadd.f32 %v3715_v57, %v6296_v52  ;;  %v3827_v2 = vadd.f32 %v3826_v50, %v3714_v33 }
 0x817   :  { %v5278_v40 = vpop.eup %5277  ;;  %4054 = vst [vmem:[%s6436_s10 + $0x38] sm:$0xff] %v5276_v11  ;;  %5295 = vpow2.f32 %v4424_v23  ;;  %v3717_v53 = vpop.f32.mrb[150].mxu1 }
 0x818   :  { %v3830_v49 = vpop.f32.mrb[150].mxu0  ;;  %v5280_v61 = vpop.eup %5279  ;;  %v3963_v26 = vadd.f32 1.0, %v5278_v40  ;;  %5297 = vpow2.f32 %v4425_v9  ;;  %v3718_v29 = vadd.f32 %v3717_v53, %v6291_v27  ;;  %v3829_v0 = vadd.f32 %v3828_v35, %v3716_v13 }
 0x819   :  { %v3719_v28 = vpop.f32.mrb[151].mxu1  ;;  %v3832_v41 = vpop.f32.mrb[151].mxu0  ;;  %v3964_v5 = vadd.f32 1.0, %v5280_v61  ;;  %5299 = vpow2.f32 %v4426_v43  ;;  %v4427_v4 = vmul.f32 -1.442695, %v3827_v2 }
 0x81a   :  { %v5282_v1 = vpop.eup %5281  ;;  %v3720_v46 = vadd.f32 %v3719_v28, %v6296_v52  ;;  %5301 = vrcp.f32 %v3963_v26  ;;  %v3831_v6 = vadd.f32 %v3830_v49, %v3718_v29  ;;  %v4428_v56 = vmul.f32 -1.442695, %v3829_v0 }
 0x81b   :  { %v5284_v45 = vpop.eup %5283  ;;  %v3965_v39 = vadd.f32 1.0, %v5282_v1  ;;  %5303 = vrcp.f32 %v3964_v5 }
 0x81c   :  { %v3966_v48 = vadd.f32 1.0, %v5284_v45  ;;  %v3833_v15 = vadd.f32 %v3832_v41, %v3720_v46  ;;  %v5286_v54 = vpop.eup %5285  ;;  %v4429_v59 = vmul.f32 -1.442695, %v3831_v6 }
 0x81d   :  { %5305 = vrcp.f32 %v3965_v39  ;;  %v5288_v60 = vpop.eup %5287  ;;  %4055 = vst [vmem:[%s6436_s10 + $0x40] sm:$0xff] %v5286_v54 }
 0x81e   :  { %5307 = vrcp.f32 %v3966_v48  ;;  %v4430_v62 = vmul.f32 -1.442695, %v3833_v15  ;;  %v5290_v51 = vpop.eup %5289  ;;  %4056 = vst [vmem:[%s6436_s10 + $0x48] sm:$0xff] %v5288_v60 }
 0x81f   :  { %5309 = vpow2.f32 %v4427_v4  ;;  %v5292_v38 = vpop.eup %5291  ;;  %4057 = vst [vmem:[%s6436_s10 + $0x50] sm:$0xff] %v5290_v51 }
 0x820   :  { %5311 = vpow2.f32 %v4428_v56  ;;  %v5294_v21 = vpop.eup %5293  ;;  %4058 = vst [vmem:[%s6436_s10 + $0x58] sm:$0xff] %v5292_v38 }
 0x821   :  { %5313 = vpow2.f32 %v4429_v59  ;;  %v5296_v37 = vpop.eup %5295  ;;  %v3967_v42 = vadd.f32 1.0, %v5294_v21 }
 0x822   :  { %5315 = vpow2.f32 %v4430_v62  ;;  %v5298_v12 = vpop.eup %5297  ;;  %v3968_v63 = vadd.f32 1.0, %v5296_v37 }
 0x823   :  { %v5300_v3 = vpop.eup %5299  ;;  %5317 = vrcp.f32 %v3967_v42  ;;  %v3969_v8 = vadd.f32 1.0, %v5298_v12 }
 0x824   :  { %v5302_v44 = vpop.eup %5301  ;;  %5319 = vrcp.f32 %v3968_v63  ;;  %v3970_v22 = vadd.f32 1.0, %v5300_v3 }
 0x825   :  { %v5304_v34 = vpop.eup %5303  ;;  %4059 = vst [vmem:[%s6436_s10 + $0x60] sm:$0xff] %v5302_v44  ;;  %5321 = vrcp.f32 %v3969_v8 }
 0x826   :  { %4060 = vst [vmem:[%s6436_s10 + $0x68] sm:$0xff] %v5304_v34  ;;  %5323 = vrcp.f32 %v3970_v22 }
 0x827   :  { %v5306_v25 = vpop.eup %5305 }
 0x828   :  { %v5308_v36 = vpop.eup %5307  ;;  %4061 = vst [vmem:[%s6436_s10 + $0x70] sm:$0xff] %v5306_v25 }
 0x829   :  { %v5310_v16 = vpop.eup %5309  ;;  %4062 = vst [vmem:[%s6436_s10 + $0x78] sm:$0xff] %v5308_v36 }
 0x82a   :  { %v5312_v10 = vpop.eup %5311  ;;  %v3971_v17 = vadd.f32 1.0, %v5310_v16 }
 0x82b   :  { %v5314_v14 = vpop.eup %5313  ;;  %v3972_v20 = vadd.f32 1.0, %v5312_v10  ;;  %v3836_v47 = vpop.f32.mrb[152].mxu1 }
 0x82c   :  { %v5316_v18 = vpop.eup %5315  ;;  %5325 = vrcp.f32 %v3971_v17  ;;  %v3973_v32 = vadd.f32 1.0, %v5314_v14  ;;  %v4711_v23 = vadd.f32 %v3836_v47, %v6291_v27  ;;  %v3838_v7 = vpop.f32.mrb[153].mxu1 }
 0x82d   :  { %5327 = vrcp.f32 %v3972_v20  ;;  %v3974_v30 = vadd.f32 1.0, %v5316_v18  ;;  %v5318_v31 = vpop.eup %5317  ;;  %v4712_v9 = vadd.f32 %v3838_v7, %v6296_v52  ;;  %v3840_v58 = vpop.f32.mrb[154].mxu1 }
 0x82e   :  { %5329 = vrcp.f32 %v3973_v32  ;;  %v5320_v55 = vpop.eup %5319  ;;  %4063 = vst [vmem:[%s6436_s10 + $0x80] sm:$0xff] %v5318_v31  ;;  %v4431_v19 = vmul.f32 -1.442695, %v4711_v23  ;;  %v4713_v50 = vadd.f32 %v3840_v58, %v6291_v27  ;;  %v3842_v11 = vpop.f32.mrb[155].mxu1 }
 0x82f   :  { %5331 = vrcp.f32 %v3974_v30  ;;  %v5322_v24 = vpop.eup %5321  ;;  %4064 = vst [vmem:[%s6436_s10 + $0x88] sm:$0xff] %v5320_v55  ;;  %v4432_v33 = vmul.f32 -1.442695, %v4712_v9  ;;  %v4714_v57 = vadd.f32 %v3842_v11, %v6296_v52 }
 0x830   :  { %v5324_v43 = vpop.eup %5323  ;;  %4065 = vst [vmem:[%s6436_s10 + $0x90] sm:$0xff] %v5322_v24  ;;  %5333 = vpow2.f32 %v4431_v19  ;;  %v4433_v35 = vmul.f32 -1.442695, %v4713_v50 }
 0x831   :  { %4066 = vst [vmem:[%s6436_s10 + $0x98] sm:$0xff] %v5324_v43  ;;  %5335 = vpow2.f32 %v4432_v33  ;;  %v4434_v40 = vmul.f32 -1.442695, %v4714_v57 }
 0x832   :  { %5337 = vpow2.f32 %v4433_v35 }
 0x833   :  { %5339 = vpow2.f32 %v4434_v40  ;;  %v3846_v53 = vpop.f32.mrb[156].mxu1 }
 0x834   :  { %v4715_v61 = vadd.f32 %v3846_v53, %v6291_v27  ;;  %v3848_v26 = vpop.f32.mrb[157].mxu1 }
 0x835   :  { %v4716_v29 = vadd.f32 %v3848_v26, %v6296_v52  ;;  %v3850_v28 = vpop.f32.mrb[158].mxu1 }
 0x836   :  { %v5326_v13 = vpop.eup %5325  ;;  %v4435_v1 = vmul.f32 -1.442695, %v4715_v61  ;;  %v4717_v5 = vadd.f32 %v3850_v28, %v6291_v27  ;;  %v3852_v0 = vpop.f32.mrb[159].mxu1 }
 0x837   :  { %v5328_v49 = vpop.eup %5327  ;;  %4067 = vst [vmem:[%s6436_s10 + $0xa0] sm:$0xff] %v5326_v13  ;;  %v4436_v46 = vmul.f32 -1.442695, %v4716_v29  ;;  %v4718_v45 = vadd.f32 %v3852_v0, %v6296_v52 }
 0x838   :  { %v5330_v2 = vpop.eup %5329  ;;  %4068 = vst [vmem:[%s6436_s10 + $0xa8] sm:$0xff] %v5328_v49  ;;  %5341 = vpow2.f32 %v4435_v1  ;;  %v4437_v39 = vmul.f32 -1.442695, %v4717_v5 }
 0x839   :  { %v5332_v41 = vpop.eup %5331  ;;  %4069 = vst [vmem:[%s6436_s10 + $0xb0] sm:$0xff] %v5330_v2  ;;  %5343 = vpow2.f32 %v4436_v46  ;;  %v4438_v4 = vmul.f32 -1.442695, %v4718_v45 }
 0x83a   :  { %4070 = vst [vmem:[%s6436_s10 + $0xb8] sm:$0xff] %v5332_v41  ;;  %v5334_v6 = vpop.eup %5333  ;;  %5345 = vpow2.f32 %v4437_v39 }
 0x83b   :  { %v5336_v48 = vpop.eup %5335  ;;  %v3975_v56 = vadd.f32 1.0, %v5334_v6  ;;  %5347 = vpow2.f32 %v4438_v4 }
 0x83c   :  { %v5338_v15 = vpop.eup %5337  ;;  %v3976_v54 = vadd.f32 1.0, %v5336_v48 }
 0x83d   :  { %v5340_v27 = vpop.eup %5339  ;;  %5349 = vrcp.f32 %v3975_v56  ;;  %v3977_v59 = vadd.f32 1.0, %v5338_v15 }
 0x83e   :  { %5351 = vrcp.f32 %v3976_v54  ;;  %v3978_v60 = vadd.f32 1.0, %v5340_v27 }
 0x83f   :  { %5353 = vrcp.f32 %v3977_v59 }
 0x840   :  { %5355 = vrcp.f32 %v3978_v60 }
 0x842   :  { %v5342_v62 = vpop.eup %5341 }
 0x843   :  { %v5344_v52 = vpop.eup %5343  ;;  %v3979_v51 = vadd.f32 1.0, %v5342_v62 }
 0x844   :  { %v5346_v38 = vpop.eup %5345  ;;  %v3980_v21 = vadd.f32 1.0, %v5344_v52 }
 0x845   :  { %v5348_v37 = vpop.eup %5347  ;;  %5357 = vrcp.f32 %v3979_v51  ;;  %v3981_v42 = vadd.f32 1.0, %v5346_v38 }
 0x846   :  { %5359 = vrcp.f32 %v3980_v21  ;;  %v3982_v12 = vadd.f32 1.0, %v5348_v37 }
 0x847   :  { %v5350_v63 = vpop.eup %5349  ;;  %5361 = vrcp.f32 %v3981_v42 }
 0x848   :  { %v5352_v3 = vpop.eup %5351  ;;  %4071 = vst [vmem:[%s6436_s10 + $0xc0] sm:$0xff] %v5350_v63  ;;  %5363 = vrcp.f32 %v3982_v12 }
 0x849   :  { %v5354_v8 = vpop.eup %5353  ;;  %4072 = vst [vmem:[%s6436_s10 + $0xc8] sm:$0xff] %v5352_v3 }
 0x84a   :  { %v5356_v44 = vpop.eup %5355  ;;  %4073 = vst [vmem:[%s6436_s10 + $0xd0] sm:$0xff] %v5354_v8 }
 0x84b   :  { %4074 = vst [vmem:[%s6436_s10 + $0xd8] sm:$0xff] %v5356_v44 }
 0x84f   :  { %v5358_v22 = vpop.eup %5357 }
 0x850   :  { %v5360_v34 = vpop.eup %5359  ;;  %4075 = vst [vmem:[%s6436_s10 + $0xe0] sm:$0xff] %v5358_v22 }
 0x851   :  { %v5362_v25 = vpop.eup %5361  ;;  %4076 = vst [vmem:[%s6436_s10 + $0xe8] sm:$0xff] %v5360_v34 }
 0x852   :  { %v5364_v36 = vpop.eup %5363  ;;  %4077 = vst [vmem:[%s6436_s10 + $0xf0] sm:$0xff] %v5362_v25 }
 0x853   :  { %4078 = vst [vmem:[%s6436_s10 + $0xf8] sm:$0xff] %v5364_v36 }
 0x854   :  { %4083 = vsyncpa [#allocation3], 1 }
 0x855   :  { %4084 = vsyncpa [#allocation5], 1 }
 0x856   :  { %4085 = vsyncpa [#allocation8], 1 }
 0x857   :  { %4086 = vsyncpa [#allocation11], 1 }

</bundles_post_ra>
